<compile_context>
chip_gen: v6e
topology: v6e:2x2x1
jax: 0.10.0
libtpu: 0.0.40
codegen_flags: <defaults>
</compile_context>

<pallas_src>
import functools

import jax
import jax.numpy as jnp
from jax.experimental import pallas as pl
from jax.experimental.pallas import tpu as pltpu

_BN_EPS = 1e-5
_VMEM_LIMIT = 32 * 1024 * 1024


def _ceil_to(x, m):
    return -(-x // m) * m


def _pick_tile(padded_dim, candidates):
    for c in candidates:
        if padded_dim % c == 0:
            return c
    return candidates[-1]


def _pick_tm(M):
    """M tile minimizing (padding + per-step overhead); prefers big tiles."""
    M8 = _ceil_to(max(M, 8), 8)
    best = None
    for tm in (512, 384, 256, 128, 64, 32, 16, 8):
        mp = _ceil_to(M8, tm)
        cost = mp + 32 * (mp // tm)        # ~0.35us/step modeled as 32 rows
        if best is None or cost < best[0]:
            best = (cost, tm, mp)
    return best[1], best[2]


def _pick_divisor(Mp, candidates=(512, 384, 256, 128, 64, 32, 16, 8)):
    for c in candidates:
        if Mp % c == 0:
            return c
    return 8


def _split_for_megacore(tm, gm, gn, Mp):
    """If the parallel grid is a single block, halve the M tile so both
    TensorCores on v7x get work (harmless single extra step on v5e/v6e)."""
    if gm * gn == 1 and Mp >= 16:
        half = Mp // 2
        tm = half if half % 8 == 0 else 8
        gm = Mp // tm
    return tm, gm


# ---------------------------- Pallas kernels ----------------------------

def _mm_stats_kernel(a_ref, b_ref, o_ref, sum_ref, ssq_ref, *acc):
    """Matmul (bf16 in, f32 MXU acc), bf16 output, per-tile column sum /
    sum-of-squares side outputs for BatchNorm batch statistics."""

    def epilogue(acc_val):
        cs = jnp.sum(acc_val, axis=0, keepdims=True)           # (1, tn)
        cq = jnp.sum(acc_val * acc_val, axis=0, keepdims=True)  # (1, tn)
        # Write the same row 8 times (keeps the stats block (8, tn)-aligned);
        # the wrapper divides the reduced sum by 8.
        sum_ref[...] = jnp.broadcast_to(cs, sum_ref.shape)
        ssq_ref[...] = jnp.broadcast_to(cq, ssq_ref.shape)
        o_ref[...] = acc_val.astype(o_ref.dtype)

    if acc:                                   # K-tiled reduction path
        acc_ref = acc[0]
        k = pl.program_id(2)

        @pl.when(k == 0)
        def _():
            acc_ref[...] = jnp.zeros_like(acc_ref)

        acc_ref[...] += jnp.dot(a_ref[...], b_ref[...],
                                preferred_element_type=jnp.float32)

        @pl.when(k == pl.num_programs(2) - 1)
        def _():
            epilogue(acc_ref[...])
    else:                                     # single-K: no scratch round trip
        epilogue(jnp.dot(a_ref[...], b_ref[...],
                         preferred_element_type=jnp.float32))


def _mm_bias_act_kernel(a_ref, b_ref, t_ref, o_ref, *acc, act):
    """Matmul + per-channel bias + activation, bf16 output, no stats."""

    def epilogue(acc_val):
        y = acc_val + t_ref[...]
        if act == "relu":
            y = jnp.maximum(y, 0.0)
        elif act == "tanh":
            y = jnp.tanh(y)
        o_ref[...] = y.astype(o_ref.dtype)

    if acc:
        acc_ref = acc[0]
        k = pl.program_id(2)

        @pl.when(k == 0)
        def _():
            acc_ref[...] = jnp.zeros_like(acc_ref)

        acc_ref[...] += jnp.dot(a_ref[...], b_ref[...],
                                preferred_element_type=jnp.float32)

        @pl.when(k == pl.num_programs(2) - 1)
        def _():
            epilogue(acc_ref[...])
    else:
        epilogue(jnp.dot(a_ref[...], b_ref[...],
                         preferred_element_type=jnp.float32))


def _affine_act_kernel(x_ref, s_ref, t_ref, o_ref, *, act):
    y = x_ref[...].astype(jnp.float32) * s_ref[...] + t_ref[...]
    if act == "relu":
        y = jnp.maximum(y, 0.0)
    elif act == "tanh":
        y = jnp.tanh(y)
    o_ref[...] = y.astype(o_ref.dtype)


# ---------------------------- kernel wrappers ----------------------------

def _matmul_layout(patches, w_mat):
    M, K = patches.shape
    _, Cout = w_mat.shape
    tm, Mp = _pick_tm(M)
    Kp = _ceil_to(max(K, 128), 128)
    tk = _pick_tile(Kp, (512, 256, 128))          # 256-multiples first (v6e MXU)
    Np = _ceil_to(max(Cout, 128), 128)
    tn = _pick_tile(Np, (512, 256, 128))
    gm, gn, gk = Mp // tm, Np // tn, Kp // tk
    tm, gm = _split_for_megacore(tm, gm, gn, Mp)

    a = patches if patches.dtype == jnp.bfloat16 else patches.astype(jnp.bfloat16)
    if (Mp - M) or (Kp - K):
        a = jnp.pad(a, ((0, Mp - M), (0, Kp - K)))
    b = jnp.pad(w_mat.astype(jnp.bfloat16), ((0, Kp - K), (0, Np - Cout)))
    return a, b, dict(M=M, Cout=Cout, Mp=Mp, Np=Np, Kp=Kp,
                      tm=tm, tn=tn, tk=tk, gm=gm, gn=gn, gk=gk)


def conv_matmul_stats(patches, w_mat):
    """(M,K)@(K,Cout) -> padded bf16 slab + per-channel f32 sum / sum-of-squares
    of the pre-affine accumulator (padded rows are zero -> contribute nothing)."""
    a, b, L = _matmul_layout(patches, w_mat)
    tm, tn, tk = L["tm"], L["tn"], L["tk"]
    gm, gn, gk = L["gm"], L["gn"], L["gk"]
    Mp, Np = L["Mp"], L["Np"]
    multi_k = gk > 1

    if multi_k:
        grid = (gm, gn, gk)
        in_specs = [pl.BlockSpec((tm, tk), lambda i, j, k: (i, k)),
                    pl.BlockSpec((tk, tn), lambda i, j, k: (k, j))]
        out_specs = (pl.BlockSpec((tm, tn), lambda i, j, k: (i, j)),
                     pl.BlockSpec((8, tn), lambda i, j, k: (i, j)),
                     pl.BlockSpec((8, tn), lambda i, j, k: (i, j)))
        scratch = [pltpu.VMEM((tm, tn), jnp.float32)]
        dims = ("parallel", "parallel", "arbitrary")
    else:
        grid = (gm, gn)
        in_specs = [pl.BlockSpec((tm, tk), lambda i, j: (i, 0)),
                    pl.BlockSpec((tk, tn), lambda i, j: (0, j))]
        out_specs = (pl.BlockSpec((tm, tn), lambda i, j: (i, j)),
                     pl.BlockSpec((8, tn), lambda i, j: (i, j)),
                     pl.BlockSpec((8, tn), lambda i, j: (i, j)))
        scratch = []
        dims = ("parallel", "parallel")

    out, psum, pssq = pl.pallas_call(
        _mm_stats_kernel,
        out_shape=(jax.ShapeDtypeStruct((Mp, Np), jnp.bfloat16),
                   jax.ShapeDtypeStruct((gm * 8, Np), jnp.float32),
                   jax.ShapeDtypeStruct((gm * 8, Np), jnp.float32)),
        grid=grid,
        in_specs=in_specs,
        out_specs=out_specs,
        scratch_shapes=scratch,
        compiler_params=pltpu.CompilerParams(
            dimension_semantics=dims, vmem_limit_bytes=_VMEM_LIMIT),
    )(a, b)

    Cout = L["Cout"]
    col_sum = jnp.sum(psum[:, :Cout], axis=0) / 8.0
    col_ssq = jnp.sum(pssq[:, :Cout], axis=0) / 8.0
    return out, col_sum, col_ssq, L["M"], Cout


def conv_matmul_bias_act(patches, w_mat, bias, act):
    """(M,K)@(K,Cout) + bias + activation; padded bf16 slab out; no stats."""
    a, b, L = _matmul_layout(patches, w_mat)
    tm, tn, tk = L["tm"], L["tn"], L["tk"]
    gm, gn, gk = L["gm"], L["gn"], L["gk"]
    Mp, Np, Cout = L["Mp"], L["Np"], L["Cout"]
    t = jnp.pad(bias.astype(jnp.float32), (0, Np - Cout)).reshape(1, Np)
    multi_k = gk > 1

    if multi_k:
        grid = (gm, gn, gk)
        in_specs = [pl.BlockSpec((tm, tk), lambda i, j, k: (i, k)),
                    pl.BlockSpec((tk, tn), lambda i, j, k: (k, j)),
                    pl.BlockSpec((1, tn), lambda i, j, k: (0, j))]
        out_specs = pl.BlockSpec((tm, tn), lambda i, j, k: (i, j))
        scratch = [pltpu.VMEM((tm, tn), jnp.float32)]
        dims = ("parallel", "parallel", "arbitrary")
    else:
        grid = (gm, gn)
        in_specs = [pl.BlockSpec((tm, tk), lambda i, j: (i, 0)),
                    pl.BlockSpec((tk, tn), lambda i, j: (0, j)),
                    pl.BlockSpec((1, tn), lambda i, j: (0, j))]
        out_specs = pl.BlockSpec((tm, tn), lambda i, j: (i, j))
        scratch = []
        dims = ("parallel", "parallel")

    out = pl.pallas_call(
        functools.partial(_mm_bias_act_kernel, act=act),
        out_shape=jax.ShapeDtypeStruct((Mp, Np), jnp.bfloat16),
        grid=grid,
        in_specs=in_specs,
        out_specs=out_specs,
        scratch_shapes=scratch,
        compiler_params=pltpu.CompilerParams(
            dimension_semantics=dims, vmem_limit_bytes=_VMEM_LIMIT),
    )(a, b, t)
    return out, L["M"], Cout


def pallas_affine_act_padded(x_pad, scale, shift, act):
    """y = act(x * scale + shift) on the padded (Mp, Cp) bf16 slab, per-channel
    scale/shift; returns the padded bf16 slab (caller slices once)."""
    Mp, Cp = x_pad.shape
    C = scale.shape[0]
    s_p = jnp.pad(scale.astype(jnp.float32), (0, Cp - C),
                  constant_values=1.0).reshape(1, Cp)
    t_p = jnp.pad(shift.astype(jnp.float32), (0, Cp - C)).reshape(1, Cp)

    tm = _pick_divisor(Mp)
    gm = Mp // tm
    tm, gm = _split_for_megacore(tm, gm, 1, Mp)

    out = pl.pallas_call(
        functools.partial(_affine_act_kernel, act=act),
        out_shape=jax.ShapeDtypeStruct((Mp, Cp), jnp.bfloat16),
        grid=(gm,),
        in_specs=[pl.BlockSpec((tm, Cp), lambda i: (i, 0)),
                  pl.BlockSpec((1, Cp), lambda i: (0, 0)),
                  pl.BlockSpec((1, Cp), lambda i: (0, 0))],
        out_specs=pl.BlockSpec((tm, Cp), lambda i: (i, 0)),
        compiler_params=pltpu.CompilerParams(
            dimension_semantics=("parallel",),
            vmem_limit_bytes=_VMEM_LIMIT),
    )(x_pad, s_p, t_p)
    return out


# ---------------------------- conv building blocks (NHWC, bf16) ----------------------------

def _im2col_nhwc(x, kh, kw, stride):
    # TODO(synk): 7x7 convs duplicate the input 49x here; a direct-conv kernel
    # with halo-row DMA would remove this slab entirely.
    N, H, W, C = x.shape
    Ho = (H - kh) // stride + 1
    Wo = (W - kw) // stride + 1
    cols = []
    for i in range(kh):
        for j in range(kw):
            cols.append(x[:, i:i + stride * (Ho - 1) + 1:stride,
                          j:j + stride * (Wo - 1) + 1:stride, :])
    patches = jnp.concatenate(cols, axis=-1)               # (N, Ho, Wo, kh*kw*C)
    return patches.reshape(N * Ho * Wo, kh * kw * C), (N, Ho, Wo)


def _bn_scale_shift(col_sum, col_ssq, count, gamma, beta):
    # nn.BatchNorm2d training-mode forward: biased batch variance over (N,H,W).
    mean = col_sum / count
    var = jnp.maximum(col_ssq / count - mean * mean, 0.0)
    scale = gamma * jax.lax.rsqrt(var + _BN_EPS)
    # conv bias is a per-channel constant -> cancelled by (x - mean)
    shift = beta - mean * scale
    return scale, shift


def conv_bn_act(x, p, *, stride=1, pad=0, pad_mode="constant",
                use_bn=True, act="relu"):
    """x NHWC (any float dtype) -> Conv2d (+ BN, batch stats) + activation.
    Output is NHWC bf16."""
    w = p["w"]                                             # (Cout, Cin, kh, kw)
    Cout, Cin, kh, kw = w.shape
    x = x.astype(jnp.bfloat16)                             # bf16 before im2col
    if pad > 0:
        x = jnp.pad(x, ((0, 0), (pad, pad), (pad, pad), (0, 0)), mode=pad_mode)
    patches, (N, Ho, Wo) = _im2col_nhwc(x, kh, kw, stride)
    w_mat = w.transpose(2, 3, 1, 0).reshape(kh * kw * Cin, Cout)
    if use_bn:
        y_pad, csum, cssq, M, _ = conv_matmul_stats(patches, w_mat)
        scale, shift = _bn_scale_shift(csum, cssq, float(M), p["gamma"], p["beta"])
        y_pad = pallas_affine_act_padded(y_pad, scale, shift, act)
    else:
        y_pad, M, _ = conv_matmul_bias_act(patches, w_mat, p["b"], act)
    y = y_pad[:M, :Cout]                                   # single slice per layer
    return y.reshape(N, Ho, Wo, Cout)


def convT_bn_act(x, p, act="relu"):
    """ConvTranspose2d(k=3, stride=2, pad=1, out_pad=1) + BN + act, NHWC bf16.

    Stride-phase decomposition: output pixel (2m+a, 2n+b) only touches the
    2x2 input neighbourhood, so the whole layer is ONE matmul
    (M, 4*Cin) @ (4*Cin, 4*Cout) followed by a phase interleave."""
    wt = p["w"]                                            # (Cin, Cout, 3, 3)
    Cin, Cout = wt.shape[0], wt.shape[1]
    N, H, W, C = x.shape
    assert C == Cin
    x = x.astype(jnp.bfloat16)

    xp = jnp.pad(x, ((0, 0), (0, 1), (0, 1), (0, 0)))
    p00 = xp[:, :H, :W, :]
    p01 = xp[:, :H, 1:W + 1, :]
    p10 = xp[:, 1:H + 1, :W, :]
    p11 = xp[:, 1:H + 1, 1:W + 1, :]
    patches = jnp.concatenate([p00, p01, p10, p11], axis=-1).reshape(N * H * W, 4 * Cin)

    wk = wt.astype(jnp.float32)

    def blk(ki, kj):
        return wk[:, :, ki, kj]                            # (Cin, Cout)

    Z = jnp.zeros((Cin, Cout), jnp.float32)
    # rows: taps [x00, x01, x10, x11]; cols: output phases [(0,0),(0,1),(1,0),(1,1)]
    w_mat = jnp.concatenate([
        jnp.concatenate([blk(1, 1), blk(1, 2), blk(2, 1), blk(2, 2)], axis=1),
        jnp.concatenate([Z,        blk(1, 0), Z,         blk(2, 0)], axis=1),
        jnp.concatenate([Z,        Z,         blk(0, 1), blk(0, 2)], axis=1),
        jnp.concatenate([Z,        Z,         Z,         blk(0, 0)], axis=1),
    ], axis=0)                                             # (4*Cin, 4*Cout)

    y_pad, csum, cssq, M, _ = conv_matmul_stats(patches, w_mat)
    # BN stats over the full (2H, 2W) output = all 4 phases together.
    csum4 = csum.reshape(4, Cout).sum(axis=0)
    cssq4 = cssq.reshape(4, Cout).sum(axis=0)
    scale, shift = _bn_scale_shift(csum4, cssq4, float(4 * M), p["gamma"], p["beta"])
    y_pad = pallas_affine_act_padded(y_pad, jnp.tile(scale, 4), jnp.tile(shift, 4), act)
    y = y_pad[:M, :4 * Cout]

    # TODO(synk): fold this phase interleave into the affine kernel's output
    # index map (strided stores) instead of an XLA reshape+transpose.
    y = y.reshape(N, H, W, 2, 2, Cout).transpose(0, 1, 3, 2, 4, 5)
    return y.reshape(N, 2 * H, 2 * W, Cout)


def resnet_block(x, p):
    h = conv_bn_act(x, p["c1"], stride=1, pad=1, pad_mode="reflect",
                    use_bn=True, act="relu")
    h = conv_bn_act(h, p["c2"], stride=1, pad=1, pad_mode="reflect",
                    use_bn=True, act="none")
    return x + h


def avg_pool_3x3_s2(x):
    # nn.AvgPool2d(3, stride=2, padding=1, count_include_pad=False), NHWC.
    # TODO(synk): pooling kept in plain JAX glue (tiny data-movement op).
    N, H, W, C = x.shape
    xp = jnp.pad(x, ((0, 0), (1, 1), (1, 1), (0, 0)))
    cnt = jnp.pad(jnp.ones((1, H, W, 1), x.dtype), ((0, 0), (1, 1), (1, 1), (0, 0)))
    Ho = (H + 2 - 3) // 2 + 1
    Wo = (W + 2 - 3) // 2 + 1
    s = jnp.zeros((N, Ho, Wo, C), x.dtype)
    c = jnp.zeros((1, Ho, Wo, 1), x.dtype)
    for i in range(3):
        for j in range(3):
            s = s + xp[:, i:i + 2 * (Ho - 1) + 1:2, j:j + 2 * (Wo - 1) + 1:2, :]
            c = c + cnt[:, i:i + 2 * (Ho - 1) + 1:2, j:j + 2 * (Wo - 1) + 1:2, :]
    return s / c


# ---------------------------- parameters ----------------------------

def _conv_params(key, cin, cout, k):
    k1, k2 = jax.random.split(key)
    return {"w": 0.05 * jax.random.normal(k1, (cout, cin, k, k), jnp.float32),
            "b": 0.05 * jax.random.normal(k2, (cout,), jnp.float32),
            "gamma": jnp.ones((cout,), jnp.float32),
            "beta": jnp.zeros((cout,), jnp.float32)}


def _convT_params(key, cin, cout, k):
    k1, k2 = jax.random.split(key)
    return {"w": 0.05 * jax.random.normal(k1, (cin, cout, k, k), jnp.float32),
            "b": 0.05 * jax.random.normal(k2, (cout,), jnp.float32),
            "gamma": jnp.ones((cout,), jnp.float32),
            "beta": jnp.zeros((cout,), jnp.float32)}


def init_params(key, input_nc=3, output_nc=3, ngf=4, n_downsample_global=1,
                n_blocks_global=1, n_local_enhancers=1, n_blocks_local=1):
    keys = iter(jax.random.split(key, 128))
    p = {"n_local_enhancers": n_local_enhancers}

    # Global generator (its final ReflectionPad/Conv7/Tanh are dropped by LocalEnhancer)
    ngf_g = ngf * 2 ** n_local_enhancers
    g = {"head": _conv_params(next(keys), input_nc, ngf_g, 7),
         "down": [], "blocks": [], "up": []}
    for i in range(n_downsample_global):
        mult = 2 ** i
        g["down"].append(_conv_params(next(keys), ngf_g * mult, ngf_g * mult * 2, 3))
    mult = 2 ** n_downsample_global
    for _ in range(n_blocks_global):
        g["blocks"].append({"c1": _conv_params(next(keys), ngf_g * mult, ngf_g * mult, 3),
                            "c2": _conv_params(next(keys), ngf_g * mult, ngf_g * mult, 3)})
    for i in range(n_downsample_global):
        mult = 2 ** (n_downsample_global - i)
        g["up"].append(_convT_params(next(keys), ngf_g * mult, ngf_g * mult // 2, 3))
    p["global"] = g

    # Local enhancers
    p["local"] = []
    for n in range(1, n_local_enhancers + 1):
        ngf_l = ngf * 2 ** (n_local_enhancers - n)
        loc = {"down_c7": _conv_params(next(keys), input_nc, ngf_l, 7),
               "down_c3": _conv_params(next(keys), ngf_l, ngf_l * 2, 3),
               "blocks": [{"c1": _conv_params(next(keys), ngf_l * 2, ngf_l * 2, 3),
                           "c2": _conv_params(next(keys), ngf_l * 2, ngf_l * 2, 3)}
                          for _ in range(n_blocks_local)],
               "up": _convT_params(next(keys), ngf_l * 2, ngf_l, 3),
               "final": _conv_params(next(keys), ngf, output_nc, 7)}
        p["local"].append(loc)
    return p


# ---------------------------- forward ----------------------------

def local_enhancer_forward(params, x_nchw):
    n_le = params["n_local_enhancers"]
    x = jnp.transpose(x_nchw, (0, 2, 3, 1))      # NCHW -> NHWC, once

    # input pyramid
    pyr = [x]
    for _ in range(n_le):
        pyr.append(avg_pool_3x3_s2(pyr[-1]))

    # truncated GlobalGenerator on the coarsest input
    g = params["global"]
    h = conv_bn_act(pyr[-1], g["head"], stride=1, pad=3, pad_mode="reflect",
                    use_bn=True, act="relu")
    for dp in g["down"]:
        h = conv_bn_act(h, dp, stride=2, pad=1, pad_mode="constant",
                        use_bn=True, act="relu")
    for bp in g["blocks"]:
        h = resnet_block(h, bp)
    for up in g["up"]:
        h = convT_bn_act(h, up, act="relu")
    output_prev = h

    # local enhancers (fine to coarse index)
    for n in range(1, n_le + 1):
        loc = params["local"][n - 1]
        xi = pyr[n_le - n]
        d = conv_bn_act(xi, loc["down_c7"], stride=1, pad=3, pad_mode="reflect",
                        use_bn=True, act="relu")
        d = conv_bn_act(d, loc["down_c3"], stride=2, pad=1, pad_mode="constant",
                        use_bn=True, act="relu")
        h = d + output_prev
        for bp in loc["blocks"]:
            h = resnet_block(h, bp)
        h = convT_bn_act(h, loc["up"], act="relu")
        if n == n_le:
            h = conv_bn_act(h, loc["final"], stride=1, pad=3, pad_mode="reflect",
                            use_bn=False, act="tanh")
        output_prev = h
    out = jnp.transpose(output_prev, (0, 3, 1, 2))          # NHWC -> NCHW
    return out.astype(jnp.float32)


if __name__ == "__main__":
    key = jax.random.PRNGKey(0)
    kp, kx = jax.random.split(key)
    params = init_params(kp, input_nc=3, output_nc=3, ngf=4,
                         n_downsample_global=1, n_blocks_global=1,
                         n_local_enhancers=1, n_blocks_local=1)
    x = jax.random.normal(kx, (2, 3, 16, 16), jnp.float32)   # NCHW

    fwd = jax.jit(lambda inp: local_enhancer_forward(params, inp))
    out = jax.block_until_ready(fwd(x))
    assert out.shape == (2, 3, 16, 16), out.shape
    assert bool(jnp.all(jnp.isfinite(out)))
    print("KERNEL_OK")
</pallas_src>

<mosaic_0001>
module attributes {stable_mosaic.version = 11 : i64} {
  func.func @_mm_stats_kernel(%arg0: i32, %arg1: i32, %arg2: memref<64x256xbf16, #tpu.memory_space<vmem>>, %arg3: memref<256x128xbf16, #tpu.memory_space<vmem>>, %arg4: memref<64x128xbf16, #tpu.memory_space<vmem>>, %arg5: memref<8x128xf32, #tpu.memory_space<vmem>>, %arg6: memref<8x128xf32, #tpu.memory_space<vmem>>) attributes {dimension_semantics = [#tpu.dimension_semantics<parallel>, #tpu.dimension_semantics<parallel>], iteration_bounds = array<i64: 2, 1>, scalar_prefetch = 0 : i64, scratch_operands = 0 : i64, tpu.core_type = #tpu.core_type<tc>, window_params = [{transform_indices = @transform_0, window_bounds = array<i64: 64, 256>}, {transform_indices = @transform_1, window_bounds = array<i64: 256, 128>}, {transform_indices = @transform_2, window_bounds = array<i64: 64, 128>}, {transform_indices = @transform_3, window_bounds = array<i64: 8, 128>}, {transform_indices = @transform_4, window_bounds = array<i64: 8, 128>}]} {
    %c0 = arith.constant 0 : index
    %c0_0 = arith.constant 0 : index
    %0 = vector.load %arg2[%c0, %c0_0] : memref<64x256xbf16, #tpu.memory_space<vmem>>, vector<64x256xbf16>
    %c0_1 = arith.constant 0 : index
    %c0_2 = arith.constant 0 : index
    %1 = vector.load %arg3[%c0_1, %c0_2] : memref<256x128xbf16, #tpu.memory_space<vmem>>, vector<256x128xbf16>
    %cst = arith.constant dense<0.000000e+00> : vector<64x128xf32>
    %2 = tpu.matmul %0, %1, %cst {dimension_numbers = #tpu.dot_dimension_numbers<[1], [0], [0], [1], [0, 0, 1, 1], [], []>} : vector<64x256xbf16>, vector<256x128xbf16>, vector<64x128xf32> -> vector<64x128xf32>
    %cst_3 = arith.constant dense<0.000000e+00> : vector<128xf32>
    %3 = vector.multi_reduction <add>, %2, %cst_3 [0] : vector<64x128xf32> to vector<128xf32>
    %4 = vector.shape_cast %3 : vector<128xf32> to vector<1x128xf32>
    %5 = arith.mulf %2, %2 : vector<64x128xf32>
    %cst_4 = arith.constant dense<0.000000e+00> : vector<128xf32>
    %6 = vector.multi_reduction <add>, %5, %cst_4 [0] : vector<64x128xf32> to vector<128xf32>
    %7 = vector.shape_cast %6 : vector<128xf32> to vector<1x128xf32>
    %8 = vector.shape_cast %4 : vector<1x128xf32> to vector<1x128xf32>
    %9 = vector.broadcast %8 : vector<1x128xf32> to vector<8x128xf32>
    %c0_5 = arith.constant 0 : index
    %c0_6 = arith.constant 0 : index
    %10 = vector.load %arg5[%c0_5, %c0_6] : memref<8x128xf32, #tpu.memory_space<vmem>>, vector<8x128xf32>
    tpu.vector_store %arg5[%c0_5, %c0_6], %9 {strides = array<i32>} : memref<8x128xf32, #tpu.memory_space<vmem>>, vector<8x128xf32>,
    %11 = vector.shape_cast %7 : vector<1x128xf32> to vector<1x128xf32>
    %12 = vector.broadcast %11 : vector<1x128xf32> to vector<8x128xf32>
    %c0_7 = arith.constant 0 : index
    %c0_8 = arith.constant 0 : index
    %13 = vector.load %arg6[%c0_7, %c0_8] : memref<8x128xf32, #tpu.memory_space<vmem>>, vector<8x128xf32>
    tpu.vector_store %arg6[%c0_7, %c0_8], %12 {strides = array<i32>} : memref<8x128xf32, #tpu.memory_space<vmem>>, vector<8x128xf32>,
    %14 = arith.truncf %2 : vector<64x128xf32> to vector<64x128xbf16>
    %c0_9 = arith.constant 0 : index
    %c0_10 = arith.constant 0 : index
    %15 = vector.load %arg4[%c0_9, %c0_10] : memref<64x128xbf16, #tpu.memory_space<vmem>>, vector<64x128xbf16>
    tpu.vector_store %arg4[%c0_9, %c0_10], %14 {strides = array<i32>} : memref<64x128xbf16, #tpu.memory_space<vmem>>, vector<64x128xbf16>,
    return
  }
  func.func @transform_0(%arg0: i32, %arg1: i32) -> (i32, i32) {
    %c0_i32 = arith.constant 0 : i32
    %c0_i32_0 = arith.constant 0 : i32
    return %arg0, %c0_i32 : i32, i32
  }
  func.func @transform_1(%arg0: i32, %arg1: i32) -> (i32, i32) {
    %c0_i32 = arith.constant 0 : i32
    %c0_i32_0 = arith.constant 0 : i32
    return %c0_i32, %arg1 : i32, i32
  }
  func.func @transform_2(%arg0: i32, %arg1: i32) -> (i32, i32) {
    %c0_i32 = arith.constant 0 : i32
    return %arg0, %arg1 : i32, i32
  }
  func.func @transform_3(%arg0: i32, %arg1: i32) -> (i32, i32) {
    %c0_i32 = arith.constant 0 : i32
    return %arg0, %arg1 : i32, i32
  }
  func.func @transform_4(%arg0: i32, %arg1: i32) -> (i32, i32) {
    %c0_i32 = arith.constant 0 : i32
    return %arg0, %arg1 : i32, i32
  }
}

module attributes {stable_mosaic.version = 11 : i64} {
  func.func @_affine_act_kernel(%arg0: i32, %arg1: memref<64x128xbf16, #tpu.memory_space<vmem>>, %arg2: memref<1x128xf32, #tpu.memory_space<vmem>>, %arg3: memref<1x128xf32, #tpu.memory_space<vmem>>, %arg4: memref<64x128xbf16, #tpu.memory_space<vmem>>) attributes {dimension_semantics = [#tpu.dimension_semantics<parallel>], iteration_bounds = array<i64: 2>, scalar_prefetch = 0 : i64, scratch_operands = 0 : i64, tpu.core_type = #tpu.core_type<tc>, window_params = [{transform_indices = @transform_0, window_bounds = array<i64: 64, 128>}, {pipeline_mode = #tpu.pipeline_mode<synchronous>, transform_indices = @transform_1, window_bounds = array<i64: 1, 128>}, {pipeline_mode = #tpu.pipeline_mode<synchronous>, transform_indices = @transform_2, window_bounds = array<i64: 1, 128>}, {transform_indices = @transform_3, window_bounds = array<i64: 64, 128>}]} {
    %c0 = arith.constant 0 : index
    %c0_0 = arith.constant 0 : index
    %0 = vector.load %arg1[%c0, %c0_0] : memref<64x128xbf16, #tpu.memory_space<vmem>>, vector<64x128xbf16>
    %1 = arith.extf %0 : vector<64x128xbf16> to vector<64x128xf32>
    %c0_1 = arith.constant 0 : index
    %c0_2 = arith.constant 0 : index
    %2 = vector.load %arg2[%c0_1, %c0_2] : memref<1x128xf32, #tpu.memory_space<vmem>>, vector<1x128xf32>
    %3 = vector.broadcast %2 : vector<1x128xf32> to vector<64x128xf32>
    %4 = arith.mulf %1, %3 : vector<64x128xf32>
    %c0_3 = arith.constant 0 : index
    %c0_4 = arith.constant 0 : index
    %5 = vector.load %arg3[%c0_3, %c0_4] : memref<1x128xf32, #tpu.memory_space<vmem>>, vector<1x128xf32>
    %6 = vector.broadcast %5 : vector<1x128xf32> to vector<64x128xf32>
    %7 = arith.addf %4, %6 : vector<64x128xf32>
    %cst = arith.constant 0.000000e+00 : f32
    %8 = vector.broadcast %cst : f32 to vector<64x128xf32>
    %9 = arith.maximumf %7, %8 : vector<64x128xf32>
    %10 = arith.truncf %9 : vector<64x128xf32> to vector<64x128xbf16>
    %c0_5 = arith.constant 0 : index
    %c0_6 = arith.constant 0 : index
    %11 = vector.load %arg4[%c0_5, %c0_6] : memref<64x128xbf16, #tpu.memory_space<vmem>>, vector<64x128xbf16>
    tpu.vector_store %arg4[%c0_5, %c0_6], %10 {strides = array<i32>} : memref<64x128xbf16, #tpu.memory_space<vmem>>, vector<64x128xbf16>,
    return
  }
  func.func @transform_0(%arg0: i32) -> (i32, i32) {
    %c0_i32 = arith.constant 0 : i32
    %c0_i32_0 = arith.constant 0 : i32
    return %arg0, %c0_i32 : i32, i32
  }
  func.func @transform_1(%arg0: i32) -> (i32, i32) {
    %c0_i32 = arith.constant 0 : i32
    %c0_i32_0 = arith.constant 0 : i32
    %c0_i32_1 = arith.constant 0 : i32
    return %c0_i32, %c0_i32_0 : i32, i32
  }
  func.func @transform_2(%arg0: i32) -> (i32, i32) {
    %c0_i32 = arith.constant 0 : i32
    %c0_i32_0 = arith.constant 0 : i32
    %c0_i32_1 = arith.constant 0 : i32
    return %c0_i32, %c0_i32_0 : i32, i32
  }
  func.func @transform_3(%arg0: i32) -> (i32, i32) {
    %c0_i32 = arith.constant 0 : i32
    %c0_i32_0 = arith.constant 0 : i32
    return %arg0, %c0_i32 : i32, i32
  }
}

module attributes {stable_mosaic.version = 11 : i64} {
  func.func @_mm_stats_kernel(%arg0: i32, %arg1: i32, %arg2: memref<16x128xbf16, #tpu.memory_space<vmem>>, %arg3: memref<128x128xbf16, #tpu.memory_space<vmem>>, %arg4: memref<16x128xbf16, #tpu.memory_space<vmem>>, %arg5: memref<8x128xf32, #tpu.memory_space<vmem>>, %arg6: memref<8x128xf32, #tpu.memory_space<vmem>>) attributes {dimension_semantics = [#tpu.dimension_semantics<parallel>, #tpu.dimension_semantics<parallel>], iteration_bounds = array<i64: 2, 1>, scalar_prefetch = 0 : i64, scratch_operands = 0 : i64, tpu.core_type = #tpu.core_type<tc>, window_params = [{transform_indices = @transform_0, window_bounds = array<i64: 16, 128>}, {transform_indices = @transform_1, window_bounds = array<i64: 128, 128>}, {transform_indices = @transform_2, window_bounds = array<i64: 16, 128>}, {transform_indices = @transform_3, window_bounds = array<i64: 8, 128>}, {transform_indices = @transform_4, window_bounds = array<i64: 8, 128>}]} {
    %c0 = arith.constant 0 : index
    %c0_0 = arith.constant 0 : index
    %0 = vector.load %arg2[%c0, %c0_0] : memref<16x128xbf16, #tpu.memory_space<vmem>>, vector<16x128xbf16>
    %c0_1 = arith.constant 0 : index
    %c0_2 = arith.constant 0 : index
    %1 = vector.load %arg3[%c0_1, %c0_2] : memref<128x128xbf16, #tpu.memory_space<vmem>>, vector<128x128xbf16>
    %cst = arith.constant dense<0.000000e+00> : vector<16x128xf32>
    %2 = tpu.matmul %0, %1, %cst {dimension_numbers = #tpu.dot_dimension_numbers<[1], [0], [0], [1], [0, 0, 1, 1], [], []>} : vector<16x128xbf16>, vector<128x128xbf16>, vector<16x128xf32> -> vector<16x128xf32>
    %cst_3 = arith.constant dense<0.000000e+00> : vector<128xf32>
    %3 = vector.multi_reduction <add>, %2, %cst_3 [0] : vector<16x128xf32> to vector<128xf32>
    %4 = vector.shape_cast %3 : vector<128xf32> to vector<1x128xf32>
    %5 = arith.mulf %2, %2 : vector<16x128xf32>
    %cst_4 = arith.constant dense<0.000000e+00> : vector<128xf32>
    %6 = vector.multi_reduction <add>, %5, %cst_4 [0] : vector<16x128xf32> to vector<128xf32>
    %7 = vector.shape_cast %6 : vector<128xf32> to vector<1x128xf32>
    %8 = vector.shape_cast %4 : vector<1x128xf32> to vector<1x128xf32>
    %9 = vector.broadcast %8 : vector<1x128xf32> to vector<8x128xf32>
    %c0_5 = arith.constant 0 : index
    %c0_6 = arith.constant 0 : index
    %10 = vector.load %arg5[%c0_5, %c0_6] : memref<8x128xf32, #tpu.memory_space<vmem>>, vector<8x128xf32>
    tpu.vector_store %arg5[%c0_5, %c0_6], %9 {strides = array<i32>} : memref<8x128xf32, #tpu.memory_space<vmem>>, vector<8x128xf32>,
    %11 = vector.shape_cast %7 : vector<1x128xf32> to vector<1x128xf32>
    %12 = vector.broadcast %11 : vector<1x128xf32> to vector<8x128xf32>
    %c0_7 = arith.constant 0 : index
    %c0_8 = arith.constant 0 : index
    %13 = vector.load %arg6[%c0_7, %c0_8] : memref<8x128xf32, #tpu.memory_space<vmem>>, vector<8x128xf32>
    tpu.vector_store %arg6[%c0_7, %c0_8], %12 {strides = array<i32>} : memref<8x128xf32, #tpu.memory_space<vmem>>, vector<8x128xf32>,
    %14 = arith.truncf %2 : vector<16x128xf32> to vector<16x128xbf16>
    %c0_9 = arith.constant 0 : index
    %c0_10 = arith.constant 0 : index
    %15 = vector.load %arg4[%c0_9, %c0_10] : memref<16x128xbf16, #tpu.memory_space<vmem>>, vector<16x128xbf16>
    tpu.vector_store %arg4[%c0_9, %c0_10], %14 {strides = array<i32>} : memref<16x128xbf16, #tpu.memory_space<vmem>>, vector<16x128xbf16>,
    return
  }
  func.func @transform_0(%arg0: i32, %arg1: i32) -> (i32, i32) {
    %c0_i32 = arith.constant 0 : i32
    %c0_i32_0 = arith.constant 0 : i32
    return %arg0, %c0_i32 : i32, i32
  }
  func.func @transform_1(%arg0: i32, %arg1: i32) -> (i32, i32) {
    %c0_i32 = arith.constant 0 : i32
    %c0_i32_0 = arith.constant 0 : i32
    return %c0_i32, %arg1 : i32, i32
  }
  func.func @transform_2(%arg0: i32, %arg1: i32) -> (i32, i32) {
    %c0_i32 = arith.constant 0 : i32
    return %arg0, %arg1 : i32, i32
  }
  func.func @transform_3(%arg0: i32, %arg1: i32) -> (i32, i32) {
    %c0_i32 = arith.constant 0 : i32
    return %arg0, %arg1 : i32, i32
  }
  func.func @transform_4(%arg0: i32, %arg1: i32) -> (i32, i32) {
    %c0_i32 = arith.constant 0 : i32
    return %arg0, %arg1 : i32, i32
  }
}

module attributes {stable_mosaic.version = 11 : i64} {
  func.func @_affine_act_kernel(%arg0: i32, %arg1: memref<16x128xbf16, #tpu.memory_space<vmem>>, %arg2: memref<1x128xf32, #tpu.memory_space<vmem>>, %arg3: memref<1x128xf32, #tpu.memory_space<vmem>>, %arg4: memref<16x128xbf16, #tpu.memory_space<vmem>>) attributes {dimension_semantics = [#tpu.dimension_semantics<parallel>], iteration_bounds = array<i64: 2>, scalar_prefetch = 0 : i64, scratch_operands = 0 : i64, tpu.core_type = #tpu.core_type<tc>, window_params = [{transform_indices = @transform_0, window_bounds = array<i64: 16, 128>}, {pipeline_mode = #tpu.pipeline_mode<synchronous>, transform_indices = @transform_1, window_bounds = array<i64: 1, 128>}, {pipeline_mode = #tpu.pipeline_mode<synchronous>, transform_indices = @transform_2, window_bounds = array<i64: 1, 128>}, {transform_indices = @transform_3, window_bounds = array<i64: 16, 128>}]} {
    %c0 = arith.constant 0 : index
    %c0_0 = arith.constant 0 : index
    %0 = vector.load %arg1[%c0, %c0_0] : memref<16x128xbf16, #tpu.memory_space<vmem>>, vector<16x128xbf16>
    %1 = arith.extf %0 : vector<16x128xbf16> to vector<16x128xf32>
    %c0_1 = arith.constant 0 : index
    %c0_2 = arith.constant 0 : index
    %2 = vector.load %arg2[%c0_1, %c0_2] : memref<1x128xf32, #tpu.memory_space<vmem>>, vector<1x128xf32>
    %3 = vector.broadcast %2 : vector<1x128xf32> to vector<16x128xf32>
    %4 = arith.mulf %1, %3 : vector<16x128xf32>
    %c0_3 = arith.constant 0 : index
    %c0_4 = arith.constant 0 : index
    %5 = vector.load %arg3[%c0_3, %c0_4] : memref<1x128xf32, #tpu.memory_space<vmem>>, vector<1x128xf32>
    %6 = vector.broadcast %5 : vector<1x128xf32> to vector<16x128xf32>
    %7 = arith.addf %4, %6 : vector<16x128xf32>
    %cst = arith.constant 0.000000e+00 : f32
    %8 = vector.broadcast %cst : f32 to vector<16x128xf32>
    %9 = arith.maximumf %7, %8 : vector<16x128xf32>
    %10 = arith.truncf %9 : vector<16x128xf32> to vector<16x128xbf16>
    %c0_5 = arith.constant 0 : index
    %c0_6 = arith.constant 0 : index
    %11 = vector.load %arg4[%c0_5, %c0_6] : memref<16x128xbf16, #tpu.memory_space<vmem>>, vector<16x128xbf16>
    tpu.vector_store %arg4[%c0_5, %c0_6], %10 {strides = array<i32>} : memref<16x128xbf16, #tpu.memory_space<vmem>>, vector<16x128xbf16>,
    return
  }
  func.func @transform_0(%arg0: i32) -> (i32, i32) {
    %c0_i32 = arith.constant 0 : i32
    %c0_i32_0 = arith.constant 0 : i32
    return %arg0, %c0_i32 : i32, i32
  }
  func.func @transform_1(%arg0: i32) -> (i32, i32) {
    %c0_i32 = arith.constant 0 : i32
    %c0_i32_0 = arith.constant 0 : i32
    %c0_i32_1 = arith.constant 0 : i32
    return %c0_i32, %c0_i32_0 : i32, i32
  }
  func.func @transform_2(%arg0: i32) -> (i32, i32) {
    %c0_i32 = arith.constant 0 : i32
    %c0_i32_0 = arith.constant 0 : i32
    %c0_i32_1 = arith.constant 0 : i32
    return %c0_i32, %c0_i32_0 : i32, i32
  }
  func.func @transform_3(%arg0: i32) -> (i32, i32) {
    %c0_i32 = arith.constant 0 : i32
    %c0_i32_0 = arith.constant 0 : i32
    return %arg0, %c0_i32 : i32, i32
  }
}

module attributes {stable_mosaic.version = 11 : i64} {
  func.func @_mm_stats_kernel(%arg0: i32, %arg1: i32, %arg2: memref<16x256xbf16, #tpu.memory_space<vmem>>, %arg3: memref<256x128xbf16, #tpu.memory_space<vmem>>, %arg4: memref<16x128xbf16, #tpu.memory_space<vmem>>, %arg5: memref<8x128xf32, #tpu.memory_space<vmem>>, %arg6: memref<8x128xf32, #tpu.memory_space<vmem>>) attributes {dimension_semantics = [#tpu.dimension_semantics<parallel>, #tpu.dimension_semantics<parallel>], iteration_bounds = array<i64: 2, 1>, scalar_prefetch = 0 : i64, scratch_operands = 0 : i64, tpu.core_type = #tpu.core_type<tc>, window_params = [{transform_indices = @transform_0, window_bounds = array<i64: 16, 256>}, {transform_indices = @transform_1, window_bounds = array<i64: 256, 128>}, {transform_indices = @transform_2, window_bounds = array<i64: 16, 128>}, {transform_indices = @transform_3, window_bounds = array<i64: 8, 128>}, {transform_indices = @transform_4, window_bounds = array<i64: 8, 128>}]} {
    %c0 = arith.constant 0 : index
    %c0_0 = arith.constant 0 : index
    %0 = vector.load %arg2[%c0, %c0_0] : memref<16x256xbf16, #tpu.memory_space<vmem>>, vector<16x256xbf16>
    %c0_1 = arith.constant 0 : index
    %c0_2 = arith.constant 0 : index
    %1 = vector.load %arg3[%c0_1, %c0_2] : memref<256x128xbf16, #tpu.memory_space<vmem>>, vector<256x128xbf16>
    %cst = arith.constant dense<0.000000e+00> : vector<16x128xf32>
    %2 = tpu.matmul %0, %1, %cst {dimension_numbers = #tpu.dot_dimension_numbers<[1], [0], [0], [1], [0, 0, 1, 1], [], []>} : vector<16x256xbf16>, vector<256x128xbf16>, vector<16x128xf32> -> vector<16x128xf32>
    %cst_3 = arith.constant dense<0.000000e+00> : vector<128xf32>
    %3 = vector.multi_reduction <add>, %2, %cst_3 [0] : vector<16x128xf32> to vector<128xf32>
    %4 = vector.shape_cast %3 : vector<128xf32> to vector<1x128xf32>
    %5 = arith.mulf %2, %2 : vector<16x128xf32>
    %cst_4 = arith.constant dense<0.000000e+00> : vector<128xf32>
    %6 = vector.multi_reduction <add>, %5, %cst_4 [0] : vector<16x128xf32> to vector<128xf32>
    %7 = vector.shape_cast %6 : vector<128xf32> to vector<1x128xf32>
    %8 = vector.shape_cast %4 : vector<1x128xf32> to vector<1x128xf32>
    %9 = vector.broadcast %8 : vector<1x128xf32> to vector<8x128xf32>
    %c0_5 = arith.constant 0 : index
    %c0_6 = arith.constant 0 : index
    %10 = vector.load %arg5[%c0_5, %c0_6] : memref<8x128xf32, #tpu.memory_space<vmem>>, vector<8x128xf32>
    tpu.vector_store %arg5[%c0_5, %c0_6], %9 {strides = array<i32>} : memref<8x128xf32, #tpu.memory_space<vmem>>, vector<8x128xf32>,
    %11 = vector.shape_cast %7 : vector<1x128xf32> to vector<1x128xf32>
    %12 = vector.broadcast %11 : vector<1x128xf32> to vector<8x128xf32>
    %c0_7 = arith.constant 0 : index
    %c0_8 = arith.constant 0 : index
    %13 = vector.load %arg6[%c0_7, %c0_8] : memref<8x128xf32, #tpu.memory_space<vmem>>, vector<8x128xf32>
    tpu.vector_store %arg6[%c0_7, %c0_8], %12 {strides = array<i32>} : memref<8x128xf32, #tpu.memory_space<vmem>>, vector<8x128xf32>,
    %14 = arith.truncf %2 : vector<16x128xf32> to vector<16x128xbf16>
    %c0_9 = arith.constant 0 : index
    %c0_10 = arith.constant 0 : index
    %15 = vector.load %arg4[%c0_9, %c0_10] : memref<16x128xbf16, #tpu.memory_space<vmem>>, vector<16x128xbf16>
    tpu.vector_store %arg4[%c0_9, %c0_10], %14 {strides = array<i32>} : memref<16x128xbf16, #tpu.memory_space<vmem>>, vector<16x128xbf16>,
    return
  }
  func.func @transform_0(%arg0: i32, %arg1: i32) -> (i32, i32) {
    %c0_i32 = arith.constant 0 : i32
    %c0_i32_0 = arith.constant 0 : i32
    return %arg0, %c0_i32 : i32, i32
  }
  func.func @transform_1(%arg0: i32, %arg1: i32) -> (i32, i32) {
    %c0_i32 = arith.constant 0 : i32
    %c0_i32_0 = arith.constant 0 : i32
    return %c0_i32, %arg1 : i32, i32
  }
  func.func @transform_2(%arg0: i32, %arg1: i32) -> (i32, i32) {
    %c0_i32 = arith.constant 0 : i32
    return %arg0, %arg1 : i32, i32
  }
  func.func @transform_3(%arg0: i32, %arg1: i32) -> (i32, i32) {
    %c0_i32 = arith.constant 0 : i32
    return %arg0, %arg1 : i32, i32
  }
  func.func @transform_4(%arg0: i32, %arg1: i32) -> (i32, i32) {
    %c0_i32 = arith.constant 0 : i32
    return %arg0, %arg1 : i32, i32
  }
}

module attributes {stable_mosaic.version = 11 : i64} {
  func.func @_affine_act_kernel(%arg0: i32, %arg1: memref<16x128xbf16, #tpu.memory_space<vmem>>, %arg2: memref<1x128xf32, #tpu.memory_space<vmem>>, %arg3: memref<1x128xf32, #tpu.memory_space<vmem>>, %arg4: memref<16x128xbf16, #tpu.memory_space<vmem>>) attributes {dimension_semantics = [#tpu.dimension_semantics<parallel>], iteration_bounds = array<i64: 2>, scalar_prefetch = 0 : i64, scratch_operands = 0 : i64, tpu.core_type = #tpu.core_type<tc>, window_params = [{transform_indices = @transform_0, window_bounds = array<i64: 16, 128>}, {pipeline_mode = #tpu.pipeline_mode<synchronous>, transform_indices = @transform_1, window_bounds = array<i64: 1, 128>}, {pipeline_mode = #tpu.pipeline_mode<synchronous>, transform_indices = @transform_2, window_bounds = array<i64: 1, 128>}, {transform_indices = @transform_3, window_bounds = array<i64: 16, 128>}]} {
    %c0 = arith.constant 0 : index
    %c0_0 = arith.constant 0 : index
    %0 = vector.load %arg1[%c0, %c0_0] : memref<16x128xbf16, #tpu.memory_space<vmem>>, vector<16x128xbf16>
    %1 = arith.extf %0 : vector<16x128xbf16> to vector<16x128xf32>
    %c0_1 = arith.constant 0 : index
    %c0_2 = arith.constant 0 : index
    %2 = vector.load %arg2[%c0_1, %c0_2] : memref<1x128xf32, #tpu.memory_space<vmem>>, vector<1x128xf32>
    %3 = vector.broadcast %2 : vector<1x128xf32> to vector<16x128xf32>
    %4 = arith.mulf %1, %3 : vector<16x128xf32>
    %c0_3 = arith.constant 0 : index
    %c0_4 = arith.constant 0 : index
    %5 = vector.load %arg3[%c0_3, %c0_4] : memref<1x128xf32, #tpu.memory_space<vmem>>, vector<1x128xf32>
    %6 = vector.broadcast %5 : vector<1x128xf32> to vector<16x128xf32>
    %7 = arith.addf %4, %6 : vector<16x128xf32>
    %8 = arith.truncf %7 : vector<16x128xf32> to vector<16x128xbf16>
    %c0_5 = arith.constant 0 : index
    %c0_6 = arith.constant 0 : index
    %9 = vector.load %arg4[%c0_5, %c0_6] : memref<16x128xbf16, #tpu.memory_space<vmem>>, vector<16x128xbf16>
    tpu.vector_store %arg4[%c0_5, %c0_6], %8 {strides = array<i32>} : memref<16x128xbf16, #tpu.memory_space<vmem>>, vector<16x128xbf16>,
    return
  }
  func.func @transform_0(%arg0: i32) -> (i32, i32) {
    %c0_i32 = arith.constant 0 : i32
    %c0_i32_0 = arith.constant 0 : i32
    return %arg0, %c0_i32 : i32, i32
  }
  func.func @transform_1(%arg0: i32) -> (i32, i32) {
    %c0_i32 = arith.constant 0 : i32
    %c0_i32_0 = arith.constant 0 : i32
    %c0_i32_1 = arith.constant 0 : i32
    return %c0_i32, %c0_i32_0 : i32, i32
  }
  func.func @transform_2(%arg0: i32) -> (i32, i32) {
    %c0_i32 = arith.constant 0 : i32
    %c0_i32_0 = arith.constant 0 : i32
    %c0_i32_1 = arith.constant 0 : i32
    return %c0_i32, %c0_i32_0 : i32, i32
  }
  func.func @transform_3(%arg0: i32) -> (i32, i32) {
    %c0_i32 = arith.constant 0 : i32
    %c0_i32_0 = arith.constant 0 : i32
    return %arg0, %c0_i32 : i32, i32
  }
}

module attributes {stable_mosaic.version = 11 : i64} {
  func.func @_mm_stats_kernel(%arg0: i32, %arg1: i32, %arg2: memref<256x256xbf16, #tpu.memory_space<vmem>>, %arg3: memref<256x128xbf16, #tpu.memory_space<vmem>>, %arg4: memref<256x128xbf16, #tpu.memory_space<vmem>>, %arg5: memref<8x128xf32, #tpu.memory_space<vmem>>, %arg6: memref<8x128xf32, #tpu.memory_space<vmem>>) attributes {dimension_semantics = [#tpu.dimension_semantics<parallel>, #tpu.dimension_semantics<parallel>], iteration_bounds = array<i64: 2, 1>, scalar_prefetch = 0 : i64, scratch_operands = 0 : i64, tpu.core_type = #tpu.core_type<tc>, window_params = [{transform_indices = @transform_0, window_bounds = array<i64: 256, 256>}, {transform_indices = @transform_1, window_bounds = array<i64: 256, 128>}, {transform_indices = @transform_2, window_bounds = array<i64: 256, 128>}, {transform_indices = @transform_3, window_bounds = array<i64: 8, 128>}, {transform_indices = @transform_4, window_bounds = array<i64: 8, 128>}]} {
    %c0 = arith.constant 0 : index
    %c0_0 = arith.constant 0 : index
    %0 = vector.load %arg2[%c0, %c0_0] : memref<256x256xbf16, #tpu.memory_space<vmem>>, vector<256x256xbf16>
    %c0_1 = arith.constant 0 : index
    %c0_2 = arith.constant 0 : index
    %1 = vector.load %arg3[%c0_1, %c0_2] : memref<256x128xbf16, #tpu.memory_space<vmem>>, vector<256x128xbf16>
    %cst = arith.constant dense<0.000000e+00> : vector<256x128xf32>
    %2 = tpu.matmul %0, %1, %cst {dimension_numbers = #tpu.dot_dimension_numbers<[1], [0], [0], [1], [0, 0, 1, 1], [], []>} : vector<256x256xbf16>, vector<256x128xbf16>, vector<256x128xf32> -> vector<256x128xf32>
    %cst_3 = arith.constant dense<0.000000e+00> : vector<128xf32>
    %3 = vector.multi_reduction <add>, %2, %cst_3 [0] : vector<256x128xf32> to vector<128xf32>
    %4 = vector.shape_cast %3 : vector<128xf32> to vector<1x128xf32>
    %5 = arith.mulf %2, %2 : vector<256x128xf32>
    %cst_4 = arith.constant dense<0.000000e+00> : vector<128xf32>
    %6 = vector.multi_reduction <add>, %5, %cst_4 [0] : vector<256x128xf32> to vector<128xf32>
    %7 = vector.shape_cast %6 : vector<128xf32> to vector<1x128xf32>
    %8 = vector.shape_cast %4 : vector<1x128xf32> to vector<1x128xf32>
    %9 = vector.broadcast %8 : vector<1x128xf32> to vector<8x128xf32>
    %c0_5 = arith.constant 0 : index
    %c0_6 = arith.constant 0 : index
    %10 = vector.load %arg5[%c0_5, %c0_6] : memref<8x128xf32, #tpu.memory_space<vmem>>, vector<8x128xf32>
    tpu.vector_store %arg5[%c0_5, %c0_6], %9 {strides = array<i32>} : memref<8x128xf32, #tpu.memory_space<vmem>>, vector<8x128xf32>,
    %11 = vector.shape_cast %7 : vector<1x128xf32> to vector<1x128xf32>
    %12 = vector.broadcast %11 : vector<1x128xf32> to vector<8x128xf32>
    %c0_7 = arith.constant 0 : index
    %c0_8 = arith.constant 0 : index
    %13 = vector.load %arg6[%c0_7, %c0_8] : memref<8x128xf32, #tpu.memory_space<vmem>>, vector<8x128xf32>
    tpu.vector_store %arg6[%c0_7, %c0_8], %12 {strides = array<i32>} : memref<8x128xf32, #tpu.memory_space<vmem>>, vector<8x128xf32>,
    %14 = arith.truncf %2 : vector<256x128xf32> to vector<256x128xbf16>
    %c0_9 = arith.constant 0 : index
    %c0_10 = arith.constant 0 : index
    %15 = vector.load %arg4[%c0_9, %c0_10] : memref<256x128xbf16, #tpu.memory_space<vmem>>, vector<256x128xbf16>
    tpu.vector_store %arg4[%c0_9, %c0_10], %14 {strides = array<i32>} : memref<256x128xbf16, #tpu.memory_space<vmem>>, vector<256x128xbf16>,
    return
  }
  func.func @transform_0(%arg0: i32, %arg1: i32) -> (i32, i32) {
    %c0_i32 = arith.constant 0 : i32
    %c0_i32_0 = arith.constant 0 : i32
    return %arg0, %c0_i32 : i32, i32
  }
  func.func @transform_1(%arg0: i32, %arg1: i32) -> (i32, i32) {
    %c0_i32 = arith.constant 0 : i32
    %c0_i32_0 = arith.constant 0 : i32
    return %c0_i32, %arg1 : i32, i32
  }
  func.func @transform_2(%arg0: i32, %arg1: i32) -> (i32, i32) {
    %c0_i32 = arith.constant 0 : i32
    return %arg0, %arg1 : i32, i32
  }
  func.func @transform_3(%arg0: i32, %arg1: i32) -> (i32, i32) {
    %c0_i32 = arith.constant 0 : i32
    return %arg0, %arg1 : i32, i32
  }
  func.func @transform_4(%arg0: i32, %arg1: i32) -> (i32, i32) {
    %c0_i32 = arith.constant 0 : i32
    return %arg0, %arg1 : i32, i32
  }
}

module attributes {stable_mosaic.version = 11 : i64} {
  func.func @_affine_act_kernel(%arg0: i32, %arg1: memref<256x128xbf16, #tpu.memory_space<vmem>>, %arg2: memref<1x128xf32, #tpu.memory_space<vmem>>, %arg3: memref<1x128xf32, #tpu.memory_space<vmem>>, %arg4: memref<256x128xbf16, #tpu.memory_space<vmem>>) attributes {dimension_semantics = [#tpu.dimension_semantics<parallel>], iteration_bounds = array<i64: 2>, scalar_prefetch = 0 : i64, scratch_operands = 0 : i64, tpu.core_type = #tpu.core_type<tc>, window_params = [{transform_indices = @transform_0, window_bounds = array<i64: 256, 128>}, {pipeline_mode = #tpu.pipeline_mode<synchronous>, transform_indices = @transform_1, window_bounds = array<i64: 1, 128>}, {pipeline_mode = #tpu.pipeline_mode<synchronous>, transform_indices = @transform_2, window_bounds = array<i64: 1, 128>}, {transform_indices = @transform_3, window_bounds = array<i64: 256, 128>}]} {
    %c0 = arith.constant 0 : index
    %c0_0 = arith.constant 0 : index
    %0 = vector.load %arg1[%c0, %c0_0] : memref<256x128xbf16, #tpu.memory_space<vmem>>, vector<256x128xbf16>
    %1 = arith.extf %0 : vector<256x128xbf16> to vector<256x128xf32>
    %c0_1 = arith.constant 0 : index
    %c0_2 = arith.constant 0 : index
    %2 = vector.load %arg2[%c0_1, %c0_2] : memref<1x128xf32, #tpu.memory_space<vmem>>, vector<1x128xf32>
    %3 = vector.broadcast %2 : vector<1x128xf32> to vector<256x128xf32>
    %4 = arith.mulf %1, %3 : vector<256x128xf32>
    %c0_3 = arith.constant 0 : index
    %c0_4 = arith.constant 0 : index
    %5 = vector.load %arg3[%c0_3, %c0_4] : memref<1x128xf32, #tpu.memory_space<vmem>>, vector<1x128xf32>
    %6 = vector.broadcast %5 : vector<1x128xf32> to vector<256x128xf32>
    %7 = arith.addf %4, %6 : vector<256x128xf32>
    %cst = arith.constant 0.000000e+00 : f32
    %8 = vector.broadcast %cst : f32 to vector<256x128xf32>
    %9 = arith.maximumf %7, %8 : vector<256x128xf32>
    %10 = arith.truncf %9 : vector<256x128xf32> to vector<256x128xbf16>
    %c0_5 = arith.constant 0 : index
    %c0_6 = arith.constant 0 : index
    %11 = vector.load %arg4[%c0_5, %c0_6] : memref<256x128xbf16, #tpu.memory_space<vmem>>, vector<256x128xbf16>
    tpu.vector_store %arg4[%c0_5, %c0_6], %10 {strides = array<i32>} : memref<256x128xbf16, #tpu.memory_space<vmem>>, vector<256x128xbf16>,
    return
  }
  func.func @transform_0(%arg0: i32) -> (i32, i32) {
    %c0_i32 = arith.constant 0 : i32
    %c0_i32_0 = arith.constant 0 : i32
    return %arg0, %c0_i32 : i32, i32
  }
  func.func @transform_1(%arg0: i32) -> (i32, i32) {
    %c0_i32 = arith.constant 0 : i32
    %c0_i32_0 = arith.constant 0 : i32
    %c0_i32_1 = arith.constant 0 : i32
    return %c0_i32, %c0_i32_0 : i32, i32
  }
  func.func @transform_2(%arg0: i32) -> (i32, i32) {
    %c0_i32 = arith.constant 0 : i32
    %c0_i32_0 = arith.constant 0 : i32
    %c0_i32_1 = arith.constant 0 : i32
    return %c0_i32, %c0_i32_0 : i32, i32
  }
  func.func @transform_3(%arg0: i32) -> (i32, i32) {
    %c0_i32 = arith.constant 0 : i32
    %c0_i32_0 = arith.constant 0 : i32
    return %arg0, %c0_i32 : i32, i32
  }
}

module attributes {stable_mosaic.version = 11 : i64} {
  func.func @_mm_stats_kernel(%arg0: i32, %arg1: i32, %arg2: memref<64x128xbf16, #tpu.memory_space<vmem>>, %arg3: memref<128x128xbf16, #tpu.memory_space<vmem>>, %arg4: memref<64x128xbf16, #tpu.memory_space<vmem>>, %arg5: memref<8x128xf32, #tpu.memory_space<vmem>>, %arg6: memref<8x128xf32, #tpu.memory_space<vmem>>) attributes {dimension_semantics = [#tpu.dimension_semantics<parallel>, #tpu.dimension_semantics<parallel>], iteration_bounds = array<i64: 2, 1>, scalar_prefetch = 0 : i64, scratch_operands = 0 : i64, tpu.core_type = #tpu.core_type<tc>, window_params = [{transform_indices = @transform_0, window_bounds = array<i64: 64, 128>}, {transform_indices = @transform_1, window_bounds = array<i64: 128, 128>}, {transform_indices = @transform_2, window_bounds = array<i64: 64, 128>}, {transform_indices = @transform_3, window_bounds = array<i64: 8, 128>}, {transform_indices = @transform_4, window_bounds = array<i64: 8, 128>}]} {
    %c0 = arith.constant 0 : index
    %c0_0 = arith.constant 0 : index
    %0 = vector.load %arg2[%c0, %c0_0] : memref<64x128xbf16, #tpu.memory_space<vmem>>, vector<64x128xbf16>
    %c0_1 = arith.constant 0 : index
    %c0_2 = arith.constant 0 : index
    %1 = vector.load %arg3[%c0_1, %c0_2] : memref<128x128xbf16, #tpu.memory_space<vmem>>, vector<128x128xbf16>
    %cst = arith.constant dense<0.000000e+00> : vector<64x128xf32>
    %2 = tpu.matmul %0, %1, %cst {dimension_numbers = #tpu.dot_dimension_numbers<[1], [0], [0], [1], [0, 0, 1, 1], [], []>} : vector<64x128xbf16>, vector<128x128xbf16>, vector<64x128xf32> -> vector<64x128xf32>
    %cst_3 = arith.constant dense<0.000000e+00> : vector<128xf32>
    %3 = vector.multi_reduction <add>, %2, %cst_3 [0] : vector<64x128xf32> to vector<128xf32>
    %4 = vector.shape_cast %3 : vector<128xf32> to vector<1x128xf32>
    %5 = arith.mulf %2, %2 : vector<64x128xf32>
    %cst_4 = arith.constant dense<0.000000e+00> : vector<128xf32>
    %6 = vector.multi_reduction <add>, %5, %cst_4 [0] : vector<64x128xf32> to vector<128xf32>
    %7 = vector.shape_cast %6 : vector<128xf32> to vector<1x128xf32>
    %8 = vector.shape_cast %4 : vector<1x128xf32> to vector<1x128xf32>
    %9 = vector.broadcast %8 : vector<1x128xf32> to vector<8x128xf32>
    %c0_5 = arith.constant 0 : index
    %c0_6 = arith.constant 0 : index
    %10 = vector.load %arg5[%c0_5, %c0_6] : memref<8x128xf32, #tpu.memory_space<vmem>>, vector<8x128xf32>
    tpu.vector_store %arg5[%c0_5, %c0_6], %9 {strides = array<i32>} : memref<8x128xf32, #tpu.memory_space<vmem>>, vector<8x128xf32>,
    %11 = vector.shape_cast %7 : vector<1x128xf32> to vector<1x128xf32>
    %12 = vector.broadcast %11 : vector<1x128xf32> to vector<8x128xf32>
    %c0_7 = arith.constant 0 : index
    %c0_8 = arith.constant 0 : index
    %13 = vector.load %arg6[%c0_7, %c0_8] : memref<8x128xf32, #tpu.memory_space<vmem>>, vector<8x128xf32>
    tpu.vector_store %arg6[%c0_7, %c0_8], %12 {strides = array<i32>} : memref<8x128xf32, #tpu.memory_space<vmem>>, vector<8x128xf32>,
    %14 = arith.truncf %2 : vector<64x128xf32> to vector<64x128xbf16>
    %c0_9 = arith.constant 0 : index
    %c0_10 = arith.constant 0 : index
    %15 = vector.load %arg4[%c0_9, %c0_10] : memref<64x128xbf16, #tpu.memory_space<vmem>>, vector<64x128xbf16>
    tpu.vector_store %arg4[%c0_9, %c0_10], %14 {strides = array<i32>} : memref<64x128xbf16, #tpu.memory_space<vmem>>, vector<64x128xbf16>,
    return
  }
  func.func @transform_0(%arg0: i32, %arg1: i32) -> (i32, i32) {
    %c0_i32 = arith.constant 0 : i32
    %c0_i32_0 = arith.constant 0 : i32
    return %arg0, %c0_i32 : i32, i32
  }
  func.func @transform_1(%arg0: i32, %arg1: i32) -> (i32, i32) {
    %c0_i32 = arith.constant 0 : i32
    %c0_i32_0 = arith.constant 0 : i32
    return %c0_i32, %arg1 : i32, i32
  }
  func.func @transform_2(%arg0: i32, %arg1: i32) -> (i32, i32) {
    %c0_i32 = arith.constant 0 : i32
    return %arg0, %arg1 : i32, i32
  }
  func.func @transform_3(%arg0: i32, %arg1: i32) -> (i32, i32) {
    %c0_i32 = arith.constant 0 : i32
    return %arg0, %arg1 : i32, i32
  }
  func.func @transform_4(%arg0: i32, %arg1: i32) -> (i32, i32) {
    %c0_i32 = arith.constant 0 : i32
    return %arg0, %arg1 : i32, i32
  }
}

module attributes {stable_mosaic.version = 11 : i64} {
  func.func @_affine_act_kernel(%arg0: i32, %arg1: memref<64x128xbf16, #tpu.memory_space<vmem>>, %arg2: memref<1x128xf32, #tpu.memory_space<vmem>>, %arg3: memref<1x128xf32, #tpu.memory_space<vmem>>, %arg4: memref<64x128xbf16, #tpu.memory_space<vmem>>) attributes {dimension_semantics = [#tpu.dimension_semantics<parallel>], iteration_bounds = array<i64: 2>, scalar_prefetch = 0 : i64, scratch_operands = 0 : i64, tpu.core_type = #tpu.core_type<tc>, window_params = [{transform_indices = @transform_0, window_bounds = array<i64: 64, 128>}, {pipeline_mode = #tpu.pipeline_mode<synchronous>, transform_indices = @transform_1, window_bounds = array<i64: 1, 128>}, {pipeline_mode = #tpu.pipeline_mode<synchronous>, transform_indices = @transform_2, window_bounds = array<i64: 1, 128>}, {transform_indices = @transform_3, window_bounds = array<i64: 64, 128>}]} {
    %c0 = arith.constant 0 : index
    %c0_0 = arith.constant 0 : index
    %0 = vector.load %arg1[%c0, %c0_0] : memref<64x128xbf16, #tpu.memory_space<vmem>>, vector<64x128xbf16>
    %1 = arith.extf %0 : vector<64x128xbf16> to vector<64x128xf32>
    %c0_1 = arith.constant 0 : index
    %c0_2 = arith.constant 0 : index
    %2 = vector.load %arg2[%c0_1, %c0_2] : memref<1x128xf32, #tpu.memory_space<vmem>>, vector<1x128xf32>
    %3 = vector.broadcast %2 : vector<1x128xf32> to vector<64x128xf32>
    %4 = arith.mulf %1, %3 : vector<64x128xf32>
    %c0_3 = arith.constant 0 : index
    %c0_4 = arith.constant 0 : index
    %5 = vector.load %arg3[%c0_3, %c0_4] : memref<1x128xf32, #tpu.memory_space<vmem>>, vector<1x128xf32>
    %6 = vector.broadcast %5 : vector<1x128xf32> to vector<64x128xf32>
    %7 = arith.addf %4, %6 : vector<64x128xf32>
    %8 = arith.truncf %7 : vector<64x128xf32> to vector<64x128xbf16>
    %c0_5 = arith.constant 0 : index
    %c0_6 = arith.constant 0 : index
    %9 = vector.load %arg4[%c0_5, %c0_6] : memref<64x128xbf16, #tpu.memory_space<vmem>>, vector<64x128xbf16>
    tpu.vector_store %arg4[%c0_5, %c0_6], %8 {strides = array<i32>} : memref<64x128xbf16, #tpu.memory_space<vmem>>, vector<64x128xbf16>,
    return
  }
  func.func @transform_0(%arg0: i32) -> (i32, i32) {
    %c0_i32 = arith.constant 0 : i32
    %c0_i32_0 = arith.constant 0 : i32
    return %arg0, %c0_i32 : i32, i32
  }
  func.func @transform_1(%arg0: i32) -> (i32, i32) {
    %c0_i32 = arith.constant 0 : i32
    %c0_i32_0 = arith.constant 0 : i32
    %c0_i32_1 = arith.constant 0 : i32
    return %c0_i32, %c0_i32_0 : i32, i32
  }
  func.func @transform_2(%arg0: i32) -> (i32, i32) {
    %c0_i32 = arith.constant 0 : i32
    %c0_i32_0 = arith.constant 0 : i32
    %c0_i32_1 = arith.constant 0 : i32
    return %c0_i32, %c0_i32_0 : i32, i32
  }
  func.func @transform_3(%arg0: i32) -> (i32, i32) {
    %c0_i32 = arith.constant 0 : i32
    %c0_i32_0 = arith.constant 0 : i32
    return %arg0, %c0_i32 : i32, i32
  }
}

module attributes {stable_mosaic.version = 11 : i64} {
  func.func @_mm_bias_act_kernel(%arg0: i32, %arg1: i32, %arg2: memref<256x256xbf16, #tpu.memory_space<vmem>>, %arg3: memref<256x128xbf16, #tpu.memory_space<vmem>>, %arg4: memref<1x128xf32, #tpu.memory_space<vmem>>, %arg5: memref<256x128xbf16, #tpu.memory_space<vmem>>) attributes {dimension_semantics = [#tpu.dimension_semantics<parallel>, #tpu.dimension_semantics<parallel>], iteration_bounds = array<i64: 2, 1>, scalar_prefetch = 0 : i64, scratch_operands = 0 : i64, tpu.core_type = #tpu.core_type<tc>, window_params = [{transform_indices = @transform_0, window_bounds = array<i64: 256, 256>}, {transform_indices = @transform_1, window_bounds = array<i64: 256, 128>}, {transform_indices = @transform_2, window_bounds = array<i64: 1, 128>}, {transform_indices = @transform_3, window_bounds = array<i64: 256, 128>}]} {
    %c0 = arith.constant 0 : index
    %c0_0 = arith.constant 0 : index
    %0 = vector.load %arg2[%c0, %c0_0] : memref<256x256xbf16, #tpu.memory_space<vmem>>, vector<256x256xbf16>
    %c0_1 = arith.constant 0 : index
    %c0_2 = arith.constant 0 : index
    %1 = vector.load %arg3[%c0_1, %c0_2] : memref<256x128xbf16, #tpu.memory_space<vmem>>, vector<256x128xbf16>
    %cst = arith.constant dense<0.000000e+00> : vector<256x128xf32>
    %2 = tpu.matmul %0, %1, %cst {dimension_numbers = #tpu.dot_dimension_numbers<[1], [0], [0], [1], [0, 0, 1, 1], [], []>} : vector<256x256xbf16>, vector<256x128xbf16>, vector<256x128xf32> -> vector<256x128xf32>
    %c0_3 = arith.constant 0 : index
    %c0_4 = arith.constant 0 : index
    %3 = vector.load %arg4[%c0_3, %c0_4] : memref<1x128xf32, #tpu.memory_space<vmem>>, vector<1x128xf32>
    %4 = vector.broadcast %3 : vector<1x128xf32> to vector<256x128xf32>
    %5 = arith.addf %2, %4 : vector<256x128xf32>
    %6 = math.tanh %5 : vector<256x128xf32>
    %7 = arith.truncf %6 : vector<256x128xf32> to vector<256x128xbf16>
    %c0_5 = arith.constant 0 : index
    %c0_6 = arith.constant 0 : index
    %8 = vector.load %arg5[%c0_5, %c0_6] : memref<256x128xbf16, #tpu.memory_space<vmem>>, vector<256x128xbf16>
    tpu.vector_store %arg5[%c0_5, %c0_6], %7 {strides = array<i32>} : memref<256x128xbf16, #tpu.memory_space<vmem>>, vector<256x128xbf16>,
    return
  }
  func.func @transform_0(%arg0: i32, %arg1: i32) -> (i32, i32) {
    %c0_i32 = arith.constant 0 : i32
    %c0_i32_0 = arith.constant 0 : i32
    return %arg0, %c0_i32 : i32, i32
  }
  func.func @transform_1(%arg0: i32, %arg1: i32) -> (i32, i32) {
    %c0_i32 = arith.constant 0 : i32
    %c0_i32_0 = arith.constant 0 : i32
    return %c0_i32, %arg1 : i32, i32
  }
  func.func @transform_2(%arg0: i32, %arg1: i32) -> (i32, i32) {
    %c0_i32 = arith.constant 0 : i32
    %c0_i32_0 = arith.constant 0 : i32
    return %c0_i32, %arg1 : i32, i32
  }
  func.func @transform_3(%arg0: i32, %arg1: i32) -> (i32, i32) {
    %c0_i32 = arith.constant 0 : i32
    return %arg0, %arg1 : i32, i32
  }
}

</mosaic_0001>

<bundles_post_ra>
// kernel: _lambda_.21
= control target key start
LH: loop header
LB: loop body
LE: loop exit
PB: predicated region body
PF: predicated region fallthrough
CT: control target
= control target key end

     0   :  { %s1004_s15 = smov 0   ;;  %s1006_s16 = smov 0   ;;  %s1116_s0 = inlined_call_operand.vmem [shape: bf16[128,256], index: 0, kind: input, shape index: {}]   ;;  %s1117_s1 = inlined_call_operand.vmem [shape: bf16[256,128], index: 1, kind: input, shape index: {}]   ;;  %s1118_s2 = inlined_call_operand.vmem [shape: bf16[128,128], index: 2, kind: output, shape index: {0}]   ;;  %s1119_s3 = inlined_call_operand.vmem [shape: f32[16,128], index: 3, kind: output, shape index: {1}]   ;;  %s1120_s4 = inlined_call_operand.vmem [shape: f32[16,128], index: 4, kind: output, shape index: {2}]  }
   0x1   :  { %s1008_s17 = smov 0  }
   0x2 LB: > { %s27_s18 = sadd.s32 1, %s973_s16  ;;  %p773_p0 = scmp.ge.s32.totalorder %s977_s17, 1  ;;  %s977_s17 = sphi %s1008_s17, %s15_s17   ;;  %s973_s16 = sphi %s1006_s16, %s1122_s16   ;;  %s969_s15 = sphi %s1004_s15, %s1121_s15  }
   0x3   : > { %p29_p1 = scmp.ge.s32.totalorder %s27_s18, 2  ;;  %p196_p2 = scmp.lt.s32.totalorder %s977_s17, 3 }
   0x5   : > { %s1124_s18 = smov (%p29_p1, %s27_s18), 0  ;;  %p197_p3 = pnand %p773_p0, %p196_p2 }
   0x6   : > { %s774_s21 = sshll.u32 (!%p197_p3), %s969_s15, 3  ;;  %p264_p5 = scmp.lt.s32.totalorder (!%p197_p3), %s969_s15, 1 }
   0x7   : > { %200 = sbr.rel (%p197_p3) target bundleno = 279 (0x117), region = 28  ;;  %p245_p4 = scmp.lt.s32.totalorder (!%p197_p3), %s774_s21, 15 }
   0xc   : > { %v927_v0 = vld [vmem:[%s1117_s1 + $0x78] sm:$0xff]   ;;  %v929_v2 = vld [vmem:[%s1117_s1 + $0x70] sm:$0xff]   ;;  %v931_v4 = vld [vmem:[%s1117_s1 + $0x68] sm:$0xff]   ;;  %s1126_s21 = smov (!%p245_p4, %s774_s21), 15  ;;  %s1128_s15 = smov (!%p264_p5, %s969_s15), 1 }
   0xd   : > { %v928_v1 = vld [vmem:[%s1117_s1 + $0x38] sm:$0xff]   ;;  %847 = vmatprep.subr.bf16.mxu0 %v927_v0  ;;  %887 = vmatprep.subr.bf16.mxu1 %v927_v0  ;;  %v930_v3 = vld [vmem:[%s1117_s1 + $0x30] sm:$0xff]   ;;  %v932_v5 = vld [vmem:[%s1117_s1 + $0x28] sm:$0xff]   ;;  %s815_s10 = sshll.u32 %s1126_s21, 3  ;;  %s778_s9 = sshll.u32 %s1126_s21, 2 }
   0xe   : > { %848 = vmatpush3.bf16.msra.mxu0 %v928_v1  ;;  %895 = vmatpush3.bf16.msra.mxu1 %v928_v1  ;;  %v933_v6 = vld [vmem:[%s1117_s1 + $0x60] sm:$0xff]   ;;  %v935_v8 = vld [vmem:[%s1117_s1 + $0x58] sm:$0xff]   ;;  %s1058_s19 = scalar_lea.vmem %s1116_s0, %s815_s10  ;;  %v937_v10 = vld [vmem:[%s1117_s1 + $0x50] sm:$0xff]   ;;  %s1093_s12 = scalar_lea.vmem %s1118_s2, %s778_s9 }
   0xf   : > { %849 = vmatprep.subr.bf16.mxu0 %v929_v2  ;;  %888 = vmatprep.subr.bf16.mxu1 %v929_v2  ;;  %v934_v7 = vld [vmem:[%s1117_s1 + $0x20] sm:$0xff]   ;;  %v936_v9 = vld [vmem:[%s1117_s1 + $0x18] sm:$0xff]   ;;  %v938_v13 = vld [vmem:[%s1117_s1 + $0x10] sm:$0xff]   ;;  %s779_s21 = sshll.u32 %s1128_s15, 3 }
  0x10   : > { %v945_v11 = vld [vmem:[%s1058_s19 + $0x4] ss:$8 sps:$4 sm:$0xff]   ;;  %v943_v18 = vld [vmem:[%s1058_s19] ss:$8 sps:$4 sm:$0xff]   ;;  %v949_v20 = vld [vmem:[%s1058_s19 + $0x14] ss:$8 sps:$4 sm:$0xff]   ;;  %s277_s23 = scalar_lea.vmem %s1120_s4, %s779_s21 }
  0x11   : > { %v948_v12 = vld [vmem:[%s1058_s19 + $0x24] ss:$8 sps:$4 sm:$0xff]   ;;  %487 = vmatprep.mubr.bf16.mxu0 %v945_v11  ;;  %v946_v19 = vld [vmem:[%s1058_s19 + $0x20] ss:$8 sps:$4 sm:$0xff]   ;;  %v952_v21 = vld [vmem:[%s1058_s19 + $0x34] ss:$8 sps:$4 sm:$0xff]  }
  0x12   : > { %850 = vmatpush3.bf16.msra.mxu0 %v930_v3  ;;  %896 = vmatpush3.bf16.msra.mxu1 %v930_v3  ;;  %v939_v14 = vld [vmem:[%s1117_s1 + $0x48] sm:$0xff]   ;;  %v941_v16 = vld [vmem:[%s1117_s1 + $0x40] sm:$0xff]   ;;  %v951_v22 = vld [vmem:[%s1058_s19 + $0x10] ss:$8 sps:$4 sm:$0xff]  }
  0x13   : > { %851 = vmatprep.subr.bf16.mxu0 %v931_v4  ;;  %889 = vmatprep.subr.bf16.mxu1 %v931_v4  ;;  %v940_v15 = vld [vmem:[%s1117_s1 + $0x8] sm:$0xff]   ;;  %v942_v17 = vld [vmem:[%s1117_s1] sm:$0xff]   ;;  %v954_v23 = vld [vmem:[%s1058_s19 + $0x30] ss:$8 sps:$4 sm:$0xff]   ;;  %s270_s19 = scalar_lea.vmem %s1119_s3, %s779_s21 }
  0x14   : > { %503 = vmatprep.mubr.bf16.mxu1 %v948_v12 }
  0x16   : > { %852 = vmatpush3.bf16.msra.mxu0 %v932_v5  ;;  %897 = vmatpush3.bf16.msra.mxu1 %v932_v5 }
  0x17   : > { %853 = vmatprep.subr.bf16.mxu0 %v933_v6  ;;  %890 = vmatprep.subr.bf16.mxu1 %v933_v6 }
  0x1a   : > { %854 = vmatpush3.bf16.msra.mxu0 %v934_v7  ;;  %898 = vmatpush3.bf16.msra.mxu1 %v934_v7 }
  0x1b   : > { %855 = vmatprep.subr.bf16.mxu0 %v935_v8  ;;  %891 = vmatprep.subr.bf16.mxu1 %v935_v8 }
  0x1e   : > { %856 = vmatpush3.bf16.msra.mxu0 %v936_v9  ;;  %899 = vmatpush3.bf16.msra.mxu1 %v936_v9 }
  0x1f   : > { %857 = vmatprep.subr.bf16.mxu0 %v937_v10  ;;  %892 = vmatprep.subr.bf16.mxu1 %v937_v10 }
  0x22   : > { %858 = vmatpush3.bf16.msra.mxu0 %v938_v13  ;;  %900 = vmatpush3.bf16.msra.mxu1 %v938_v13 }
  0x23   : > { %859 = vmatprep.subr.bf16.mxu0 %v939_v14  ;;  %893 = vmatprep.subr.bf16.mxu1 %v939_v14 }
  0x26   : > { %860 = vmatpush3.bf16.msra.mxu0 %v940_v15  ;;  %901 = vmatpush3.bf16.msra.mxu1 %v940_v15 }
  0x27   : > { %861 = vmatprep.subr.bf16.mxu0 %v941_v16  ;;  %894 = vmatprep.subr.bf16.mxu1 %v941_v16 }
  0x2a   : > { %862 = vmatpush3.bf16.msra.mxu0 %v942_v17  ;;  %902 = vmatpush3.bf16.msra.mxu1 %v942_v17 }
  0x2d   : > { %488 = vmatmul.mubr.bf16.vlgmr.msra.gmra.mxu0 %v943_v18  ;;  %504 = vmatmul.mubr.bf16.vlgmr.msra.gmra.mxu1 %v946_v19 }
  0x2e   : > { %495 = vmatprep.mubr.bf16.mxu0 %v949_v20  ;;  %511 = vmatprep.mubr.bf16.mxu1 %v952_v21 }
  0x35   : > { %496 = vmatmul.mubr.bf16.gmra.mxu0 %v951_v22  ;;  %512 = vmatmul.mubr.bf16.gmra.mxu1 %v954_v23 }
  0xed   : > { %v863_v24 = vpop.f32.mrf.mxu0  ;;  %v875_v25 = vpop.f32.mrf.mxu1 }
  0xef   : > { %v864_v26 = vpop.f32.mrf.mxu0  ;;  %v876_v27 = vpop.f32.mrf.mxu1 }
  0xf0   : > { %v877_v30 = vadd.f32 %v876_v27, %v875_v25  ;;  %v865_v33 = vadd.f32 %v864_v26, %v863_v24 }
  0xf1   : > { %v866_v28 = vpop.f32.mrf.mxu0  ;;  %v878_v29 = vpop.f32.mrf.mxu1 }
  0xf2   : > { %v533_v46 = vmul.f32 %v865_v33, %v865_v33  ;;  %v537_v61 = vmul.f32 %v877_v30, %v877_v30 }
  0xf3   : > { %v867_v31 = vpop.f32.mrf.mxu0  ;;  %v879_v32 = vpop.f32.mrf.mxu1 }
  0xf4   : > { %v868_v34 = vadd.f32 %v867_v31, %v866_v28  ;;  %v880_v35 = vadd.f32 %v879_v32, %v878_v29 }
  0xf5   : > { %v869_v36 = vpop.f32.mrf.mxu0  ;;  %v881_v37 = vpop.f32.mrf.mxu1 }
  0xf6   : > { %v827_v38 = vpack.c.bf16 %v868_v34, %v865_v33  ;;  %v837_v39 = vpack.c.bf16 %v880_v35, %v877_v30  ;;  %v534_v42 = vmul.f32 %v868_v34, %v868_v34  ;;  %v520_v47 = vadd.f32 %v868_v34, %v865_v33 }
  0xf7   : > { %v870_v40 = vpop.f32.mrf.mxu0  ;;  %v882_v41 = vpop.f32.mrf.mxu1  ;;  %v538_v0 = vmul.f32 %v880_v35, %v880_v35 }
  0xf8   : > { %828 = vst [vmem:[%s1093_s12] sm:$0xff] %v827_v38   ;;  %v871_v43 = vadd.f32 %v870_v40, %v869_v36  ;;  %845 = vst [vmem:[%s1093_s12 + $0x10] sm:$0xff] %v837_v39   ;;  %v883_v49 = vadd.f32 %v882_v41, %v881_v37  ;;  %v541_v52 = vadd.f32 %v534_v42, %v533_v46 }
  0xf9   : > { %v872_v44 = vpop.f32.mrf.mxu0  ;;  %v884_v45 = vpop.f32.mrf.mxu1 }
  0xfa   : > { %v535_v48 = vmul.f32 %v871_v43, %v871_v43  ;;  %v521_v53 = vadd.f32 %v871_v43, %v520_v47  ;;  %v539_v3 = vmul.f32 %v883_v49, %v883_v49 }
  0xfb   : > { %v873_v50 = vpop.f32.mrf.mxu0  ;;  %v885_v51 = vpop.f32.mrf.mxu1 }
  0xfc   : > { %v874_v54 = vadd.f32 %v873_v50, %v872_v44  ;;  %v886_v55 = vadd.f32 %v885_v51, %v884_v45  ;;  %v542_v56 = vadd.f32 %v541_v52, %v535_v48 }
  0xfe   : > { %v522_v57 = vadd.f32 %v874_v54, %v521_v53  ;;  %v536_v58 = vmul.f32 %v874_v54, %v874_v54  ;;  %v832_v59 = vpack.c.bf16 %v874_v54, %v871_v43  ;;  %v842_v60 = vpack.c.bf16 %v886_v55, %v883_v49 }
  0xff   : > { %v540_v7 = vmul.f32 %v886_v55, %v886_v55 }
 0x100   : > { %v523_v62 = vadd.f32 %v877_v30, %v522_v57  ;;  %v543_v63 = vadd.f32 %v542_v56, %v536_v58  ;;  %844 = vst [vmem:[%s1093_s12 + $0x8] sm:$0xff] %v832_v59   ;;  %846 = vst [vmem:[%s1093_s12 + $0x18] sm:$0xff] %v842_v60  }
 0x102   : > { %v544_v1 = vadd.f32 %v543_v63, %v537_v61  ;;  %v524_v2 = vadd.f32 %v880_v35, %v523_v62 }
 0x104   : > { %v525_v4 = vadd.f32 %v883_v49, %v524_v2  ;;  %v545_v5 = vadd.f32 %v544_v1, %v538_v0 }
 0x106   : > { %v526_v6 = vadd.f32 %v886_v55, %v525_v4  ;;  %v546_v8 = vadd.f32 %v545_v5, %v539_v3 }
 0x108   : > { %v527_v9 = vrot.slane %v526_v6, 4  ;;  %v547_v10 = vadd.f32 %v546_v8, %v540_v7 }
 0x10a   : > { %v528_v11 = vadd.f32 %v527_v9, %v526_v6  ;;  %v548_v12 = vrot.slane %v547_v10, 4 }
 0x10c   : > { %v529_v13 = vrot.slane %v528_v11, 2  ;;  %v549_v14 = vadd.f32 %v548_v12, %v547_v10 }
 0x10e   : > { %v530_v15 = vadd.f32 %v529_v13, %v528_v11  ;;  %v550_v16 = vrot.slane %v549_v14, 2 }
 0x110   : > { %v531_v17 = vrot.slane %v530_v15, 1  ;;  %v551_v18 = vadd.f32 %v550_v16, %v549_v14 }
 0x112   : > { %v532_v19 = vadd.f32 %v531_v17, %v530_v15  ;;  %v552_v20 = vrot.slane %v551_v18, 1 }
 0x114   : > { %v553_v21 = vadd.f32 %v552_v20, %v551_v18  ;;  %554 = vst [vmem:[%s270_s19] sm:$0xff] %v532_v19 }
 0x116   : > { %555 = vst [vmem:[%s277_s23] sm:$0xff] %v553_v21 }
 0x117 PF: > { %s15_s17 = sadd.s32 1, %s977_s17   ;;  %s1121_s15 = smov %s973_s16 }
 0x118   : > { %p12_p6 = scmp.ge.s32.totalorder %s15_s17, 4   ;;  %s1122_s16 = smov %s1124_s18 }
 0x11a   :  { %14 = sbr.rel (!%p12_p6) target bundleno = 2 (0x2), region = 85 }

// kernel: _lambda_.22
= control target key start
LH: loop header
LB: loop body
LE: loop exit
PB: predicated region body
PF: predicated region fallthrough
CT: control target
= control target key end

     0   :  { %s431_s12 = smov 0   ;;  %s461_s0 = inlined_call_operand.vmem [shape: bf16[128,128], index: 0, kind: input, shape index: {}]   ;;  %s462_s1 = inlined_call_operand.vmem [shape: f32[1,128], index: 1, kind: input, shape index: {}]   ;;  %s463_s2 = inlined_call_operand.vmem [shape: f32[1,128], index: 2, kind: input, shape index: {}]   ;;  %s464_s3 = inlined_call_operand.vmem [shape: bf16[128,128], index: 3, kind: output, shape index: {}]  }
   0x1 LB: > { %s324_s13 = sadd.s32 4294967295, %s409_s12   ;;  %p328_p0 = scmp.ge.s32.totalorder %s409_s12, 1  ;;  %s409_s12 = sphi %s431_s12, %s13_s12  }
   0x2   : > { %p138_p1 = scmp.lt.s32.totalorder %s409_s12, 3 }
   0x4   : > { %p139_p2 = pnand %p328_p0, %p138_p1 }
   0x5   : > { %s329_s14 = sshll.u32 (!%p139_p2), %s324_s13, 3 }
   0x6   : > { %142 = sbr.rel (%p139_p2) target bundleno = 27 (0x1b), region = 32  ;;  %p163_p3 = scmp.lt.s32.totalorder (!%p139_p2), %s329_s14, 15 }
   0xb   : > { %s466_s14 = smov (!%p163_p3, %s329_s14), 15  ;;  %v333_v0 = vld [vmem:[%s462_s1] ss:$0 sm:$0xff] }
   0xc   : > { %s330_s15 = sshll.u32 %s466_s14, 2  ;;  %v334_v9 = vld [vmem:[%s463_s2] ss:$0 sm:$0xff] }
   0xd   : > { %s166_s18 = scalar_lea.vmem %s461_s0, %s330_s15  ;;  %s172_s25 = scalar_lea.vmem %s464_s3, %s330_s15 }
   0xe   : > { %v354_v1 = vld [vmem:[%s166_s18] sm:$0xff]   ;;  %v389_v2 = vld [vmem:[%s166_s18 + $0x8] sm:$0xff]   ;;  %v390_v3 = vld [vmem:[%s166_s18 + $0x10] sm:$0xff]  }
   0xf   : > { %v355_v4 = vunpack.c.l.bf16 %v354_v1  ;;  %v356_v5 = vunpack.c.h.bf16 %v354_v1  ;;  %v359_v6 = vunpack.c.l.bf16 %v389_v2  ;;  %v360_v7 = vunpack.c.h.bf16 %v389_v2  ;;  %v391_v8 = vld [vmem:[%s166_s18 + $0x18] sm:$0xff]  }
  0x10   : > { %v363_v10 = vunpack.c.l.bf16 %v390_v3  ;;  %v364_v11 = vunpack.c.h.bf16 %v390_v3  ;;  %v367_v12 = vunpack.c.l.bf16 %v391_v8  ;;  %v368_v13 = vunpack.c.h.bf16 %v391_v8 }
  0x11   : > { %v197_v14 = vmul.f32 %v355_v4, %v333_v0  ;;  %v198_v15 = vmul.f32 %v356_v5, %v333_v0  ;;  %v199_v16 = vmul.f32 %v359_v6, %v333_v0  ;;  %v200_v17 = vmul.f32 %v360_v7, %v333_v0 }
  0x12   : > { %v201_v18 = vmul.f32 %v363_v10, %v333_v0  ;;  %v202_v19 = vmul.f32 %v364_v11, %v333_v0  ;;  %v203_v20 = vmul.f32 %v367_v12, %v333_v0  ;;  %v204_v21 = vmul.f32 %v368_v13, %v333_v0 }
  0x13   : > { %v212_v22 = vadd.f32 %v334_v9, %v197_v14  ;;  %v213_v23 = vadd.f32 %v334_v9, %v198_v15  ;;  %v214_v24 = vadd.f32 %v334_v9, %v199_v16  ;;  %v215_v25 = vadd.f32 %v334_v9, %v200_v17 }
  0x14   : > { %v216_v26 = vadd.f32 %v334_v9, %v201_v18  ;;  %v217_v27 = vadd.f32 %v334_v9, %v202_v19  ;;  %v218_v28 = vadd.f32 %v334_v9, %v203_v20  ;;  %v219_v29 = vadd.f32 %v334_v9, %v204_v21 }
  0x15   : > { %v220_v30 = vmax.f32 %v212_v22, 0.0  ;;  %v221_v31 = vmax.f32 %v213_v23, 0.0  ;;  %v222_v32 = vmax.f32 %v214_v24, 0.0  ;;  %v223_v33 = vmax.f32 %v215_v25, 0.0 }
  0x16   : > { %v224_v34 = vmax.f32 %v216_v26, 0.0  ;;  %v225_v35 = vmax.f32 %v217_v27, 0.0  ;;  %v226_v36 = vmax.f32 %v218_v28, 0.0  ;;  %v227_v37 = vmax.f32 %v219_v29, 0.0 }
  0x17   : > { %v372_v38 = vpack.c.bf16 %v221_v31, %v220_v30  ;;  %v377_v39 = vpack.c.bf16 %v223_v33, %v222_v32 }
  0x18   : > { %v382_v40 = vpack.c.bf16 %v225_v35, %v224_v34  ;;  %v387_v41 = vpack.c.bf16 %v227_v37, %v226_v36 }
  0x19   : > { %373 = vst [vmem:[%s172_s25] sm:$0xff] %v372_v38   ;;  %392 = vst [vmem:[%s172_s25 + $0x8] sm:$0xff] %v377_v39  }
  0x1a   : > { %393 = vst [vmem:[%s172_s25 + $0x10] sm:$0xff] %v382_v40   ;;  %394 = vst [vmem:[%s172_s25 + $0x18] sm:$0xff] %v387_v41  }
  0x1b PF: > { %s13_s12 = sadd.s32 1, %s409_s12  }
  0x1c   : > { %p10_p4 = scmp.ge.s32.totalorder %s13_s12, 4  }
  0x1e   :  { %12 = sbr.rel (!%p10_p4) target bundleno = 1 (0x1), region = 62 }

// kernel: _lambda_.23
= control target key start
LH: loop header
LB: loop body
LE: loop exit
PB: predicated region body
PF: predicated region fallthrough
CT: control target
= control target key end

     0   :  { %s736_s15 = smov 0   ;;  %s738_s16 = smov 0   ;;  %s804_s0 = inlined_call_operand.vmem [shape: bf16[32,128], index: 0, kind: input, shape index: {}]   ;;  %s805_s1 = inlined_call_operand.vmem [shape: bf16[128,128], index: 1, kind: input, shape index: {}]   ;;  %s806_s2 = inlined_call_operand.vmem [shape: bf16[32,128], index: 2, kind: output, shape index: {0}]   ;;  %s807_s3 = inlined_call_operand.vmem [shape: f32[16,128], index: 3, kind: output, shape index: {1}]   ;;  %s808_s4 = inlined_call_operand.vmem [shape: f32[16,128], index: 4, kind: output, shape index: {2}]  }
   0x1   :  { %s740_s17 = smov 0  }
   0x2 LB: > { %s27_s18 = sadd.s32 1, %s703_s16  ;;  %p594_p0 = scmp.ge.s32.totalorder %s707_s17, 1  ;;  %s707_s17 = sphi %s740_s17, %s15_s17   ;;  %s703_s16 = sphi %s738_s16, %s810_s16   ;;  %s699_s15 = sphi %s736_s15, %s809_s15  }
   0x3   : > { %p29_p1 = scmp.ge.s32.totalorder %s27_s18, 2  ;;  %p195_p2 = scmp.lt.s32.totalorder %s707_s17, 3 }
   0x5   : > { %s812_s18 = smov (%p29_p1, %s27_s18), 0  ;;  %p196_p3 = pnand %p594_p0, %p195_p2 }
   0x6   : > { %s595_s23 = sshll.u32 (!%p196_p3), %s699_s15, 1  ;;  %p261_p5 = scmp.lt.s32.totalorder (!%p196_p3), %s699_s15, 1 }
   0x7   : > { %199 = sbr.rel (%p196_p3) target bundleno = 259 (0x103), region = 28  ;;  %p243_p4 = scmp.lt.s32.totalorder (!%p196_p3), %s595_s23, 3 }
   0xc   : > { %v676_v0 = vld [vmem:[%s805_s1 + $0x38] sm:$0xff]   ;;  %v709_v1 = vmov 0.0   ;;  %v677_v2 = vld [vmem:[%s805_s1 + $0x30] sm:$0xff]   ;;  %vm710_vm0 = vmmov 0   ;;  %s814_s23 = smov (!%p243_p4, %s595_s23), 3  ;;  %v678_v3 = vld [vmem:[%s805_s1 + $0x28] sm:$0xff]  }
   0xd   : > { %630 = vmatprep.subr.bf16.mxu0 %v709_v1  ;;  %646 = vmatprep.mubr.msk.bf16.mxu0 %vm710_vm0, %v709_v1  ;;  %s596_s26 = sshll.u32 %s814_s23, 2  ;;  %v679_v4 = vld [vmem:[%s805_s1 + $0x20] sm:$0xff]   ;;  %v680_v5 = vld [vmem:[%s805_s1 + $0x18] sm:$0xff]   ;;  %v681_v6 = vld [vmem:[%s805_s1 + $0x10] sm:$0xff]   ;;  %s816_s15 = smov (!%p261_p5, %s699_s15), 1 }
   0xe   : > { %631 = vmatpush3.bf16.msra.mxu0 %v676_v0  ;;  %s246_s29 = scalar_lea.vmem %s804_s0, %s596_s26  ;;  %v682_v7 = vld [vmem:[%s805_s1 + $0x8] sm:$0xff]   ;;  %v683_v8 = vld [vmem:[%s805_s1] sm:$0xff]   ;;  %s259_s20 = scalar_lea.vmem %s806_s2, %s596_s26 }
   0xf   : > { %632 = vmatprep.subr.bf16.mxu0 %v709_v1  ;;  %v684_v9 = vld [vmem:[%s246_s29] sm:$0xff]   ;;  %s599_s21 = sshll.u32 %s816_s15, 3 }
  0x10   : > { %s267_s24 = scalar_lea.vmem %s807_s3, %s599_s21  ;;  %s274_s27 = scalar_lea.vmem %s808_s4, %s599_s21 }
  0x12   : > { %633 = vmatpush3.bf16.msra.mxu0 %v677_v2 }
  0x13   : > { %634 = vmatprep.subr.bf16.mxu0 %v709_v1 }
  0x16   : > { %635 = vmatpush3.bf16.msra.mxu0 %v678_v3 }
  0x17   : > { %636 = vmatprep.subr.bf16.mxu0 %v709_v1 }
  0x1a   : > { %637 = vmatpush3.bf16.msra.mxu0 %v679_v4 }
  0x1b   : > { %638 = vmatprep.subr.bf16.mxu0 %v709_v1 }
  0x1e   : > { %639 = vmatpush3.bf16.msra.mxu0 %v680_v5 }
  0x1f   : > { %640 = vmatprep.subr.bf16.mxu0 %v709_v1 }
  0x22   : > { %641 = vmatpush3.bf16.msra.mxu0 %v681_v6 }
  0x23   : > { %642 = vmatprep.subr.bf16.mxu0 %v709_v1 }
  0x26   : > { %643 = vmatpush3.bf16.msra.mxu0 %v682_v7 }
  0x27   : > { %644 = vmatprep.subr.bf16.mxu0 %v709_v1 }
  0x2a   : > { %645 = vmatpush3.bf16.msra.mxu0 %v683_v8 }
  0x2d   : > { %647 = vmatmul.mubr.bf16.vlgmr.msra.gmra.mxu0 %v684_v9 }
  0xed   : > { %v382_v10 = vpop.f32.mrf.mxu0 }
  0xee   : > { %v396_v13 = vmul.f32 %v382_v10, %v382_v10 }
  0xef   : > { %v648_v11 = vpop.f32.mrf.mxu0 }
  0xf1   : > { %v385_v12 = vpop.f32.mrf.mxu0 }
  0xf2   : > { %v389_v14 = vadd.f32 %v385_v12, %v382_v10  ;;  %v397_v15 = vmul.f32 %v385_v12, %v385_v12  ;;  %v619_v16 = vpack.c.bf16 %v385_v12, %v382_v10 }
  0xf3   : > { %v649_v17 = vpop.f32.mrf.mxu0 }
  0xf4   : > { %v390_v18 = vrot.slane %v389_v14, 4  ;;  %v398_v19 = vadd.f32 %v397_v15, %v396_v13  ;;  %620 = vst [vmem:[%s259_s20] sm:$0xff] %v619_v16  }
  0xf6   : > { %v391_v20 = vadd.f32 %v390_v18, %v389_v14  ;;  %v399_v21 = vrot.slane %v398_v19, 4 }
  0xf8   : > { %v392_v22 = vrot.slane %v391_v20, 2  ;;  %v400_v23 = vadd.f32 %v399_v21, %v398_v19 }
  0xfa   : > { %v393_v24 = vadd.f32 %v392_v22, %v391_v20  ;;  %v401_v25 = vrot.slane %v400_v23, 2 }
  0xfc   : > { %v394_v26 = vrot.slane %v393_v24, 1  ;;  %v402_v27 = vadd.f32 %v401_v25, %v400_v23 }
  0xfe   : > { %v395_v28 = vadd.f32 %v394_v26, %v393_v24  ;;  %v403_v29 = vrot.slane %v402_v27, 1 }
 0x100   : > { %v404_v30 = vadd.f32 %v403_v29, %v402_v27  ;;  %405 = vst [vmem:[%s267_s24] sm:$0xff] %v395_v28 }
 0x102   : > { %406 = vst [vmem:[%s274_s27] sm:$0xff] %v404_v30 }
 0x103 PF: > { %s15_s17 = sadd.s32 1, %s707_s17   ;;  %s809_s15 = smov %s703_s16 }
 0x104   : > { %p12_p6 = scmp.ge.s32.totalorder %s15_s17, 4   ;;  %s810_s16 = smov %s812_s18 }
 0x106   :  { %14 = sbr.rel (!%p12_p6) target bundleno = 2 (0x2), region = 85 }

// kernel: _lambda_.24
= control target key start
LH: loop header
LB: loop body
LE: loop exit
PB: predicated region body
PF: predicated region fallthrough
CT: control target
= control target key end

     0   :  { %s326_s12 = smov 0   ;;  %s343_s0 = inlined_call_operand.vmem [shape: bf16[32,128], index: 0, kind: input, shape index: {}]   ;;  %s344_s1 = inlined_call_operand.vmem [shape: f32[1,128], index: 1, kind: input, shape index: {}]   ;;  %s345_s2 = inlined_call_operand.vmem [shape: f32[1,128], index: 2, kind: input, shape index: {}]   ;;  %s346_s3 = inlined_call_operand.vmem [shape: bf16[32,128], index: 3, kind: output, shape index: {}]  }
   0x1 LB: > { %s264_s13 = sadd.s32 4294967295, %s304_s12   ;;  %p268_p0 = scmp.ge.s32.totalorder %s304_s12, 1  ;;  %s304_s12 = sphi %s326_s12, %s13_s12  }
   0x2   : > { %p138_p1 = scmp.lt.s32.totalorder %s304_s12, 3 }
   0x4   : > { %p139_p2 = pnand %p268_p0, %p138_p1 }
   0x5   : > { %s269_s14 = sshll.u32 (!%p139_p2), %s264_s13, 1 }
   0x6   : > { %142 = sbr.rel (%p139_p2) target bundleno = 26 (0x1a), region = 32  ;;  %p163_p3 = scmp.lt.s32.totalorder (!%p139_p2), %s269_s14, 3 }
   0xb   : > { %s348_s14 = smov (!%p163_p3, %s269_s14), 3  ;;  %v273_v1 = vld [vmem:[%s344_s1] ss:$0 sm:$0xff] }
   0xc   : > { %s270_s15 = sshll.u32 %s348_s14, 2  ;;  %v274_v4 = vld [vmem:[%s345_s2] ss:$0 sm:$0xff] }
   0xd   : > { %s166_s18 = scalar_lea.vmem %s343_s0, %s270_s15  ;;  %s172_s25 = scalar_lea.vmem %s346_s3, %s270_s15 }
   0xe   : > { %v282_v0 = vld [vmem:[%s166_s18] sm:$0xff]  }
   0xf   : > { %v283_v2 = vunpack.c.l.bf16 %v282_v0  ;;  %v284_v3 = vunpack.c.h.bf16 %v282_v0 }
  0x11   : > { %v185_v5 = vmul.f32 %v283_v2, %v273_v1  ;;  %v186_v6 = vmul.f32 %v284_v3, %v273_v1 }
  0x13   : > { %v194_v7 = vadd.f32 %v274_v4, %v185_v5  ;;  %v195_v8 = vadd.f32 %v274_v4, %v186_v6 }
  0x15   : > { %v196_v9 = vmax.f32 %v194_v7, 0.0  ;;  %v197_v10 = vmax.f32 %v195_v8, 0.0 }
  0x17   : > { %v288_v11 = vpack.c.bf16 %v197_v10, %v196_v9 }
  0x19   : > { %289 = vst [vmem:[%s172_s25] sm:$0xff] %v288_v11  }
  0x1a PF: > { %s13_s12 = sadd.s32 1, %s304_s12  }
  0x1b   : > { %p10_p4 = scmp.ge.s32.totalorder %s13_s12, 4  }
  0x1d   :  { %12 = sbr.rel (!%p10_p4) target bundleno = 1 (0x1), region = 62 }

// kernel: tile.28
= control target key start
LH: loop header
LB: loop body
LE: loop exit
PB: predicated region body
PF: predicated region fallthrough
CT: control target
= control target key end

     0   :  { %s22_s0 = inlined_call_operand.vmem [shape: f32[8], index: 0, kind: input, shape index: {}]   ;;  %s23_s1 = inlined_call_operand.vmem [shape: f32[4,8], index: 1, kind: output, shape index: {}]  }
   0x1   :  { %v4_v0 = vld [vmem:[%s22_s0] ss:$0 sm:$0xff] }
   0x2   :  { %5 = vst [vmem:[%s23_s1] sm:$0xf] %v4_v0 }

// kernel: _lambda_.28
= control target key start
LH: loop header
LB: loop body
LE: loop exit
PB: predicated region body
PF: predicated region fallthrough
CT: control target
= control target key end

     0   :  { %s324_s12 = smov 0   ;;  %s341_s0 = inlined_call_operand.vmem [shape: bf16[32,128], index: 0, kind: input, shape index: {}]   ;;  %s342_s1 = inlined_call_operand.vmem [shape: f32[1,128], index: 1, kind: input, shape index: {}]   ;;  %s343_s2 = inlined_call_operand.vmem [shape: f32[1,128], index: 2, kind: input, shape index: {}]   ;;  %s344_s3 = inlined_call_operand.vmem [shape: bf16[32,128], index: 3, kind: output, shape index: {}]  }
   0x1 LB: > { %s262_s13 = sadd.s32 4294967295, %s302_s12   ;;  %p266_p0 = scmp.ge.s32.totalorder %s302_s12, 1  ;;  %s302_s12 = sphi %s324_s12, %s13_s12  }
   0x2   : > { %p138_p1 = scmp.lt.s32.totalorder %s302_s12, 3 }
   0x4   : > { %p139_p2 = pnand %p266_p0, %p138_p1 }
   0x5   : > { %s267_s14 = sshll.u32 (!%p139_p2), %s262_s13, 1 }
   0x6   : > { %142 = sbr.rel (%p139_p2) target bundleno = 24 (0x18), region = 32  ;;  %p163_p3 = scmp.lt.s32.totalorder (!%p139_p2), %s267_s14, 3 }
   0xb   : > { %s346_s14 = smov (!%p163_p3, %s267_s14), 3  ;;  %v271_v1 = vld [vmem:[%s342_s1] ss:$0 sm:$0xff] }
   0xc   : > { %s268_s15 = sshll.u32 %s346_s14, 2  ;;  %v272_v4 = vld [vmem:[%s343_s2] ss:$0 sm:$0xff] }
   0xd   : > { %s166_s18 = scalar_lea.vmem %s341_s0, %s268_s15  ;;  %s172_s25 = scalar_lea.vmem %s344_s3, %s268_s15 }
   0xe   : > { %v280_v0 = vld [vmem:[%s166_s18] sm:$0xff]  }
   0xf   : > { %v281_v2 = vunpack.c.l.bf16 %v280_v0  ;;  %v282_v3 = vunpack.c.h.bf16 %v280_v0 }
  0x11   : > { %v185_v5 = vmul.f32 %v281_v2, %v271_v1  ;;  %v186_v6 = vmul.f32 %v282_v3, %v271_v1 }
  0x13   : > { %v194_v7 = vadd.f32 %v272_v4, %v185_v5  ;;  %v195_v8 = vadd.f32 %v272_v4, %v186_v6 }
  0x15   : > { %v286_v9 = vpack.c.bf16 %v195_v8, %v194_v7 }
  0x17   : > { %287 = vst [vmem:[%s172_s25] sm:$0xff] %v286_v9  }
  0x18 PF: > { %s13_s12 = sadd.s32 1, %s302_s12  }
  0x19   : > { %p10_p4 = scmp.ge.s32.totalorder %s13_s12, 4  }
  0x1b   :  { %12 = sbr.rel (!%p10_p4) target bundleno = 1 (0x1), region = 62 }

// kernel: tile.29
= control target key start
LH: loop header
LB: loop body
LE: loop exit
PB: predicated region body
PF: predicated region fallthrough
CT: control target
= control target key end

     0   :  { %vm8_vm0 = vcmask 64512   ;;  %s40_s8 = smov 8   ;;  %s41_s9 = smov 16   ;;  %vm14_vm1 = vcmask 261312   ;;  %vm20_vm2 = vcmask 195712   ;;  %vm26_vm3 = vcmask 130112   ;;  %s58_s0 = inlined_call_operand.vmem [shape: f32[4,8], index: 0, kind: input, shape index: {}]   ;;  %s59_s1 = inlined_call_operand.vmem [shape: f32[32], index: 1, kind: output, shape index: {}]  }
   0x1   :  { %v5_v0 = vld [vmem:[%s58_s0] sm:$0xf]  ;;  %s39_s0 = smov 24  }
   0x2   :  { %6 = vst [vmem:[#allocation1] sm:$0xf] %v5_v0 }
   0x9   :  { %v11_v1 = vld [vmem:[#allocation1 + $0x3] sm:$0x1]   ;;  %v23_v2 = vld [vmem:[#allocation1 + $0x1] sm:$0x1]   ;;  %v7_v3 = vld [vmem:[#allocation1] sm:$0x1]  }
   0xa   :  { %12 = vrot.lane.b32.xlu0 %v11_v1, %s39_s0  ;;  %24 = vrot.lane.b32.xlu1 %v23_v2, %s40_s8  ;;  %v17_v4 = vld [vmem:[#allocation1 + $0x2] sm:$0x1]   ;;  %9 = vst.msk [vmem:[#allocation0] sm:$0x1] %vm8_vm0, %v7_v3  }
   0xe   :  { %18 = vrot.lane.b32.xlu0 %v17_v4, %s41_s9 }
  0x7c   :  { %v13_v5 = vpop.permute.xlu0 %12   ;;  %v25_v6 = vpop.permute.xlu1 %24  }
  0x7d   :  { %15 = vst.msk [vmem:[#allocation0] sm:$0x1] %vm14_vm1, %v13_v5  }
  0x80   :  { %v19_v7 = vpop.permute.xlu0 %18  }
  0x81   :  { %21 = vst.msk [vmem:[#allocation0] sm:$0x1] %vm20_vm2, %v19_v7  }
  0x82   :  { %27 = vst.msk [vmem:[#allocation0] sm:$0x1] %vm26_vm3, %v25_v6  }
  0x89   :  { %v32_v8 = vld [vmem:[#allocation0] sm:$0x1] }
  0x8a   :  { %35 = vst [vmem:[%s59_s1] sm:$0x1] %v32_v8 }

// kernel: _lambda_.25
= control target key start
LH: loop header
LB: loop body
LE: loop exit
PB: predicated region body
PF: predicated region fallthrough
CT: control target
= control target key end

     0   :  { %s817_s15 = smov 0   ;;  %s819_s16 = smov 0   ;;  %s913_s0 = inlined_call_operand.vmem [shape: bf16[32,256], index: 0, kind: input, shape index: {}]   ;;  %s914_s1 = inlined_call_operand.vmem [shape: bf16[256,128], index: 1, kind: input, shape index: {}]   ;;  %s915_s2 = inlined_call_operand.vmem [shape: bf16[32,128], index: 2, kind: output, shape index: {0}]   ;;  %s916_s3 = inlined_call_operand.vmem [shape: f32[16,128], index: 3, kind: output, shape index: {1}]   ;;  %s917_s4 = inlined_call_operand.vmem [shape: f32[16,128], index: 4, kind: output, shape index: {2}]  }
   0x1   :  { %s821_s17 = smov 0  }
   0x2 LB: > { %s27_s18 = sadd.s32 1, %s786_s16  ;;  %p665_p0 = scmp.ge.s32.totalorder %s790_s17, 1  ;;  %s790_s17 = sphi %s821_s17, %s15_s17   ;;  %s786_s16 = sphi %s819_s16, %s919_s16   ;;  %s782_s15 = sphi %s817_s15, %s918_s15  }
   0x3   : > { %p29_p1 = scmp.ge.s32.totalorder %s27_s18, 2  ;;  %p196_p2 = scmp.lt.s32.totalorder %s790_s17, 3 }
   0x5   : > { %s921_s18 = smov (%p29_p1, %s27_s18), 0  ;;  %p197_p3 = pnand %p665_p0, %p196_p2 }
   0x6   : > { %s666_s21 = sshll.u32 (!%p197_p3), %s782_s15, 1  ;;  %p264_p5 = scmp.lt.s32.totalorder (!%p197_p3), %s782_s15, 1 }
   0x7   : > { %200 = sbr.rel (%p197_p3) target bundleno = 263 (0x107), region = 28  ;;  %p245_p4 = scmp.lt.s32.totalorder (!%p197_p3), %s666_s21, 3 }
   0xc   : > { %v749_v0 = vld [vmem:[%s914_s1 + $0x78] sm:$0xff]   ;;  %v751_v2 = vld [vmem:[%s914_s1 + $0x70] sm:$0xff]   ;;  %v753_v4 = vld [vmem:[%s914_s1 + $0x68] sm:$0xff]   ;;  %s923_s21 = smov (!%p245_p4, %s666_s21), 3  ;;  %s925_s15 = smov (!%p264_p5, %s782_s15), 1 }
   0xd   : > { %v750_v1 = vld [vmem:[%s914_s1 + $0x38] sm:$0xff]   ;;  %703 = vmatprep.subr.bf16.mxu0 %v749_v0  ;;  %v752_v3 = vld [vmem:[%s914_s1 + $0x30] sm:$0xff]   ;;  %v754_v5 = vld [vmem:[%s914_s1 + $0x28] sm:$0xff]   ;;  %s695_s10 = sshll.u32 %s923_s21, 3  ;;  %s670_s9 = sshll.u32 %s923_s21, 2 }
   0xe   : > { %704 = vmatpush3.bf16.msra.mxu0 %v750_v1  ;;  %v755_v6 = vld [vmem:[%s914_s1 + $0x60] sm:$0xff]   ;;  %v757_v8 = vld [vmem:[%s914_s1 + $0x58] sm:$0xff]   ;;  %s249_s19 = scalar_lea.vmem %s913_s0, %s695_s10  ;;  %v759_v10 = vld [vmem:[%s914_s1 + $0x50] sm:$0xff]   ;;  %s262_s12 = scalar_lea.vmem %s915_s2, %s670_s9 }
   0xf   : > { %705 = vmatprep.subr.bf16.mxu0 %v751_v2  ;;  %v756_v7 = vld [vmem:[%s914_s1 + $0x20] sm:$0xff]   ;;  %v758_v9 = vld [vmem:[%s914_s1 + $0x18] sm:$0xff]   ;;  %v760_v12 = vld [vmem:[%s914_s1 + $0x10] sm:$0xff]   ;;  %s671_s21 = sshll.u32 %s925_s15, 3 }
  0x10   : > { %v767_v11 = vld [vmem:[%s249_s19 + $0x4] ss:$8 sps:$4 sm:$0xff]   ;;  %v765_v17 = vld [vmem:[%s249_s19] ss:$8 sps:$4 sm:$0xff]   ;;  %s270_s19 = scalar_lea.vmem %s916_s3, %s671_s21  ;;  %s277_s23 = scalar_lea.vmem %s917_s4, %s671_s21 }
  0x11   : > { %451 = vmatprep.mubr.bf16.mxu0 %v767_v11  ;;  %v761_v13 = vld [vmem:[%s914_s1 + $0x48] sm:$0xff]   ;;  %v763_v15 = vld [vmem:[%s914_s1 + $0x40] sm:$0xff]  }
  0x12   : > { %706 = vmatpush3.bf16.msra.mxu0 %v752_v3  ;;  %v762_v14 = vld [vmem:[%s914_s1 + $0x8] sm:$0xff]   ;;  %v764_v16 = vld [vmem:[%s914_s1] sm:$0xff]  }
  0x13   : > { %707 = vmatprep.subr.bf16.mxu0 %v753_v4 }
  0x16   : > { %708 = vmatpush3.bf16.msra.mxu0 %v754_v5 }
  0x17   : > { %709 = vmatprep.subr.bf16.mxu0 %v755_v6 }
  0x1a   : > { %710 = vmatpush3.bf16.msra.mxu0 %v756_v7 }
  0x1b   : > { %711 = vmatprep.subr.bf16.mxu0 %v757_v8 }
  0x1e   : > { %712 = vmatpush3.bf16.msra.mxu0 %v758_v9 }
  0x1f   : > { %713 = vmatprep.subr.bf16.mxu0 %v759_v10 }
  0x22   : > { %714 = vmatpush3.bf16.msra.mxu0 %v760_v12 }
  0x23   : > { %715 = vmatprep.subr.bf16.mxu0 %v761_v13 }
  0x26   : > { %716 = vmatpush3.bf16.msra.mxu0 %v762_v14 }
  0x27   : > { %717 = vmatprep.subr.bf16.mxu0 %v763_v15 }
  0x2a   : > { %718 = vmatpush3.bf16.msra.mxu0 %v764_v16 }
  0x2d   : > { %452 = vmatmul.mubr.bf16.vlgmr.msra.gmra.mxu0 %v765_v17 }
  0xed   : > { %v719_v18 = vpop.f32.mrf.mxu0 }
  0xef   : > { %v720_v19 = vpop.f32.mrf.mxu0 }
  0xf0   : > { %v721_v21 = vadd.f32 %v720_v19, %v719_v18 }
  0xf1   : > { %v722_v20 = vpop.f32.mrf.mxu0 }
  0xf2   : > { %v467_v24 = vmul.f32 %v721_v21, %v721_v21 }
  0xf3   : > { %v723_v22 = vpop.f32.mrf.mxu0 }
  0xf4   : > { %v724_v23 = vadd.f32 %v723_v22, %v722_v20 }
  0xf6   : > { %v460_v25 = vadd.f32 %v724_v23, %v721_v21  ;;  %v468_v26 = vmul.f32 %v724_v23, %v724_v23  ;;  %v701_v27 = vpack.c.bf16 %v724_v23, %v721_v21 }
  0xf8   : > { %v461_v28 = vrot.slane %v460_v25, 4  ;;  %v469_v29 = vadd.f32 %v468_v26, %v467_v24  ;;  %702 = vst [vmem:[%s262_s12] sm:$0xff] %v701_v27  }
  0xfa   : > { %v462_v30 = vadd.f32 %v461_v28, %v460_v25  ;;  %v470_v31 = vrot.slane %v469_v29, 4 }
  0xfc   : > { %v463_v32 = vrot.slane %v462_v30, 2  ;;  %v471_v33 = vadd.f32 %v470_v31, %v469_v29 }
  0xfe   : > { %v464_v34 = vadd.f32 %v463_v32, %v462_v30  ;;  %v472_v35 = vrot.slane %v471_v33, 2 }
 0x100   : > { %v465_v36 = vrot.slane %v464_v34, 1  ;;  %v473_v37 = vadd.f32 %v472_v35, %v471_v33 }
 0x102   : > { %v466_v38 = vadd.f32 %v465_v36, %v464_v34  ;;  %v474_v39 = vrot.slane %v473_v37, 1 }
 0x104   : > { %v475_v40 = vadd.f32 %v474_v39, %v473_v37  ;;  %476 = vst [vmem:[%s270_s19] sm:$0xff] %v466_v38 }
 0x106   : > { %477 = vst [vmem:[%s277_s23] sm:$0xff] %v475_v40 }
 0x107 PF: > { %s15_s17 = sadd.s32 1, %s790_s17   ;;  %s918_s15 = smov %s786_s16 }
 0x108   : > { %p12_p6 = scmp.ge.s32.totalorder %s15_s17, 4   ;;  %s919_s16 = smov %s921_s18 }
 0x10a   :  { %14 = sbr.rel (!%p12_p6) target bundleno = 2 (0x2), region = 85 }

// kernel: _lambda_.31
= control target key start
LH: loop header
LB: loop body
LE: loop exit
PB: predicated region body
PF: predicated region fallthrough
CT: control target
= control target key end

     0   :  { %s1688_s15 = smov 0   ;;  %s1690_s16 = smov 0   ;;  %s1932_s0 = inlined_call_operand.vmem [shape: bf16[512,256], index: 0, kind: input, shape index: {}]   ;;  %s1933_s1 = inlined_call_operand.vmem [shape: bf16[256,128], index: 1, kind: input, shape index: {}]   ;;  %s1934_s2 = inlined_call_operand.vmem [shape: bf16[512,128], index: 2, kind: output, shape index: {0}]   ;;  %s1935_s3 = inlined_call_operand.vmem [shape: f32[16,128], index: 3, kind: output, shape index: {1}]   ;;  %s1936_s4 = inlined_call_operand.vmem [shape: f32[16,128], index: 4, kind: output, shape index: {2}]  }
   0x1   :  { %s1692_s17 = smov 0  }
   0x2 LB: > { %s27_s18 = sadd.s32 1, %s1657_s16  ;;  %p1205_p0 = scmp.ge.s32.totalorder %s1661_s17, 1  ;;  %s1661_s17 = sphi %s1692_s17, %s15_s17   ;;  %s1657_s16 = sphi %s1690_s16, %s1938_s16   ;;  %s1653_s15 = sphi %s1688_s15, %s1937_s15  }
   0x3   : > { %p29_p1 = scmp.ge.s32.totalorder %s27_s18, 2  ;;  %p196_p2 = scmp.lt.s32.totalorder %s1661_s17, 3 }
   0x5   : > { %s1940_s18 = smov (%p29_p1, %s27_s18), 0  ;;  %p197_p3 = pnand %p1205_p0, %p196_p2 }
   0x6   : > { %s1206_s21 = sshll.u32 (!%p197_p3), %s1653_s15, 5  ;;  %p264_p5 = scmp.lt.s32.totalorder (!%p197_p3), %s1653_s15, 1 }
   0x7   : > { %200 = sbr.rel (%p197_p3) target bundleno = 351 (0x15f), region = 28  ;;  %p245_p4 = scmp.lt.s32.totalorder (!%p197_p3), %s1206_s21, 63 }
   0xc   : > { %v1575_v0 = vld [vmem:[%s1933_s1 + $0x78] sm:$0xff]   ;;  %v1577_v2 = vld [vmem:[%s1933_s1 + $0x70] sm:$0xff]   ;;  %v1579_v4 = vld [vmem:[%s1933_s1 + $0x68] sm:$0xff]   ;;  %s1942_s21 = smov (!%p245_p4, %s1206_s21), 63  ;;  %s1944_s15 = smov (!%p264_p5, %s1653_s15), 1 }
   0xd   : > { %v1576_v1 = vld [vmem:[%s1933_s1 + $0x38] sm:$0xff]   ;;  %1423 = vmatprep.subr.bf16.mxu0 %v1575_v0  ;;  %1535 = vmatprep.subr.bf16.mxu1 %v1575_v0  ;;  %v1578_v3 = vld [vmem:[%s1933_s1 + $0x30] sm:$0xff]   ;;  %v1580_v5 = vld [vmem:[%s1933_s1 + $0x28] sm:$0xff]   ;;  %s1295_s10 = sshll.u32 %s1942_s21, 3  ;;  %s1210_s9 = sshll.u32 %s1942_s21, 2 }
   0xe   : > { %1424 = vmatpush3.bf16.msra.mxu0 %v1576_v1  ;;  %1543 = vmatpush3.bf16.msra.mxu1 %v1576_v1  ;;  %v1581_v6 = vld [vmem:[%s1933_s1 + $0x60] sm:$0xff]   ;;  %v1583_v8 = vld [vmem:[%s1933_s1 + $0x58] sm:$0xff]   ;;  %s1742_s19 = scalar_lea.vmem %s1932_s0, %s1295_s10  ;;  %v1585_v10 = vld [vmem:[%s1933_s1 + $0x50] sm:$0xff]   ;;  %s1807_s12 = scalar_lea.vmem %s1934_s2, %s1210_s9 }
   0xf   : > { %1425 = vmatprep.subr.bf16.mxu0 %v1577_v2  ;;  %1536 = vmatprep.subr.bf16.mxu1 %v1577_v2  ;;  %v1582_v7 = vld [vmem:[%s1933_s1 + $0x20] sm:$0xff]   ;;  %v1584_v9 = vld [vmem:[%s1933_s1 + $0x18] sm:$0xff]   ;;  %v1586_v12 = vld [vmem:[%s1933_s1 + $0x10] sm:$0xff]   ;;  %s1211_s21 = sshll.u32 %s1944_s15, 3 }
  0x10   : > { %v1593_v11 = vld [vmem:[%s1742_s19 + $0x4] ss:$8 sps:$4 sm:$0xff]   ;;  %v1591_v18 = vld [vmem:[%s1742_s19] ss:$8 sps:$4 sm:$0xff]   ;;  %v1594_v19 = vld [vmem:[%s1742_s19 + $0x14] ss:$8 sps:$4 sm:$0xff]   ;;  %s277_s23 = scalar_lea.vmem %s1936_s4, %s1211_s21 }
  0x11   : > { %631 = vmatprep.mubr.bf16.mxu0 %v1593_v11  ;;  %v1587_v13 = vld [vmem:[%s1933_s1 + $0x48] sm:$0xff]   ;;  %v1589_v16 = vld [vmem:[%s1933_s1 + $0x40] sm:$0xff]   ;;  %v1609_v21 = vld [vmem:[%s1742_s19 + $0x94] ss:$8 sps:$4 sm:$0xff]  }
  0x12   : > { %1426 = vmatpush3.bf16.msra.mxu0 %v1578_v3  ;;  %1544 = vmatpush3.bf16.msra.mxu1 %v1578_v3  ;;  %v1605_v14 = vld [vmem:[%s1742_s19 + $0x84] ss:$8 sps:$4 sm:$0xff]   ;;  %v1603_v20 = vld [vmem:[%s1742_s19 + $0x80] ss:$8 sps:$4 sm:$0xff]   ;;  %v1596_v22 = vld [vmem:[%s1742_s19 + $0x10] ss:$8 sps:$4 sm:$0xff]  }
  0x13   : > { %1427 = vmatprep.subr.bf16.mxu0 %v1579_v4  ;;  %1537 = vmatprep.subr.bf16.mxu1 %v1579_v4  ;;  %v1588_v15 = vld [vmem:[%s1933_s1 + $0x8] sm:$0xff]   ;;  %v1590_v17 = vld [vmem:[%s1933_s1] sm:$0xff]   ;;  %v1611_v24 = vld [vmem:[%s1742_s19 + $0x90] ss:$8 sps:$4 sm:$0xff]  }
  0x14   : > { %695 = vmatprep.mubr.bf16.mxu1 %v1605_v14  ;;  %v1597_v23 = vld [vmem:[%s1742_s19 + $0x24] ss:$8 sps:$4 sm:$0xff]   ;;  %v1599_v26 = vld [vmem:[%s1742_s19 + $0x20] ss:$8 sps:$4 sm:$0xff]   ;;  %v1600_v27 = vld [vmem:[%s1742_s19 + $0x34] ss:$8 sps:$4 sm:$0xff]  }
  0x15   : > { %v1615_v25 = vld [vmem:[%s1742_s19 + $0xa4] ss:$8 sps:$4 sm:$0xff]   ;;  %v1617_v28 = vld [vmem:[%s1742_s19 + $0xa0] ss:$8 sps:$4 sm:$0xff]   ;;  %v1621_v29 = vld [vmem:[%s1742_s19 + $0xb4] ss:$8 sps:$4 sm:$0xff]  }
  0x16   : > { %1428 = vmatpush3.bf16.msra.mxu0 %v1580_v5  ;;  %1545 = vmatpush3.bf16.msra.mxu1 %v1580_v5  ;;  %v1602_v30 = vld [vmem:[%s1742_s19 + $0x30] ss:$8 sps:$4 sm:$0xff]   ;;  %v1606_v31 = vld [vmem:[%s1742_s19 + $0x44] ss:$8 sps:$4 sm:$0xff]   ;;  %v1608_v34 = vld [vmem:[%s1742_s19 + $0x40] ss:$8 sps:$4 sm:$0xff]  }
  0x17   : > { %1429 = vmatprep.subr.bf16.mxu0 %v1581_v6  ;;  %1538 = vmatprep.subr.bf16.mxu1 %v1581_v6  ;;  %v1623_v32 = vld [vmem:[%s1742_s19 + $0xb0] ss:$8 sps:$4 sm:$0xff]   ;;  %v1627_v33 = vld [vmem:[%s1742_s19 + $0xc4] ss:$8 sps:$4 sm:$0xff]   ;;  %v1612_v35 = vld [vmem:[%s1742_s19 + $0x54] ss:$8 sps:$4 sm:$0xff]  }
  0x18   : > { %v1629_v36 = vld [vmem:[%s1742_s19 + $0xc0] ss:$8 sps:$4 sm:$0xff]   ;;  %v1630_v37 = vld [vmem:[%s1742_s19 + $0xd4] ss:$8 sps:$4 sm:$0xff]   ;;  %v1614_v38 = vld [vmem:[%s1742_s19 + $0x50] ss:$8 sps:$4 sm:$0xff]  }
  0x19   : > { %v1618_v39 = vld [vmem:[%s1742_s19 + $0x64] ss:$8 sps:$4 sm:$0xff]   ;;  %v1632_v40 = vld [vmem:[%s1742_s19 + $0xd0] ss:$8 sps:$4 sm:$0xff]   ;;  %v1620_v42 = vld [vmem:[%s1742_s19 + $0x60] ss:$8 sps:$4 sm:$0xff]  }
  0x1a   : > { %1430 = vmatpush3.bf16.msra.mxu0 %v1582_v7  ;;  %1546 = vmatpush3.bf16.msra.mxu1 %v1582_v7  ;;  %v1633_v41 = vld [vmem:[%s1742_s19 + $0xe4] ss:$8 sps:$4 sm:$0xff]   ;;  %v1624_v43 = vld [vmem:[%s1742_s19 + $0x74] ss:$8 sps:$4 sm:$0xff]   ;;  %v1635_v44 = vld [vmem:[%s1742_s19 + $0xe0] ss:$8 sps:$4 sm:$0xff]  }
  0x1b   : > { %1431 = vmatprep.subr.bf16.mxu0 %v1583_v8  ;;  %1539 = vmatprep.subr.bf16.mxu1 %v1583_v8  ;;  %v1636_v45 = vld [vmem:[%s1742_s19 + $0xf4] ss:$8 sps:$4 sm:$0xff]   ;;  %v1626_v46 = vld [vmem:[%s1742_s19 + $0x70] ss:$8 sps:$4 sm:$0xff]  }
  0x1c   : > { %v1638_v47 = vld [vmem:[%s1742_s19 + $0xf0] ss:$8 sps:$4 sm:$0xff]   ;;  %s270_s19 = scalar_lea.vmem %s1935_s3, %s1211_s21 }
  0x1e   : > { %1432 = vmatpush3.bf16.msra.mxu0 %v1584_v9  ;;  %1547 = vmatpush3.bf16.msra.mxu1 %v1584_v9 }
  0x1f   : > { %1433 = vmatprep.subr.bf16.mxu0 %v1585_v10  ;;  %1540 = vmatprep.subr.bf16.mxu1 %v1585_v10 }
  0x22   : > { %1434 = vmatpush3.bf16.msra.mxu0 %v1586_v12  ;;  %1548 = vmatpush3.bf16.msra.mxu1 %v1586_v12 }
  0x23   : > { %1435 = vmatprep.subr.bf16.mxu0 %v1587_v13  ;;  %1541 = vmatprep.subr.bf16.mxu1 %v1587_v13 }
  0x26   : > { %1436 = vmatpush3.bf16.msra.mxu0 %v1588_v15  ;;  %1549 = vmatpush3.bf16.msra.mxu1 %v1588_v15 }
  0x27   : > { %1437 = vmatprep.subr.bf16.mxu0 %v1589_v16  ;;  %1542 = vmatprep.subr.bf16.mxu1 %v1589_v16 }
  0x2a   : > { %1438 = vmatpush3.bf16.msra.mxu0 %v1590_v17  ;;  %1550 = vmatpush3.bf16.msra.mxu1 %v1590_v17 }
  0x2d   : > { %632 = vmatmul.mubr.bf16.vlgmr.msra.gmra.mxu0 %v1591_v18  ;;  %696 = vmatmul.mubr.bf16.vlgmr.msra.gmra.mxu1 %v1603_v20 }
  0x2e   : > { %639 = vmatprep.mubr.bf16.mxu0 %v1594_v19  ;;  %703 = vmatprep.mubr.bf16.mxu1 %v1609_v21 }
  0x35   : > { %640 = vmatmul.mubr.bf16.gmra.mxu0 %v1596_v22  ;;  %704 = vmatmul.mubr.bf16.gmra.mxu1 %v1611_v24 }
  0x36   : > { %647 = vmatprep.mubr.bf16.mxu0 %v1597_v23  ;;  %711 = vmatprep.mubr.bf16.mxu1 %v1615_v25 }
  0x3d   : > { %648 = vmatmul.mubr.bf16.gmra.mxu0 %v1599_v26  ;;  %712 = vmatmul.mubr.bf16.gmra.mxu1 %v1617_v28 }
  0x3e   : > { %655 = vmatprep.mubr.bf16.mxu0 %v1600_v27  ;;  %719 = vmatprep.mubr.bf16.mxu1 %v1621_v29 }
  0x45   : > { %656 = vmatmul.mubr.bf16.gmra.mxu0 %v1602_v30  ;;  %720 = vmatmul.mubr.bf16.gmra.mxu1 %v1623_v32 }
  0x46   : > { %663 = vmatprep.mubr.bf16.mxu0 %v1606_v31  ;;  %727 = vmatprep.mubr.bf16.mxu1 %v1627_v33 }
  0x4d   : > { %664 = vmatmul.mubr.bf16.gmra.mxu0 %v1608_v34  ;;  %728 = vmatmul.mubr.bf16.gmra.mxu1 %v1629_v36 }
  0x4e   : > { %671 = vmatprep.mubr.bf16.mxu0 %v1612_v35  ;;  %735 = vmatprep.mubr.bf16.mxu1 %v1630_v37 }
  0x55   : > { %672 = vmatmul.mubr.bf16.gmra.mxu0 %v1614_v38  ;;  %736 = vmatmul.mubr.bf16.gmra.mxu1 %v1632_v40 }
  0x56   : > { %679 = vmatprep.mubr.bf16.mxu0 %v1618_v39  ;;  %743 = vmatprep.mubr.bf16.mxu1 %v1633_v41 }
  0x5d   : > { %680 = vmatmul.mubr.bf16.gmra.mxu0 %v1620_v42  ;;  %744 = vmatmul.mubr.bf16.gmra.mxu1 %v1635_v44 }
  0x5e   : > { %687 = vmatprep.mubr.bf16.mxu0 %v1624_v43  ;;  %751 = vmatprep.mubr.bf16.mxu1 %v1636_v45 }
  0x65   : > { %688 = vmatmul.mubr.bf16.gmra.mxu0 %v1626_v46  ;;  %752 = vmatmul.mubr.bf16.gmra.mxu1 %v1638_v47 }
  0xed   : > { %v1439_v48 = vpop.f32.mrf.mxu0  ;;  %v1487_v49 = vpop.f32.mrf.mxu1 }
  0xef   : > { %v1440_v50 = vpop.f32.mrf.mxu0  ;;  %v1488_v51 = vpop.f32.mrf.mxu1 }
  0xf0   : > { %v1798_v55 = vadd.f32 %v1488_v51, %v1487_v49  ;;  %v1800_v56 = vadd.f32 %v1440_v50, %v1439_v48 }
  0xf1   : > { %v1442_v52 = vpop.f32.mrf.mxu0  ;;  %v1490_v53 = vpop.f32.mrf.mxu1 }
  0xf2   : > { %v797_v45 = vmul.f32 %v1800_v56, %v1800_v56 }
  0xf3   : > { %v1443_v54 = vpop.f32.mrf.mxu0  ;;  %v1491_v58 = vpop.f32.mrf.mxu1 }
  0xf4   : > { %v1802_v57 = vadd.f32 %v1443_v54, %v1442_v52  ;;  %v1809_v60 = vadd.f32 %v1491_v58, %v1490_v53 }
  0xf5   : > { %v1445_v59 = vpop.f32.mrf.mxu0  ;;  %v1493_v62 = vpop.f32.mrf.mxu1 }
  0xf6   : > { %v1331_v61 = vpack.c.bf16 %v1802_v57, %v1800_v56  ;;  %v1371_v0 = vpack.c.bf16 %v1809_v60, %v1798_v55  ;;  %v798_v41 = vmul.f32 %v1802_v57, %v1802_v57  ;;  %v760_v48 = vadd.f32 %v1802_v57, %v1800_v56 }
  0xf7   : > { %v1446_v63 = vpop.f32.mrf.mxu0  ;;  %v1494_v1 = vpop.f32.mrf.mxu1 }
  0xf8   : > { %1332 = vst [vmem:[%s1807_s12] sm:$0xff] %v1331_v61   ;;  %1415 = vst [vmem:[%s1807_s12 + $0x40] sm:$0xff] %v1371_v0   ;;  %v1817_v5 = vadd.f32 %v1494_v1, %v1493_v62  ;;  %v1447_v6 = vadd.f32 %v1446_v63, %v1445_v59  ;;  %v829_v50 = vadd.f32 %v798_v41, %v797_v45 }
  0xf9   : > { %v1448_v2 = vpop.f32.mrf.mxu0  ;;  %v1496_v3 = vpop.f32.mrf.mxu1 }
  0xfa   : > { %v799_v46 = vmul.f32 %v1447_v6, %v1447_v6  ;;  %v761_v54 = vadd.f32 %v1447_v6, %v760_v48 }
  0xfb   : > { %v1449_v4 = vpop.f32.mrf.mxu0  ;;  %v1497_v8 = vpop.f32.mrf.mxu1 }
  0xfc   : > { %v1450_v7 = vadd.f32 %v1449_v4, %v1448_v2  ;;  %v1819_v10 = vadd.f32 %v1497_v8, %v1496_v3  ;;  %v830_v62 = vadd.f32 %v829_v50, %v799_v46 }
  0xfd   : > { %v1451_v9 = vpop.f32.mrf.mxu0  ;;  %v1499_v12 = vpop.f32.mrf.mxu1 }
  0xfe   : > { %v1336_v11 = vpack.c.bf16 %v1450_v7, %v1447_v6  ;;  %v1376_v14 = vpack.c.bf16 %v1819_v10, %v1817_v5  ;;  %v800_v51 = vmul.f32 %v1450_v7, %v1450_v7  ;;  %v762_v2 = vadd.f32 %v1450_v7, %v761_v54 }
  0xff   : > { %v1452_v13 = vpop.f32.mrf.mxu0  ;;  %v1500_v15 = vpop.f32.mrf.mxu1 }
 0x100   : > { %1408 = vst [vmem:[%s1807_s12 + $0x8] sm:$0xff] %v1336_v11   ;;  %1416 = vst [vmem:[%s1807_s12 + $0x48] sm:$0xff] %v1376_v14   ;;  %v1825_v19 = vadd.f32 %v1500_v15, %v1499_v12  ;;  %v1453_v20 = vadd.f32 %v1452_v13, %v1451_v9  ;;  %v831_v57 = vadd.f32 %v830_v62, %v800_v51 }
 0x101   : > { %v1454_v16 = vpop.f32.mrf.mxu0  ;;  %v1502_v17 = vpop.f32.mrf.mxu1 }
 0x102   : > { %v801_v63 = vmul.f32 %v1453_v20, %v1453_v20  ;;  %v763_v6 = vadd.f32 %v1453_v20, %v762_v2 }
 0x103   : > { %v1455_v18 = vpop.f32.mrf.mxu0  ;;  %v1503_v22 = vpop.f32.mrf.mxu1 }
 0x104   : > { %v1456_v21 = vadd.f32 %v1455_v18, %v1454_v16  ;;  %v1827_v24 = vadd.f32 %v1503_v22, %v1502_v17  ;;  %v832_v12 = vadd.f32 %v831_v57, %v801_v63 }
 0x105   : > { %v1457_v23 = vpop.f32.mrf.mxu0  ;;  %v1505_v26 = vpop.f32.mrf.mxu1 }
 0x106   : > { %v1341_v25 = vpack.c.bf16 %v1456_v21, %v1453_v20  ;;  %v1381_v28 = vpack.c.bf16 %v1827_v24, %v1825_v19  ;;  %v802_v4 = vmul.f32 %v1456_v21, %v1456_v21  ;;  %v764_v14 = vadd.f32 %v1456_v21, %v763_v6 }
 0x107   : > { %v1458_v27 = vpop.f32.mrf.mxu0  ;;  %v1506_v29 = vpop.f32.mrf.mxu1 }
 0x108   : > { %1409 = vst [vmem:[%s1807_s12 + $0x10] sm:$0xff] %v1341_v25   ;;  %1417 = vst [vmem:[%s1807_s12 + $0x50] sm:$0xff] %v1381_v28   ;;  %v1833_v33 = vadd.f32 %v1506_v29, %v1505_v26  ;;  %v1459_v34 = vadd.f32 %v1458_v27, %v1457_v23  ;;  %v833_v17 = vadd.f32 %v832_v12, %v802_v4 }
 0x109   : > { %v1460_v30 = vpop.f32.mrf.mxu0  ;;  %v1508_v31 = vpop.f32.mrf.mxu1 }
 0x10a   : > { %v803_v15 = vmul.f32 %v1459_v34, %v1459_v34  ;;  %v765_v22 = vadd.f32 %v1459_v34, %v764_v14 }
 0x10b   : > { %v1461_v32 = vpop.f32.mrf.mxu0  ;;  %v1509_v36 = vpop.f32.mrf.mxu1 }
 0x10c   : > { %v1462_v35 = vadd.f32 %v1461_v32, %v1460_v30  ;;  %v1835_v38 = vadd.f32 %v1509_v36, %v1508_v31  ;;  %v834_v29 = vadd.f32 %v833_v17, %v803_v15 }
 0x10d   : > { %v1463_v37 = vpop.f32.mrf.mxu0  ;;  %v1511_v40 = vpop.f32.mrf.mxu1 }
 0x10e   : > { %v1346_v39 = vpack.c.bf16 %v1462_v35, %v1459_v34  ;;  %v1386_v43 = vpack.c.bf16 %v1835_v38, %v1833_v33  ;;  %v804_v23 = vmul.f32 %v1462_v35, %v1462_v35  ;;  %v766_v30 = vadd.f32 %v1462_v35, %v765_v22 }
 0x10f   : > { %v1464_v42 = vpop.f32.mrf.mxu0  ;;  %v1512_v44 = vpop.f32.mrf.mxu1 }
 0x110   : > { %1410 = vst [vmem:[%s1807_s12 + $0x18] sm:$0xff] %v1346_v39   ;;  %1418 = vst [vmem:[%s1807_s12 + $0x58] sm:$0xff] %v1386_v43   ;;  %v1847_v53 = vadd.f32 %v1512_v44, %v1511_v40  ;;  %v1465_v58 = vadd.f32 %v1464_v42, %v1463_v37  ;;  %v835_v39 = vadd.f32 %v834_v29, %v804_v23 }
 0x111   : > { %v1466_v47 = vpop.f32.mrf.mxu0  ;;  %v1514_v49 = vpop.f32.mrf.mxu1 }
 0x112   : > { %v805_v31 = vmul.f32 %v1465_v58, %v1465_v58  ;;  %v767_v34 = vadd.f32 %v1465_v58, %v766_v30 }
 0x113   : > { %v1467_v52 = vpop.f32.mrf.mxu0  ;;  %v1515_v61 = vpop.f32.mrf.mxu1 }
 0x114   : > { %v1468_v59 = vadd.f32 %v1467_v52, %v1466_v47  ;;  %v1849_v1 = vadd.f32 %v1515_v61, %v1514_v49  ;;  %v836_v43 = vadd.f32 %v835_v39, %v805_v31 }
 0x115   : > { %v1469_v0 = vpop.f32.mrf.mxu0  ;;  %v1517_v56 = vpop.f32.mrf.mxu1 }
 0x116   : > { %v1351_v3 = vpack.c.bf16 %v1468_v59, %v1465_v58  ;;  %v1391_v9 = vpack.c.bf16 %v1849_v1, %v1847_v53  ;;  %v806_v40 = vmul.f32 %v1468_v59, %v1468_v59  ;;  %v768_v44 = vadd.f32 %v1468_v59, %v767_v34 }
 0x117   : > { %v1470_v8 = vpop.f32.mrf.mxu0  ;;  %v1518_v11 = vpop.f32.mrf.mxu1 }
 0x118   : > { %1411 = vst [vmem:[%s1807_s12 + $0x20] sm:$0xff] %v1351_v3   ;;  %1419 = vst [vmem:[%s1807_s12 + $0x60] sm:$0xff] %v1391_v9   ;;  %v1855_v7 = vadd.f32 %v1518_v11, %v1517_v56  ;;  %v1471_v25 = vadd.f32 %v1470_v8, %v1469_v0  ;;  %v837_v49 = vadd.f32 %v836_v43, %v806_v40 }
 0x119   : > { %v1472_v13 = vpop.f32.mrf.mxu0  ;;  %v1520_v16 = vpop.f32.mrf.mxu1  ;;  %v815_v40 = vmul.f32 %v1817_v5, %v1817_v5  ;;  %v816_v43 = vmul.f32 %v1819_v10, %v1819_v10 }
 0x11a   : > { %v807_v45 = vmul.f32 %v1471_v25, %v1471_v25  ;;  %v769_v50 = vadd.f32 %v1471_v25, %v768_v44 }
 0x11b   : > { %v1473_v18 = vpop.f32.mrf.mxu0  ;;  %v1521_v27 = vpop.f32.mrf.mxu1 }
 0x11c   : > { %v1474_v26 = vadd.f32 %v1473_v18, %v1472_v13  ;;  %v1857_v28 = vadd.f32 %v1521_v27, %v1520_v16  ;;  %v838_v62 = vadd.f32 %v837_v49, %v807_v45  ;;  %v817_v45 = vmul.f32 %v1825_v19, %v1825_v19 }
 0x11d   : > { %v1475_v20 = vpop.f32.mrf.mxu0  ;;  %v1523_v32 = vpop.f32.mrf.mxu1 }
 0x11e   : > { %v1356_v21 = vpack.c.bf16 %v1474_v26, %v1471_v25  ;;  %v1396_v37 = vpack.c.bf16 %v1857_v28, %v1855_v7  ;;  %v808_v51 = vmul.f32 %v1474_v26, %v1474_v26  ;;  %v770_v63 = vadd.f32 %v1474_v26, %v769_v50 }
 0x11f   : > { %v1476_v36 = vpop.f32.mrf.mxu0  ;;  %v1524_v41 = vpop.f32.mrf.mxu1 }
 0x120   : > { %1412 = vst [vmem:[%s1807_s12 + $0x28] sm:$0xff] %v1356_v21   ;;  %1420 = vst [vmem:[%s1807_s12 + $0x68] sm:$0xff] %v1396_v37   ;;  %v1477_v46 = vadd.f32 %v1476_v36, %v1475_v20  ;;  %v1863_v48 = vadd.f32 %v1524_v41, %v1523_v32  ;;  %v839_v57 = vadd.f32 %v838_v62, %v808_v51 }
 0x121   : > { %v1478_v42 = vpop.f32.mrf.mxu0  ;;  %v1526_v47 = vpop.f32.mrf.mxu1  ;;  %v813_v21 = vmul.f32 %v1798_v55, %v1798_v55  ;;  %v814_v37 = vmul.f32 %v1809_v60, %v1809_v60 }
 0x122   : > { %v809_v0 = vmul.f32 %v1477_v46, %v1477_v46  ;;  %v771_v4 = vadd.f32 %v1477_v46, %v770_v63  ;;  %v822_v63 = vmul.f32 %v1849_v1, %v1849_v1 }
 0x123   : > { %v1479_v35 = vpop.f32.mrf.mxu0  ;;  %v1527_v54 = vpop.f32.mrf.mxu1 }
 0x124   : > { %v1480_v52 = vadd.f32 %v1479_v35, %v1478_v42  ;;  %v1865_v61 = vadd.f32 %v1527_v54, %v1526_v47  ;;  %v840_v12 = vadd.f32 %v839_v57, %v809_v0 }
 0x125   : > { %v1481_v58 = vpop.f32.mrf.mxu0  ;;  %v1529_v2 = vpop.f32.mrf.mxu1 }
 0x126   : > { %v1361_v59 = vpack.c.bf16 %v1480_v52, %v1477_v46  ;;  %v1401_v56 = vpack.c.bf16 %v1865_v61, %v1863_v48  ;;  %v810_v8 = vmul.f32 %v1480_v52, %v1480_v52  ;;  %v772_v13 = vadd.f32 %v1480_v52, %v771_v4 }
 0x127   : > { %v1482_v3 = vpop.f32.mrf.mxu0  ;;  %v1530_v6 = vpop.f32.mrf.mxu1 }
 0x128   : > { %1413 = vst [vmem:[%s1807_s12 + $0x30] sm:$0xff] %v1361_v59   ;;  %v1483_v9 = vadd.f32 %v1482_v3, %v1481_v58  ;;  %1421 = vst [vmem:[%s1807_s12 + $0x70] sm:$0xff] %v1401_v56   ;;  %v1531_v17 = vadd.f32 %v1530_v6, %v1529_v2  ;;  %v841_v18 = vadd.f32 %v840_v12, %v810_v8 }
 0x129   : > { %v1484_v11 = vpop.f32.mrf.mxu0  ;;  %v1532_v15 = vpop.f32.mrf.mxu1 }
 0x12a   : > { %v811_v14 = vmul.f32 %v1483_v9, %v1483_v9  ;;  %v773_v22 = vadd.f32 %v1483_v9, %v772_v13 }
 0x12b   : > { %v1485_v16 = vpop.f32.mrf.mxu0  ;;  %v1533_v25 = vpop.f32.mrf.mxu1 }
 0x12c   : > { %v1486_v23 = vadd.f32 %v1485_v16, %v1484_v11  ;;  %v1534_v26 = vadd.f32 %v1533_v25, %v1532_v15  ;;  %v842_v27 = vadd.f32 %v841_v18, %v811_v14  ;;  %v827_v11 = vmul.f32 %v1531_v17, %v1531_v17 }
 0x12e   : > { %v774_v20 = vadd.f32 %v1486_v23, %v773_v22  ;;  %v812_v29 = vmul.f32 %v1486_v23, %v1486_v23  ;;  %v1366_v30 = vpack.c.bf16 %v1486_v23, %v1483_v9  ;;  %v1406_v31 = vpack.c.bf16 %v1534_v26, %v1531_v17 }
 0x12f   : > { %v826_v9 = vmul.f32 %v1865_v61, %v1865_v61 }
 0x130   : > { %v775_v32 = vadd.f32 %v1798_v55, %v774_v20  ;;  %v843_v36 = vadd.f32 %v842_v27, %v812_v29  ;;  %1414 = vst [vmem:[%s1807_s12 + $0x38] sm:$0xff] %v1366_v30   ;;  %1422 = vst [vmem:[%s1807_s12 + $0x78] sm:$0xff] %v1406_v31  }
 0x132   : > { %v776_v39 = vadd.f32 %v1809_v60, %v775_v32  ;;  %v844_v34 = vadd.f32 %v843_v36, %v813_v21  ;;  %v818_v60 = vmul.f32 %v1827_v24, %v1827_v24 }
 0x134   : > { %v777_v41 = vadd.f32 %v1817_v5, %v776_v39  ;;  %v845_v42 = vadd.f32 %v844_v34, %v814_v37  ;;  %v819_v5 = vmul.f32 %v1833_v33, %v1833_v33 }
 0x136   : > { %v778_v55 = vadd.f32 %v1819_v10, %v777_v41  ;;  %v846_v44 = vadd.f32 %v845_v42, %v815_v40  ;;  %v820_v10 = vmul.f32 %v1835_v38, %v1835_v38 }
 0x138   : > { %v847_v46 = vadd.f32 %v846_v44, %v816_v43  ;;  %v779_v47 = vadd.f32 %v1825_v19, %v778_v55  ;;  %v821_v19 = vmul.f32 %v1847_v53, %v1847_v53 }
 0x13a   : > { %v780_v35 = vadd.f32 %v1827_v24, %v779_v47  ;;  %v848_v49 = vadd.f32 %v847_v46, %v817_v45 }
 0x13c   : > { %v781_v50 = vadd.f32 %v1833_v33, %v780_v35  ;;  %v849_v51 = vadd.f32 %v848_v49, %v818_v60 }
 0x13e   : > { %v782_v52 = vadd.f32 %v1835_v38, %v781_v50  ;;  %v850_v54 = vadd.f32 %v849_v51, %v819_v5  ;;  %v823_v38 = vmul.f32 %v1855_v7, %v1855_v7 }
 0x140   : > { %v783_v58 = vadd.f32 %v1847_v53, %v782_v52  ;;  %v851_v62 = vadd.f32 %v850_v54, %v820_v10  ;;  %v824_v53 = vmul.f32 %v1857_v28, %v1857_v28 }
 0x142   : > { %v784_v24 = vadd.f32 %v1849_v1, %v783_v58  ;;  %v852_v0 = vadd.f32 %v851_v62, %v821_v19  ;;  %v825_v1 = vmul.f32 %v1863_v48, %v1863_v48 }
 0x144   : > { %v853_v33 = vadd.f32 %v852_v0, %v822_v63  ;;  %v785_v59 = vadd.f32 %v1855_v7, %v784_v24 }
 0x146   : > { %v854_v2 = vadd.f32 %v853_v33, %v823_v38  ;;  %v786_v3 = vadd.f32 %v1857_v28, %v785_v59  ;;  %v828_v28 = vmul.f32 %v1534_v26, %v1534_v26 }
 0x148   : > { %v855_v56 = vadd.f32 %v854_v2, %v824_v53  ;;  %v787_v57 = vadd.f32 %v1863_v48, %v786_v3 }
 0x14a   : > { %v856_v4 = vadd.f32 %v855_v56, %v825_v1  ;;  %v788_v8 = vadd.f32 %v1865_v61, %v787_v57 }
 0x14c   : > { %v857_v7 = vadd.f32 %v856_v4, %v826_v9  ;;  %v789_v6 = vadd.f32 %v1531_v17, %v788_v8 }
 0x14e   : > { %v858_v12 = vadd.f32 %v857_v7, %v827_v11  ;;  %v790_v13 = vadd.f32 %v1534_v26, %v789_v6 }
 0x150   : > { %v791_v14 = vrot.slane %v790_v13, 4  ;;  %v859_v15 = vadd.f32 %v858_v12, %v828_v28 }
 0x152   : > { %v792_v16 = vadd.f32 %v791_v14, %v790_v13  ;;  %v860_v18 = vrot.slane %v859_v15, 4 }
 0x154   : > { %v793_v22 = vrot.slane %v792_v16, 2  ;;  %v861_v48 = vadd.f32 %v860_v18, %v859_v15 }
 0x156   : > { %v794_v23 = vadd.f32 %v793_v22, %v792_v16  ;;  %v862_v25 = vrot.slane %v861_v48, 2 }
 0x158   : > { %v795_v27 = vrot.slane %v794_v23, 1  ;;  %v863_v20 = vadd.f32 %v862_v25, %v861_v48 }
 0x15a   : > { %v796_v61 = vadd.f32 %v795_v27, %v794_v23  ;;  %v864_v17 = vrot.slane %v863_v20, 1 }
 0x15c   : > { %v865_v26 = vadd.f32 %v864_v17, %v863_v20  ;;  %866 = vst [vmem:[%s270_s19] sm:$0xff] %v796_v61 }
 0x15e   : > { %867 = vst [vmem:[%s277_s23] sm:$0xff] %v865_v26 }
 0x15f PF: > { %s15_s17 = sadd.s32 1, %s1661_s17   ;;  %s1937_s15 = smov %s1657_s16 }
 0x160   : > { %p12_p6 = scmp.ge.s32.totalorder %s15_s17, 4   ;;  %s1938_s16 = smov %s1940_s18 }
 0x162   :  { %14 = sbr.rel (!%p12_p6) target bundleno = 2 (0x2), region = 85 }

// kernel: _lambda_.32
= control target key start
LH: loop header
LB: loop body
LE: loop exit
PB: predicated region body
PF: predicated region fallthrough
CT: control target
= control target key end

     0   :  { %s851_s12 = smov 0   ;;  %s985_s0 = inlined_call_operand.vmem [shape: bf16[512,128], index: 0, kind: input, shape index: {}]   ;;  %s986_s1 = inlined_call_operand.vmem [shape: f32[1,128], index: 1, kind: input, shape index: {}]   ;;  %s987_s2 = inlined_call_operand.vmem [shape: f32[1,128], index: 2, kind: input, shape index: {}]   ;;  %s988_s3 = inlined_call_operand.vmem [shape: bf16[512,128], index: 3, kind: output, shape index: {}]  }
   0x1 LB: > { %s564_s13 = sadd.s32 4294967295, %s829_s12   ;;  %p568_p0 = scmp.ge.s32.totalorder %s829_s12, 1  ;;  %s829_s12 = sphi %s851_s12, %s13_s12  }
   0x2   : > { %p138_p1 = scmp.lt.s32.totalorder %s829_s12, 3 }
   0x4   : > { %p139_p2 = pnand %p568_p0, %p138_p1 }
   0x5   : > { %s569_s14 = sshll.u32 (!%p139_p2), %s564_s13, 5 }
   0x6   : > { %142 = sbr.rel (%p139_p2) target bundleno = 57 (0x39), region = 32  ;;  %p163_p3 = scmp.lt.s32.totalorder (!%p139_p2), %s569_s14, 63 }
   0xb   : > { %s990_s14 = smov (!%p163_p3, %s569_s14), 63  ;;  %v872_v0 = vld [vmem:[%s986_s1] ss:$0 sm:$0xff] }
   0xc   : > { %s570_s15 = sshll.u32 %s990_s14, 2  ;;  %v881_v9 = vld [vmem:[%s987_s2] ss:$0 sm:$0xff] }
   0xd   : > { %s867_s18 = scalar_lea.vmem %s985_s0, %s570_s15  ;;  %s906_s25 = scalar_lea.vmem %s988_s3, %s570_s15 }
   0xe   : > { %v642_v1 = vld [vmem:[%s867_s18] sm:$0xff]   ;;  %v785_v2 = vld [vmem:[%s867_s18 + $0x8] sm:$0xff]   ;;  %v786_v3 = vld [vmem:[%s867_s18 + $0x10] sm:$0xff]  }
   0xf   : > { %v643_v4 = vunpack.c.l.bf16 %v642_v1  ;;  %v644_v5 = vunpack.c.h.bf16 %v642_v1  ;;  %v647_v6 = vunpack.c.l.bf16 %v785_v2  ;;  %v648_v7 = vunpack.c.h.bf16 %v785_v2  ;;  %v787_v8 = vld [vmem:[%s867_s18 + $0x18] sm:$0xff]   ;;  %v788_v30 = vld [vmem:[%s867_s18 + $0x20] sm:$0xff]   ;;  %v789_v35 = vld [vmem:[%s867_s18 + $0x28] sm:$0xff]  }
  0x10   : > { %v651_v10 = vunpack.c.l.bf16 %v786_v3  ;;  %v652_v11 = vunpack.c.h.bf16 %v786_v3  ;;  %v655_v12 = vunpack.c.l.bf16 %v787_v8  ;;  %v656_v13 = vunpack.c.h.bf16 %v787_v8  ;;  %v790_v40 = vld [vmem:[%s867_s18 + $0x30] sm:$0xff]   ;;  %v791_v45 = vld [vmem:[%s867_s18 + $0x38] sm:$0xff]   ;;  %v792_v3 = vld [vmem:[%s867_s18 + $0x40] sm:$0xff]  }
  0x11   : > { %v245_v14 = vmul.f32 %v643_v4, %v872_v0  ;;  %v246_v15 = vmul.f32 %v644_v5, %v872_v0  ;;  %v247_v16 = vmul.f32 %v647_v6, %v872_v0  ;;  %v248_v17 = vmul.f32 %v648_v7, %v872_v0 }
  0x12   : > { %v249_v18 = vmul.f32 %v651_v10, %v872_v0  ;;  %v250_v19 = vmul.f32 %v652_v11, %v872_v0  ;;  %v251_v20 = vmul.f32 %v655_v12, %v872_v0  ;;  %v252_v21 = vmul.f32 %v656_v13, %v872_v0  ;;  %v793_v13 = vld [vmem:[%s867_s18 + $0x48] sm:$0xff]  }
  0x13   : > { %v284_v22 = vadd.f32 %v881_v9, %v245_v14  ;;  %v285_v23 = vadd.f32 %v881_v9, %v246_v15  ;;  %v286_v24 = vadd.f32 %v881_v9, %v247_v16  ;;  %v287_v25 = vadd.f32 %v881_v9, %v248_v17 }
  0x14   : > { %v288_v26 = vadd.f32 %v881_v9, %v249_v18  ;;  %v289_v27 = vadd.f32 %v881_v9, %v250_v19  ;;  %v290_v28 = vadd.f32 %v881_v9, %v251_v20  ;;  %v291_v29 = vadd.f32 %v881_v9, %v252_v21  ;;  %v794_v18 = vld [vmem:[%s867_s18 + $0x50] sm:$0xff]  }
  0x15   : > { %v316_v31 = vmax.f32 %v284_v22, 0.0  ;;  %v317_v32 = vmax.f32 %v285_v23, 0.0  ;;  %v318_v33 = vmax.f32 %v286_v24, 0.0  ;;  %v319_v34 = vmax.f32 %v287_v25, 0.0  ;;  %v795_v23 = vld [vmem:[%s867_s18 + $0x58] sm:$0xff]  }
  0x16   : > { %v320_v36 = vmax.f32 %v288_v26, 0.0  ;;  %v321_v37 = vmax.f32 %v289_v27, 0.0  ;;  %v322_v38 = vmax.f32 %v290_v28, 0.0  ;;  %v323_v39 = vmax.f32 %v291_v29, 0.0 }
  0x17   : > { %v708_v41 = vpack.c.bf16 %v317_v32, %v316_v31  ;;  %v713_v42 = vpack.c.bf16 %v319_v34, %v318_v33  ;;  %v659_v43 = vunpack.c.l.bf16 %v788_v30  ;;  %v660_v44 = vunpack.c.h.bf16 %v788_v30 }
  0x18   : > { %v718_v46 = vpack.c.bf16 %v321_v37, %v320_v36  ;;  %v723_v47 = vpack.c.bf16 %v323_v39, %v322_v38  ;;  %v663_v48 = vunpack.c.l.bf16 %v789_v35  ;;  %v664_v49 = vunpack.c.h.bf16 %v789_v35 }
  0x19   : > { %709 = vst [vmem:[%s906_s25] sm:$0xff] %v708_v41   ;;  %800 = vst [vmem:[%s906_s25 + $0x8] sm:$0xff] %v713_v42   ;;  %v253_v50 = vmul.f32 %v659_v43, %v872_v0  ;;  %v254_v51 = vmul.f32 %v660_v44, %v872_v0  ;;  %v667_v52 = vunpack.c.l.bf16 %v790_v40  ;;  %v668_v53 = vunpack.c.h.bf16 %v790_v40  ;;  %v796_v40 = vld [vmem:[%s867_s18 + $0x60] sm:$0xff]  }
  0x1a   : > { %801 = vst [vmem:[%s906_s25 + $0x10] sm:$0xff] %v718_v46   ;;  %802 = vst [vmem:[%s906_s25 + $0x18] sm:$0xff] %v723_v47   ;;  %v255_v54 = vmul.f32 %v663_v48, %v872_v0  ;;  %v256_v55 = vmul.f32 %v664_v49, %v872_v0  ;;  %v671_v56 = vunpack.c.l.bf16 %v791_v45  ;;  %v672_v57 = vunpack.c.h.bf16 %v791_v45 }
  0x1b   : > { %v292_v58 = vadd.f32 %v881_v9, %v253_v50  ;;  %v293_v59 = vadd.f32 %v881_v9, %v254_v51  ;;  %v257_v60 = vmul.f32 %v667_v52, %v872_v0  ;;  %v258_v61 = vmul.f32 %v668_v53, %v872_v0  ;;  %v797_v53 = vld [vmem:[%s867_s18 + $0x68] sm:$0xff]  }
  0x1c   : > { %v294_v62 = vadd.f32 %v881_v9, %v255_v54  ;;  %v295_v63 = vadd.f32 %v881_v9, %v256_v55  ;;  %v259_v1 = vmul.f32 %v671_v56, %v872_v0  ;;  %v260_v2 = vmul.f32 %v672_v57, %v872_v0 }
  0x1d   : > { %v324_v4 = vmax.f32 %v292_v58, 0.0  ;;  %v325_v5 = vmax.f32 %v293_v59, 0.0  ;;  %v296_v6 = vadd.f32 %v881_v9, %v257_v60  ;;  %v297_v7 = vadd.f32 %v881_v9, %v258_v61  ;;  %v798_v58 = vld [vmem:[%s867_s18 + $0x70] sm:$0xff]  }
  0x1e   : > { %v326_v8 = vmax.f32 %v294_v62, 0.0  ;;  %v327_v10 = vmax.f32 %v295_v63, 0.0  ;;  %v298_v11 = vadd.f32 %v881_v9, %v259_v1  ;;  %v299_v12 = vadd.f32 %v881_v9, %v260_v2  ;;  %v799_v63 = vld [vmem:[%s867_s18 + $0x78] sm:$0xff]  }
  0x1f   : > { %v728_v14 = vpack.c.bf16 %v325_v5, %v324_v4  ;;  %v328_v15 = vmax.f32 %v296_v6, 0.0  ;;  %v329_v16 = vmax.f32 %v297_v7, 0.0  ;;  %v675_v17 = vunpack.c.l.bf16 %v792_v3 }
  0x20   : > { %v733_v19 = vpack.c.bf16 %v327_v10, %v326_v8  ;;  %v330_v20 = vmax.f32 %v298_v11, 0.0  ;;  %v331_v21 = vmax.f32 %v299_v12, 0.0  ;;  %v676_v22 = vunpack.c.h.bf16 %v792_v3 }
  0x21   : > { %803 = vst [vmem:[%s906_s25 + $0x20] sm:$0xff] %v728_v14   ;;  %v738_v24 = vpack.c.bf16 %v329_v16, %v328_v15  ;;  %v261_v25 = vmul.f32 %v675_v17, %v872_v0  ;;  %v679_v26 = vunpack.c.l.bf16 %v793_v13  ;;  %v680_v27 = vunpack.c.h.bf16 %v793_v13 }
  0x22   : > { %804 = vst [vmem:[%s906_s25 + $0x28] sm:$0xff] %v733_v19   ;;  %v743_v28 = vpack.c.bf16 %v331_v21, %v330_v20  ;;  %v262_v29 = vmul.f32 %v676_v22, %v872_v0  ;;  %v683_v30 = vunpack.c.l.bf16 %v794_v18  ;;  %v684_v31 = vunpack.c.h.bf16 %v794_v18 }
  0x23   : > { %805 = vst [vmem:[%s906_s25 + $0x30] sm:$0xff] %v738_v24   ;;  %v300_v32 = vadd.f32 %v881_v9, %v261_v25  ;;  %v263_v33 = vmul.f32 %v679_v26, %v872_v0  ;;  %v264_v34 = vmul.f32 %v680_v27, %v872_v0  ;;  %v687_v35 = vunpack.c.l.bf16 %v795_v23 }
  0x24   : > { %806 = vst [vmem:[%s906_s25 + $0x38] sm:$0xff] %v743_v28   ;;  %v301_v36 = vadd.f32 %v881_v9, %v262_v29  ;;  %v265_v37 = vmul.f32 %v683_v30, %v872_v0  ;;  %v266_v38 = vmul.f32 %v684_v31, %v872_v0  ;;  %v688_v39 = vunpack.c.h.bf16 %v795_v23 }
  0x25   : > { %v332_v41 = vmax.f32 %v300_v32, 0.0  ;;  %v302_v42 = vadd.f32 %v881_v9, %v263_v33  ;;  %v303_v43 = vadd.f32 %v881_v9, %v264_v34  ;;  %v267_v44 = vmul.f32 %v687_v35, %v872_v0 }
  0x26   : > { %v333_v45 = vmax.f32 %v301_v36, 0.0  ;;  %v304_v46 = vadd.f32 %v881_v9, %v265_v37  ;;  %v305_v47 = vadd.f32 %v881_v9, %v266_v38  ;;  %v268_v48 = vmul.f32 %v688_v39, %v872_v0 }
  0x27   : > { %v334_v49 = vmax.f32 %v302_v42, 0.0  ;;  %v335_v50 = vmax.f32 %v303_v43, 0.0  ;;  %v306_v51 = vadd.f32 %v881_v9, %v267_v44  ;;  %v691_v52 = vunpack.c.l.bf16 %v796_v40 }
  0x28   : > { %v748_v54 = vpack.c.bf16 %v333_v45, %v332_v41  ;;  %v336_v55 = vmax.f32 %v304_v46, 0.0  ;;  %v337_v56 = vmax.f32 %v305_v47, 0.0  ;;  %v307_v57 = vadd.f32 %v881_v9, %v268_v48 }
  0x29   : > { %v753_v59 = vpack.c.bf16 %v335_v50, %v334_v49  ;;  %v338_v60 = vmax.f32 %v306_v51, 0.0  ;;  %v692_v61 = vunpack.c.h.bf16 %v796_v40  ;;  %v269_v62 = vmul.f32 %v691_v52, %v872_v0 }
  0x2a   : > { %807 = vst [vmem:[%s906_s25 + $0x40] sm:$0xff] %v748_v54   ;;  %v758_v1 = vpack.c.bf16 %v337_v56, %v336_v55  ;;  %v339_v2 = vmax.f32 %v307_v57, 0.0  ;;  %v695_v3 = vunpack.c.l.bf16 %v797_v53  ;;  %v696_v4 = vunpack.c.h.bf16 %v797_v53 }
  0x2b   : > { %808 = vst [vmem:[%s906_s25 + $0x48] sm:$0xff] %v753_v59   ;;  %v270_v5 = vmul.f32 %v692_v61, %v872_v0  ;;  %v308_v6 = vadd.f32 %v881_v9, %v269_v62  ;;  %v699_v7 = vunpack.c.l.bf16 %v798_v58  ;;  %v700_v8 = vunpack.c.h.bf16 %v798_v58 }
  0x2c   : > { %809 = vst [vmem:[%s906_s25 + $0x50] sm:$0xff] %v758_v1   ;;  %v763_v10 = vpack.c.bf16 %v339_v2, %v338_v60  ;;  %v271_v11 = vmul.f32 %v695_v3, %v872_v0  ;;  %v272_v12 = vmul.f32 %v696_v4, %v872_v0  ;;  %v703_v13 = vunpack.c.l.bf16 %v799_v63 }
  0x2d   : > { %v309_v14 = vadd.f32 %v881_v9, %v270_v5  ;;  %v340_v15 = vmax.f32 %v308_v6, 0.0  ;;  %v273_v16 = vmul.f32 %v699_v7, %v872_v0  ;;  %v274_v17 = vmul.f32 %v700_v8, %v872_v0 }
  0x2e   : > { %810 = vst [vmem:[%s906_s25 + $0x58] sm:$0xff] %v763_v10   ;;  %v310_v18 = vadd.f32 %v881_v9, %v271_v11  ;;  %v311_v19 = vadd.f32 %v881_v9, %v272_v12  ;;  %v704_v20 = vunpack.c.h.bf16 %v799_v63  ;;  %v275_v21 = vmul.f32 %v703_v13, %v872_v0 }
  0x2f   : > { %v341_v22 = vmax.f32 %v309_v14, 0.0  ;;  %v312_v23 = vadd.f32 %v881_v9, %v273_v16  ;;  %v313_v24 = vadd.f32 %v881_v9, %v274_v17 }
  0x30   : > { %v342_v25 = vmax.f32 %v310_v18, 0.0  ;;  %v343_v26 = vmax.f32 %v311_v19, 0.0  ;;  %v276_v27 = vmul.f32 %v704_v20, %v872_v0  ;;  %v314_v28 = vadd.f32 %v881_v9, %v275_v21 }
  0x31   : > { %v768_v29 = vpack.c.bf16 %v341_v22, %v340_v15  ;;  %v344_v30 = vmax.f32 %v312_v23, 0.0  ;;  %v345_v31 = vmax.f32 %v313_v24, 0.0 }
  0x32   : > { %v773_v32 = vpack.c.bf16 %v343_v26, %v342_v25  ;;  %v315_v33 = vadd.f32 %v881_v9, %v276_v27  ;;  %v346_v34 = vmax.f32 %v314_v28, 0.0 }
  0x33   : > { %811 = vst [vmem:[%s906_s25 + $0x60] sm:$0xff] %v768_v29   ;;  %v778_v35 = vpack.c.bf16 %v345_v31, %v344_v30 }
  0x34   : > { %812 = vst [vmem:[%s906_s25 + $0x68] sm:$0xff] %v773_v32   ;;  %v347_v36 = vmax.f32 %v315_v33, 0.0 }
  0x35   : > { %813 = vst [vmem:[%s906_s25 + $0x70] sm:$0xff] %v778_v35  }
  0x36   : > { %v783_v37 = vpack.c.bf16 %v347_v36, %v346_v34 }
  0x38   : > { %814 = vst [vmem:[%s906_s25 + $0x78] sm:$0xff] %v783_v37  }
  0x39 PF: > { %s13_s12 = sadd.s32 1, %s829_s12  }
  0x3a   : > { %p10_p4 = scmp.ge.s32.totalorder %s13_s12, 4  }
  0x3c   :  { %12 = sbr.rel (!%p10_p4) target bundleno = 1 (0x1), region = 62 }

// kernel: _lambda_.33
= control target key start
LH: loop header
LB: loop body
LE: loop exit
PB: predicated region body
PF: predicated region fallthrough
CT: control target
= control target key end

     0   :  { %s887_s15 = smov 0   ;;  %s889_s16 = smov 0   ;;  %s968_s0 = inlined_call_operand.vmem [shape: bf16[128,128], index: 0, kind: input, shape index: {}]   ;;  %s969_s1 = inlined_call_operand.vmem [shape: bf16[128,128], index: 1, kind: input, shape index: {}]   ;;  %s970_s2 = inlined_call_operand.vmem [shape: bf16[128,128], index: 2, kind: output, shape index: {0}]   ;;  %s971_s3 = inlined_call_operand.vmem [shape: f32[16,128], index: 3, kind: output, shape index: {1}]   ;;  %s972_s4 = inlined_call_operand.vmem [shape: f32[16,128], index: 4, kind: output, shape index: {2}]  }
   0x1   :  { %s891_s17 = smov 0  }
   0x2 LB: > { %s27_s18 = sadd.s32 1, %s856_s16  ;;  %p690_p0 = scmp.ge.s32.totalorder %s860_s17, 1  ;;  %s860_s17 = sphi %s891_s17, %s15_s17   ;;  %s856_s16 = sphi %s889_s16, %s974_s16   ;;  %s852_s15 = sphi %s887_s15, %s973_s15  }
   0x3   : > { %p29_p1 = scmp.ge.s32.totalorder %s27_s18, 2  ;;  %p195_p2 = scmp.lt.s32.totalorder %s860_s17, 3 }
   0x5   : > { %s976_s18 = smov (%p29_p1, %s27_s18), 0  ;;  %p196_p3 = pnand %p690_p0, %p195_p2 }
   0x6   : > { %s691_s21 = sshll.u32 (!%p196_p3), %s852_s15, 3  ;;  %p261_p5 = scmp.lt.s32.totalorder (!%p196_p3), %s852_s15, 1 }
   0x7   : > { %199 = sbr.rel (%p196_p3) target bundleno = 273 (0x111), region = 28  ;;  %p243_p4 = scmp.lt.s32.totalorder (!%p196_p3), %s691_s21, 15 }
   0xc   : > { %v826_v0 = vld [vmem:[%s969_s1 + $0x38] sm:$0xff]   ;;  %v827_v1 = vld [vmem:[%s969_s1 + $0x30] sm:$0xff]   ;;  %s978_s21 = smov (!%p243_p4, %s691_s21), 15  ;;  %v828_v2 = vld [vmem:[%s969_s1 + $0x28] sm:$0xff]   ;;  %s980_s15 = smov (!%p261_p5, %s852_s15), 1 }
   0xd   : > { %762 = vmatprep.subr.bf16.mxu0 %v826_v0  ;;  %786 = vmatprep.subr.bf16.mxu1 %v826_v0  ;;  %s692_s26 = sshll.u32 %s978_s21, 2  ;;  %v829_v3 = vld [vmem:[%s969_s1 + $0x20] sm:$0xff]   ;;  %v830_v6 = vld [vmem:[%s969_s1 + $0x18] sm:$0xff]   ;;  %v831_v7 = vld [vmem:[%s969_s1 + $0x10] sm:$0xff]   ;;  %s695_s21 = sshll.u32 %s980_s15, 3 }
   0xe   : > { %763 = vmatpush3.bf16.msra.mxu0 %v826_v0  ;;  %794 = vmatpush3.bf16.msra.mxu1 %v826_v0  ;;  %s925_s29 = scalar_lea.vmem %s968_s0, %s692_s26  ;;  %v832_v8 = vld [vmem:[%s969_s1 + $0x8] sm:$0xff]   ;;  %v833_v9 = vld [vmem:[%s969_s1] sm:$0xff]   ;;  %s259_s20 = scalar_lea.vmem %s970_s2, %s692_s26 }
   0xf   : > { %764 = vmatprep.subr.bf16.mxu0 %v827_v1  ;;  %787 = vmatprep.subr.bf16.mxu1 %v827_v1  ;;  %v834_v4 = vld [vmem:[%s925_s29] sm:$0xff]   ;;  %v836_v5 = vld [vmem:[%s925_s29 + $0x10] sm:$0xff]   ;;  %v835_v10 = vld [vmem:[%s925_s29 + $0x8] sm:$0xff]   ;;  %s267_s24 = scalar_lea.vmem %s971_s3, %s695_s21  ;;  %s274_s27 = scalar_lea.vmem %s972_s4, %s695_s21 }
  0x10   : > { %778 = vmatprep.mubr.bf16.mxu0 %v834_v4  ;;  %782 = vmatprep.mubr.bf16.mxu1 %v836_v5  ;;  %v837_v11 = vld [vmem:[%s925_s29 + $0x18] sm:$0xff]  }
  0x12   : > { %765 = vmatpush3.bf16.msra.mxu0 %v827_v1  ;;  %795 = vmatpush3.bf16.msra.mxu1 %v827_v1 }
  0x13   : > { %766 = vmatprep.subr.bf16.mxu0 %v828_v2  ;;  %788 = vmatprep.subr.bf16.mxu1 %v828_v2 }
  0x16   : > { %767 = vmatpush3.bf16.msra.mxu0 %v828_v2  ;;  %796 = vmatpush3.bf16.msra.mxu1 %v828_v2 }
  0x17   : > { %768 = vmatprep.subr.bf16.mxu0 %v829_v3  ;;  %789 = vmatprep.subr.bf16.mxu1 %v829_v3 }
  0x1a   : > { %769 = vmatpush3.bf16.msra.mxu0 %v829_v3  ;;  %797 = vmatpush3.bf16.msra.mxu1 %v829_v3 }
  0x1b   : > { %770 = vmatprep.subr.bf16.mxu0 %v830_v6  ;;  %790 = vmatprep.subr.bf16.mxu1 %v830_v6 }
  0x1e   : > { %771 = vmatpush3.bf16.msra.mxu0 %v830_v6  ;;  %798 = vmatpush3.bf16.msra.mxu1 %v830_v6 }
  0x1f   : > { %772 = vmatprep.subr.bf16.mxu0 %v831_v7  ;;  %791 = vmatprep.subr.bf16.mxu1 %v831_v7 }
  0x22   : > { %773 = vmatpush3.bf16.msra.mxu0 %v831_v7  ;;  %799 = vmatpush3.bf16.msra.mxu1 %v831_v7 }
  0x23   : > { %774 = vmatprep.subr.bf16.mxu0 %v832_v8  ;;  %792 = vmatprep.subr.bf16.mxu1 %v832_v8 }
  0x26   : > { %775 = vmatpush3.bf16.msra.mxu0 %v832_v8  ;;  %800 = vmatpush3.bf16.msra.mxu1 %v832_v8 }
  0x27   : > { %776 = vmatprep.subr.bf16.mxu0 %v833_v9  ;;  %793 = vmatprep.subr.bf16.mxu1 %v833_v9 }
  0x2a   : > { %777 = vmatpush3.bf16.msra.mxu0 %v833_v9  ;;  %801 = vmatpush3.bf16.msra.mxu1 %v833_v9 }
  0x2d   : > { %779 = vmatmul.mubr.bf16.vlgmr.msra.gmra.mxu0 %v835_v10  ;;  %783 = vmatmul.mubr.bf16.vlgmr.msra.gmra.mxu1 %v837_v11 }
  0xed   : > { %v780_v12 = vpop.f32.mrf.mxu0  ;;  %v784_v13 = vpop.f32.mrf.mxu1 }
  0xee   : > { %v452_v27 = vmul.f32 %v780_v12, %v780_v12  ;;  %v456_v39 = vmul.f32 %v784_v13, %v784_v13 }
  0xef   : > { %v406_v14 = vpop.f32.mrf.mxu0  ;;  %v422_v15 = vpop.f32.mrf.mxu1 }
  0xf0   : > { %v450_v22 = vmul.f32 %v406_v14, %v406_v14  ;;  %v454_v33 = vmul.f32 %v422_v15, %v422_v15 }
  0xf1   : > { %v781_v16 = vpop.f32.mrf.mxu0  ;;  %v785_v17 = vpop.f32.mrf.mxu1 }
  0xf2   : > { %v735_v18 = vpack.c.bf16 %v781_v16, %v780_v12  ;;  %v745_v19 = vpack.c.bf16 %v785_v17, %v784_v13  ;;  %v453_v30 = vmul.f32 %v781_v16, %v781_v16  ;;  %v457_v42 = vmul.f32 %v785_v17, %v785_v17 }
  0xf3   : > { %v409_v20 = vpop.f32.mrf.mxu0  ;;  %v425_v21 = vpop.f32.mrf.mxu1 }
  0xf4   : > { %747 = vst [vmem:[%s259_s20 + $0x8] sm:$0xff] %v735_v18   ;;  %v437_v23 = vadd.f32 %v409_v20, %v406_v14  ;;  %v451_v24 = vmul.f32 %v409_v20, %v409_v20  ;;  %v730_v25 = vpack.c.bf16 %v409_v20, %v406_v14  ;;  %749 = vst [vmem:[%s259_s20 + $0x18] sm:$0xff] %v745_v19  }
  0xf5   : > { %v740_v26 = vpack.c.bf16 %v425_v21, %v422_v15  ;;  %v455_v37 = vmul.f32 %v425_v21, %v425_v21 }
  0xf6   : > { %v438_v28 = vadd.f32 %v780_v12, %v437_v23  ;;  %v458_v29 = vadd.f32 %v451_v24, %v450_v22  ;;  %731 = vst [vmem:[%s259_s20] sm:$0xff] %v730_v25  }
  0xf7   : > { %748 = vst [vmem:[%s259_s20 + $0x10] sm:$0xff] %v740_v26  }
  0xf8   : > { %v459_v31 = vadd.f32 %v458_v29, %v452_v27  ;;  %v439_v32 = vadd.f32 %v781_v16, %v438_v28 }
  0xfa   : > { %v440_v34 = vadd.f32 %v439_v32, %v422_v15  ;;  %v460_v35 = vadd.f32 %v459_v31, %v453_v30 }
  0xfc   : > { %v441_v36 = vadd.f32 %v440_v34, %v425_v21  ;;  %v461_v38 = vadd.f32 %v460_v35, %v454_v33 }
  0xfe   : > { %v442_v40 = vadd.f32 %v784_v13, %v441_v36  ;;  %v462_v41 = vadd.f32 %v461_v38, %v455_v37 }
 0x100   : > { %v443_v43 = vadd.f32 %v785_v17, %v442_v40  ;;  %v463_v44 = vadd.f32 %v462_v41, %v456_v39 }
 0x102   : > { %v444_v45 = vrot.slane %v443_v43, 4  ;;  %v464_v46 = vadd.f32 %v463_v44, %v457_v42 }
 0x104   : > { %v445_v47 = vadd.f32 %v444_v45, %v443_v43  ;;  %v465_v48 = vrot.slane %v464_v46, 4 }
 0x106   : > { %v446_v49 = vrot.slane %v445_v47, 2  ;;  %v466_v50 = vadd.f32 %v465_v48, %v464_v46 }
 0x108   : > { %v447_v51 = vadd.f32 %v446_v49, %v445_v47  ;;  %v467_v52 = vrot.slane %v466_v50, 2 }
 0x10a   : > { %v448_v53 = vrot.slane %v447_v51, 1  ;;  %v468_v54 = vadd.f32 %v467_v52, %v466_v50 }
 0x10c   : > { %v449_v55 = vadd.f32 %v448_v53, %v447_v51  ;;  %v469_v56 = vrot.slane %v468_v54, 1 }
 0x10e   : > { %v470_v57 = vadd.f32 %v469_v56, %v468_v54  ;;  %471 = vst [vmem:[%s267_s24] sm:$0xff] %v449_v55 }
 0x110   : > { %472 = vst [vmem:[%s274_s27] sm:$0xff] %v470_v57 }
 0x111 PF: > { %s15_s17 = sadd.s32 1, %s860_s17   ;;  %s973_s15 = smov %s856_s16 }
 0x112   : > { %p12_p6 = scmp.ge.s32.totalorder %s15_s17, 4   ;;  %s974_s16 = smov %s976_s18 }
 0x114   :  { %14 = sbr.rel (!%p12_p6) target bundleno = 2 (0x2), region = 85 }

// kernel: _lambda_.38
= control target key start
LH: loop header
LB: loop body
LE: loop exit
PB: predicated region body
PF: predicated region fallthrough
CT: control target
= control target key end

     0   :  { %s423_s12 = smov 0   ;;  %s449_s0 = inlined_call_operand.vmem [shape: bf16[128,128], index: 0, kind: input, shape index: {}]   ;;  %s450_s1 = inlined_call_operand.vmem [shape: f32[1,128], index: 1, kind: input, shape index: {}]   ;;  %s451_s2 = inlined_call_operand.vmem [shape: f32[1,128], index: 2, kind: input, shape index: {}]   ;;  %s452_s3 = inlined_call_operand.vmem [shape: bf16[128,128], index: 3, kind: output, shape index: {}]  }
   0x1 LB: > { %s316_s13 = sadd.s32 4294967295, %s401_s12   ;;  %p320_p0 = scmp.ge.s32.totalorder %s401_s12, 1  ;;  %s401_s12 = sphi %s423_s12, %s13_s12  }
   0x2   : > { %p138_p1 = scmp.lt.s32.totalorder %s401_s12, 3 }
   0x4   : > { %p139_p2 = pnand %p320_p0, %p138_p1 }
   0x5   : > { %s321_s14 = sshll.u32 (!%p139_p2), %s316_s13, 3 }
   0x6   : > { %142 = sbr.rel (%p139_p2) target bundleno = 25 (0x19), region = 32  ;;  %p163_p3 = scmp.lt.s32.totalorder (!%p139_p2), %s321_s14, 15 }
   0xb   : > { %s454_s14 = smov (!%p163_p3, %s321_s14), 15  ;;  %v325_v0 = vld [vmem:[%s450_s1] ss:$0 sm:$0xff] }
   0xc   : > { %s322_s15 = sshll.u32 %s454_s14, 2  ;;  %v326_v9 = vld [vmem:[%s451_s2] ss:$0 sm:$0xff] }
   0xd   : > { %s166_s18 = scalar_lea.vmem %s449_s0, %s322_s15  ;;  %s172_s25 = scalar_lea.vmem %s452_s3, %s322_s15 }
   0xe   : > { %v346_v1 = vld [vmem:[%s166_s18] sm:$0xff]   ;;  %v381_v2 = vld [vmem:[%s166_s18 + $0x8] sm:$0xff]   ;;  %v382_v3 = vld [vmem:[%s166_s18 + $0x10] sm:$0xff]  }
   0xf   : > { %v347_v4 = vunpack.c.l.bf16 %v346_v1  ;;  %v348_v5 = vunpack.c.h.bf16 %v346_v1  ;;  %v351_v6 = vunpack.c.l.bf16 %v381_v2  ;;  %v352_v7 = vunpack.c.h.bf16 %v381_v2  ;;  %v383_v8 = vld [vmem:[%s166_s18 + $0x18] sm:$0xff]  }
  0x10   : > { %v355_v10 = vunpack.c.l.bf16 %v382_v3  ;;  %v356_v11 = vunpack.c.h.bf16 %v382_v3  ;;  %v359_v12 = vunpack.c.l.bf16 %v383_v8  ;;  %v360_v13 = vunpack.c.h.bf16 %v383_v8 }
  0x11   : > { %v197_v14 = vmul.f32 %v347_v4, %v325_v0  ;;  %v198_v15 = vmul.f32 %v348_v5, %v325_v0  ;;  %v199_v16 = vmul.f32 %v351_v6, %v325_v0  ;;  %v200_v17 = vmul.f32 %v352_v7, %v325_v0 }
  0x12   : > { %v201_v18 = vmul.f32 %v355_v10, %v325_v0  ;;  %v202_v19 = vmul.f32 %v356_v11, %v325_v0  ;;  %v203_v20 = vmul.f32 %v359_v12, %v325_v0  ;;  %v204_v21 = vmul.f32 %v360_v13, %v325_v0 }
  0x13   : > { %v212_v22 = vadd.f32 %v326_v9, %v197_v14  ;;  %v213_v23 = vadd.f32 %v326_v9, %v198_v15  ;;  %v214_v24 = vadd.f32 %v326_v9, %v199_v16  ;;  %v215_v25 = vadd.f32 %v326_v9, %v200_v17 }
  0x14   : > { %v216_v26 = vadd.f32 %v326_v9, %v201_v18  ;;  %v217_v27 = vadd.f32 %v326_v9, %v202_v19  ;;  %v218_v28 = vadd.f32 %v326_v9, %v203_v20  ;;  %v219_v29 = vadd.f32 %v326_v9, %v204_v21 }
  0x15   : > { %v364_v30 = vpack.c.bf16 %v213_v23, %v212_v22  ;;  %v369_v31 = vpack.c.bf16 %v215_v25, %v214_v24 }
  0x16   : > { %v374_v32 = vpack.c.bf16 %v217_v27, %v216_v26  ;;  %v379_v33 = vpack.c.bf16 %v219_v29, %v218_v28 }
  0x17   : > { %365 = vst [vmem:[%s172_s25] sm:$0xff] %v364_v30   ;;  %384 = vst [vmem:[%s172_s25 + $0x8] sm:$0xff] %v369_v31  }
  0x18   : > { %385 = vst [vmem:[%s172_s25 + $0x10] sm:$0xff] %v374_v32   ;;  %386 = vst [vmem:[%s172_s25 + $0x18] sm:$0xff] %v379_v33  }
  0x19 PF: > { %s13_s12 = sadd.s32 1, %s401_s12  }
  0x1a   : > { %p10_p4 = scmp.ge.s32.totalorder %s13_s12, 4  }
  0x1c   :  { %12 = sbr.rel (!%p10_p4) target bundleno = 1 (0x1), region = 62 }

// kernel: tile.38
= control target key start
LH: loop header
LB: loop body
LE: loop exit
PB: predicated region body
PF: predicated region fallthrough
CT: control target
= control target key end

     0   :  { %s22_s0 = inlined_call_operand.vmem [shape: f32[4], index: 0, kind: input, shape index: {}]   ;;  %s23_s1 = inlined_call_operand.vmem [shape: f32[4,4], index: 1, kind: output, shape index: {}]  }
   0x1   :  { %v4_v0 = vld [vmem:[%s22_s0] ss:$0 sm:$0xff] }
   0x2   :  { %5 = vst [vmem:[%s23_s1] sm:$0xf] %v4_v0 }

// kernel: tile.39
= control target key start
LH: loop header
LB: loop body
LE: loop exit
PB: predicated region body
PF: predicated region fallthrough
CT: control target
= control target key end

     0   :  { %vm8_vm0 = vcmask 31744   ;;  %s40_s8 = smov 4   ;;  %s41_s9 = smov 8   ;;  %vm14_vm1 = vcmask 130144   ;;  %vm20_vm2 = vcmask 97344   ;;  %vm26_vm3 = vcmask 64544   ;;  %s58_s0 = inlined_call_operand.vmem [shape: f32[4,4], index: 0, kind: input, shape index: {}]   ;;  %s59_s1 = inlined_call_operand.vmem [shape: f32[16], index: 1, kind: output, shape index: {}]  }
   0x1   :  { %v5_v0 = vld [vmem:[%s58_s0] sm:$0xf]  ;;  %s39_s0 = smov 12  }
   0x2   :  { %6 = vst [vmem:[#allocation1] sm:$0xf] %v5_v0 }
   0x9   :  { %v11_v1 = vld [vmem:[#allocation1 + $0x3] sm:$0x1]   ;;  %v23_v2 = vld [vmem:[#allocation1 + $0x1] sm:$0x1]   ;;  %v7_v3 = vld [vmem:[#allocation1] sm:$0x1]  }
   0xa   :  { %12 = vrot.lane.b32.xlu0 %v11_v1, %s39_s0  ;;  %24 = vrot.lane.b32.xlu1 %v23_v2, %s40_s8  ;;  %v17_v4 = vld [vmem:[#allocation1 + $0x2] sm:$0x1]   ;;  %9 = vst.msk [vmem:[#allocation0] sm:$0x1] %vm8_vm0, %v7_v3  }
   0xe   :  { %18 = vrot.lane.b32.xlu0 %v17_v4, %s41_s9 }
  0x7c   :  { %v13_v5 = vpop.permute.xlu0 %12   ;;  %v25_v6 = vpop.permute.xlu1 %24  }
  0x7d   :  { %15 = vst.msk [vmem:[#allocation0] sm:$0x1] %vm14_vm1, %v13_v5  }
  0x80   :  { %v19_v7 = vpop.permute.xlu0 %18  }
  0x81   :  { %21 = vst.msk [vmem:[#allocation0] sm:$0x1] %vm20_vm2, %v19_v7  }
  0x82   :  { %27 = vst.msk [vmem:[#allocation0] sm:$0x1] %vm26_vm3, %v25_v6  }
  0x89   :  { %v32_v8 = vld [vmem:[#allocation0] sm:$0x1] }
  0x8a   :  { %35 = vst [vmem:[%s59_s1] sm:$0x1] %v32_v8 }

// kernel: _lambda_.41
= control target key start
LH: loop header
LB: loop body
LE: loop exit
PB: predicated region body
PF: predicated region fallthrough
CT: control target
= control target key end

     0   :  { %s1558_s12 = smov 0   ;;  %s1560_s13 = smov 0   ;;  %s1732_s0 = inlined_call_operand.vmem [shape: bf16[512,256], index: 0, kind: input, shape index: {}]   ;;  %s1733_s1 = inlined_call_operand.vmem [shape: bf16[256,128], index: 1, kind: input, shape index: {}]   ;;  %s1734_s2 = inlined_call_operand.vmem [shape: f32[1,128], index: 2, kind: input, shape index: {}]   ;;  %s1735_s3 = inlined_call_operand.vmem [shape: bf16[512,128], index: 3, kind: output, shape index: {}]  }
   0x1   :  { %s1562_s14 = smov 0  }
   0x2 LB: > { %s25_s15 = sadd.s32 1, %s1532_s13  ;;  %p1017_p0 = scmp.ge.s32.totalorder %s1536_s14, 1  ;;  %s1536_s14 = sphi %s1562_s14, %s13_s14   ;;  %s1532_s13 = sphi %s1560_s13, %s1737_s13   ;;  %s1528_s12 = sphi %s1558_s12, %s1736_s12  }
   0x3   : > { %p27_p1 = scmp.ge.s32.totalorder %s25_s15, 2  ;;  %p170_p2 = scmp.lt.s32.totalorder %s1536_s14, 3 }
   0x5   : > { %s1739_s15 = smov (%p27_p1, %s25_s15), 0  ;;  %p171_p3 = pnand %p1017_p0, %p170_p2 }
   0x6   : > { %s1018_s18 = sshll.u32 (!%p171_p3), %s1528_s12, 5 }
   0x7   : > { %174 = sbr.rel (%p171_p3) target bundleno = 322 (0x142), region = 32  ;;  %p206_p4 = scmp.lt.s32.totalorder (!%p171_p3), %s1018_s18, 63 }
   0xc   : > { %v1386_v0 = vld [vmem:[%s1733_s1 + $0x78] sm:$0xff]   ;;  %v1388_v2 = vld [vmem:[%s1733_s1 + $0x70] sm:$0xff]   ;;  %v1390_v4 = vld [vmem:[%s1733_s1 + $0x68] sm:$0xff]   ;;  %s1741_s18 = smov (!%p206_p4, %s1018_s18), 63 }
   0xd   : > { %v1387_v1 = vld [vmem:[%s1733_s1 + $0x38] sm:$0xff]   ;;  %1234 = vmatprep.subr.bf16.mxu0 %v1386_v0  ;;  %1346 = vmatprep.subr.bf16.mxu1 %v1386_v0  ;;  %v1389_v3 = vld [vmem:[%s1733_s1 + $0x30] sm:$0xff]   ;;  %v1391_v5 = vld [vmem:[%s1733_s1 + $0x28] sm:$0xff]   ;;  %s1106_s6 = sshll.u32 %s1741_s18, 3  ;;  %s1022_s5 = sshll.u32 %s1741_s18, 2 }
   0xe   : > { %1235 = vmatpush3.bf16.msra.mxu0 %v1387_v1  ;;  %1354 = vmatpush3.bf16.msra.mxu1 %v1387_v1  ;;  %v1392_v6 = vld [vmem:[%s1733_s1 + $0x60] sm:$0xff]   ;;  %v1394_v8 = vld [vmem:[%s1733_s1 + $0x58] sm:$0xff]   ;;  %s1609_s11 = scalar_lea.vmem %s1732_s0, %s1106_s6  ;;  %v1396_v10 = vld [vmem:[%s1733_s1 + $0x50] sm:$0xff]   ;;  %s1683_s8 = scalar_lea.vmem %s1735_s3, %s1022_s5 }
   0xf   : > { %1236 = vmatprep.subr.bf16.mxu0 %v1388_v2  ;;  %1347 = vmatprep.subr.bf16.mxu1 %v1388_v2  ;;  %v1393_v7 = vld [vmem:[%s1733_s1 + $0x20] sm:$0xff]   ;;  %v1395_v9 = vld [vmem:[%s1733_s1 + $0x18] sm:$0xff]   ;;  %v1397_v13 = vld [vmem:[%s1733_s1 + $0x10] sm:$0xff]  }
  0x10   : > { %v1404_v11 = vld [vmem:[%s1609_s11 + $0x4] ss:$8 sps:$4 sm:$0xff]   ;;  %v1402_v18 = vld [vmem:[%s1609_s11] ss:$8 sps:$4 sm:$0xff]   ;;  %v1408_v20 = vld [vmem:[%s1609_s11 + $0x14] ss:$8 sps:$4 sm:$0xff]  }
  0x11   : > { %v1407_v12 = vld [vmem:[%s1609_s11 + $0x84] ss:$8 sps:$4 sm:$0xff]   ;;  %588 = vmatprep.mubr.bf16.mxu0 %v1404_v11  ;;  %v1405_v19 = vld [vmem:[%s1609_s11 + $0x80] ss:$8 sps:$4 sm:$0xff]   ;;  %v1410_v21 = vld [vmem:[%s1609_s11 + $0x94] ss:$8 sps:$4 sm:$0xff]  }
  0x12   : > { %1237 = vmatpush3.bf16.msra.mxu0 %v1389_v3  ;;  %1355 = vmatpush3.bf16.msra.mxu1 %v1389_v3  ;;  %v1398_v14 = vld [vmem:[%s1733_s1 + $0x48] sm:$0xff]   ;;  %v1400_v16 = vld [vmem:[%s1733_s1 + $0x40] sm:$0xff]   ;;  %v1412_v22 = vld [vmem:[%s1609_s11 + $0x10] ss:$8 sps:$4 sm:$0xff]  }
  0x13   : > { %1238 = vmatprep.subr.bf16.mxu0 %v1390_v4  ;;  %1348 = vmatprep.subr.bf16.mxu1 %v1390_v4  ;;  %v1399_v15 = vld [vmem:[%s1733_s1 + $0x8] sm:$0xff]   ;;  %v1401_v17 = vld [vmem:[%s1733_s1] sm:$0xff]   ;;  %v1413_v23 = vld [vmem:[%s1609_s11 + $0x90] ss:$8 sps:$4 sm:$0xff]  }
  0x14   : > { %652 = vmatprep.mubr.bf16.mxu1 %v1407_v12  ;;  %v1414_v24 = vld [vmem:[%s1609_s11 + $0x24] ss:$8 sps:$4 sm:$0xff]   ;;  %v1418_v26 = vld [vmem:[%s1609_s11 + $0x20] ss:$8 sps:$4 sm:$0xff]   ;;  %v1420_v28 = vld [vmem:[%s1609_s11 + $0x34] ss:$8 sps:$4 sm:$0xff]  }
  0x15   : > { %v1416_v25 = vld [vmem:[%s1609_s11 + $0xa4] ss:$8 sps:$4 sm:$0xff]   ;;  %v1419_v27 = vld [vmem:[%s1609_s11 + $0xa0] ss:$8 sps:$4 sm:$0xff]   ;;  %v1422_v29 = vld [vmem:[%s1609_s11 + $0xb4] ss:$8 sps:$4 sm:$0xff]  }
  0x16   : > { %1239 = vmatpush3.bf16.msra.mxu0 %v1391_v5  ;;  %1356 = vmatpush3.bf16.msra.mxu1 %v1391_v5  ;;  %v1424_v30 = vld [vmem:[%s1609_s11 + $0x30] ss:$8 sps:$4 sm:$0xff]   ;;  %v1426_v32 = vld [vmem:[%s1609_s11 + $0x44] ss:$8 sps:$4 sm:$0xff]   ;;  %v1430_v34 = vld [vmem:[%s1609_s11 + $0x40] ss:$8 sps:$4 sm:$0xff]  }
  0x17   : > { %1240 = vmatprep.subr.bf16.mxu0 %v1392_v6  ;;  %1349 = vmatprep.subr.bf16.mxu1 %v1392_v6  ;;  %v1425_v31 = vld [vmem:[%s1609_s11 + $0xb0] ss:$8 sps:$4 sm:$0xff]   ;;  %v1428_v33 = vld [vmem:[%s1609_s11 + $0xc4] ss:$8 sps:$4 sm:$0xff]   ;;  %v1431_v35 = vld [vmem:[%s1609_s11 + $0xc0] ss:$8 sps:$4 sm:$0xff]  }
  0x18   : > { %v1432_v36 = vld [vmem:[%s1609_s11 + $0x54] ss:$8 sps:$4 sm:$0xff]   ;;  %v1436_v38 = vld [vmem:[%s1609_s11 + $0x50] ss:$8 sps:$4 sm:$0xff]   ;;  %v1438_v40 = vld [vmem:[%s1609_s11 + $0x64] ss:$8 sps:$4 sm:$0xff]  }
  0x19   : > { %v1434_v37 = vld [vmem:[%s1609_s11 + $0xd4] ss:$8 sps:$4 sm:$0xff]   ;;  %v1437_v39 = vld [vmem:[%s1609_s11 + $0xd0] ss:$8 sps:$4 sm:$0xff]   ;;  %v1440_v41 = vld [vmem:[%s1609_s11 + $0xe4] ss:$8 sps:$4 sm:$0xff]  }
  0x1a   : > { %1241 = vmatpush3.bf16.msra.mxu0 %v1393_v7  ;;  %1357 = vmatpush3.bf16.msra.mxu1 %v1393_v7  ;;  %v1442_v42 = vld [vmem:[%s1609_s11 + $0x60] ss:$8 sps:$4 sm:$0xff]   ;;  %v1444_v44 = vld [vmem:[%s1609_s11 + $0x74] ss:$8 sps:$4 sm:$0xff]   ;;  %v1448_v46 = vld [vmem:[%s1609_s11 + $0x70] ss:$8 sps:$4 sm:$0xff]  }
  0x1b   : > { %1242 = vmatprep.subr.bf16.mxu0 %v1394_v8  ;;  %1350 = vmatprep.subr.bf16.mxu1 %v1394_v8  ;;  %v1443_v43 = vld [vmem:[%s1609_s11 + $0xe0] ss:$8 sps:$4 sm:$0xff]   ;;  %v1446_v45 = vld [vmem:[%s1609_s11 + $0xf4] ss:$8 sps:$4 sm:$0xff]   ;;  %v1449_v47 = vld [vmem:[%s1609_s11 + $0xf0] ss:$8 sps:$4 sm:$0xff]  }
  0x1c   : > { %v1667_v50 = vld [vmem:[%s1734_s2] ss:$0 sm:$0xff] }
  0x1e   : > { %1243 = vmatpush3.bf16.msra.mxu0 %v1395_v9  ;;  %1358 = vmatpush3.bf16.msra.mxu1 %v1395_v9 }
  0x1f   : > { %1244 = vmatprep.subr.bf16.mxu0 %v1396_v10  ;;  %1351 = vmatprep.subr.bf16.mxu1 %v1396_v10 }
  0x22   : > { %1245 = vmatpush3.bf16.msra.mxu0 %v1397_v13  ;;  %1359 = vmatpush3.bf16.msra.mxu1 %v1397_v13 }
  0x23   : > { %1246 = vmatprep.subr.bf16.mxu0 %v1398_v14  ;;  %1352 = vmatprep.subr.bf16.mxu1 %v1398_v14 }
  0x26   : > { %1247 = vmatpush3.bf16.msra.mxu0 %v1399_v15  ;;  %1360 = vmatpush3.bf16.msra.mxu1 %v1399_v15 }
  0x27   : > { %1248 = vmatprep.subr.bf16.mxu0 %v1400_v16  ;;  %1353 = vmatprep.subr.bf16.mxu1 %v1400_v16 }
  0x2a   : > { %1249 = vmatpush3.bf16.msra.mxu0 %v1401_v17  ;;  %1361 = vmatpush3.bf16.msra.mxu1 %v1401_v17 }
  0x2d   : > { %589 = vmatmul.mubr.bf16.vlgmr.msra.gmra.mxu0 %v1402_v18  ;;  %653 = vmatmul.mubr.bf16.vlgmr.msra.gmra.mxu1 %v1405_v19 }
  0x2e   : > { %596 = vmatprep.mubr.bf16.mxu0 %v1408_v20  ;;  %660 = vmatprep.mubr.bf16.mxu1 %v1410_v21 }
  0x35   : > { %597 = vmatmul.mubr.bf16.gmra.mxu0 %v1412_v22  ;;  %661 = vmatmul.mubr.bf16.gmra.mxu1 %v1413_v23 }
  0x36   : > { %604 = vmatprep.mubr.bf16.mxu0 %v1414_v24  ;;  %668 = vmatprep.mubr.bf16.mxu1 %v1416_v25 }
  0x3d   : > { %605 = vmatmul.mubr.bf16.gmra.mxu0 %v1418_v26  ;;  %669 = vmatmul.mubr.bf16.gmra.mxu1 %v1419_v27 }
  0x3e   : > { %612 = vmatprep.mubr.bf16.mxu0 %v1420_v28  ;;  %676 = vmatprep.mubr.bf16.mxu1 %v1422_v29 }
  0x45   : > { %613 = vmatmul.mubr.bf16.gmra.mxu0 %v1424_v30  ;;  %677 = vmatmul.mubr.bf16.gmra.mxu1 %v1425_v31 }
  0x46   : > { %620 = vmatprep.mubr.bf16.mxu0 %v1426_v32  ;;  %684 = vmatprep.mubr.bf16.mxu1 %v1428_v33 }
  0x4d   : > { %621 = vmatmul.mubr.bf16.gmra.mxu0 %v1430_v34  ;;  %685 = vmatmul.mubr.bf16.gmra.mxu1 %v1431_v35 }
  0x4e   : > { %628 = vmatprep.mubr.bf16.mxu0 %v1432_v36  ;;  %692 = vmatprep.mubr.bf16.mxu1 %v1434_v37 }
  0x55   : > { %629 = vmatmul.mubr.bf16.gmra.mxu0 %v1436_v38  ;;  %693 = vmatmul.mubr.bf16.gmra.mxu1 %v1437_v39 }
  0x56   : > { %636 = vmatprep.mubr.bf16.mxu0 %v1438_v40  ;;  %700 = vmatprep.mubr.bf16.mxu1 %v1440_v41 }
  0x5d   : > { %637 = vmatmul.mubr.bf16.gmra.mxu0 %v1442_v42  ;;  %701 = vmatmul.mubr.bf16.gmra.mxu1 %v1443_v43 }
  0x5e   : > { %644 = vmatprep.mubr.bf16.mxu0 %v1444_v44  ;;  %708 = vmatprep.mubr.bf16.mxu1 %v1446_v45 }
  0x65   : > { %645 = vmatmul.mubr.bf16.gmra.mxu0 %v1448_v46  ;;  %709 = vmatmul.mubr.bf16.gmra.mxu1 %v1449_v47 }
  0xed   : > { %v1250_v48 = vpop.f32.mrf.mxu0  ;;  %v1298_v49 = vpop.f32.mrf.mxu1 }
  0xef   : > { %v1251_v51 = vpop.f32.mrf.mxu0  ;;  %v1299_v52 = vpop.f32.mrf.mxu1 }
  0xf0   : > { %v1252_v53 = vadd.f32 %v1251_v51, %v1250_v48  ;;  %v1300_v54 = vadd.f32 %v1299_v52, %v1298_v49 }
  0xf1   : > { %v1253_v55 = vpop.f32.mrf.mxu0  ;;  %v1301_v56 = vpop.f32.mrf.mxu1 }
  0xf2   : > { %v591_v57 = vadd.f32 %v1252_v53, %v1667_v50  ;;  %v655_v58 = vadd.f32 %v1300_v54, %v1667_v50 }
  0xf3   : > { %v1254_v59 = vpop.f32.mrf.mxu0  ;;  %v1302_v60 = vpop.f32.mrf.mxu1 }
  0xf4   : > { %v1255_v61 = vadd.f32 %v1254_v59, %v1253_v55  ;;  %v1303_v62 = vadd.f32 %v1302_v60, %v1301_v56  ;;  %1450 = vtanh.f32 %v591_v57 }
  0xf5   : > { %v1256_v63 = vpop.f32.mrf.mxu0  ;;  %v1304_v0 = vpop.f32.mrf.mxu1  ;;  %1452 = vtanh.f32 %v655_v58 }
  0xf6   : > { %v594_v1 = vadd.f32 %v1255_v61, %v1667_v50  ;;  %v658_v2 = vadd.f32 %v1303_v62, %v1667_v50 }
  0xf7   : > { %v1257_v3 = vpop.f32.mrf.mxu0  ;;  %v1305_v4 = vpop.f32.mrf.mxu1 }
  0xf8   : > { %1454 = vtanh.f32 %v594_v1  ;;  %v1258_v5 = vadd.f32 %v1257_v3, %v1256_v63  ;;  %v1306_v6 = vadd.f32 %v1305_v4, %v1304_v0 }
  0xf9   : > { %1456 = vtanh.f32 %v658_v2  ;;  %v1259_v7 = vpop.f32.mrf.mxu0  ;;  %v1307_v8 = vpop.f32.mrf.mxu1 }
  0xfa   : > { %v599_v9 = vadd.f32 %v1258_v5, %v1667_v50  ;;  %v663_v10 = vadd.f32 %v1306_v6, %v1667_v50 }
  0xfb   : > { %v1260_v11 = vpop.f32.mrf.mxu0  ;;  %v1308_v12 = vpop.f32.mrf.mxu1 }
  0xfc   : > { %v1261_v13 = vadd.f32 %v1260_v11, %v1259_v7  ;;  %v1309_v14 = vadd.f32 %v1308_v12, %v1307_v8  ;;  %1458 = vtanh.f32 %v599_v9 }
  0xfd   : > { %v1262_v15 = vpop.f32.mrf.mxu0  ;;  %v1310_v16 = vpop.f32.mrf.mxu1  ;;  %1460 = vtanh.f32 %v663_v10 }
  0xfe   : > { %v602_v17 = vadd.f32 %v1261_v13, %v1667_v50  ;;  %v666_v18 = vadd.f32 %v1309_v14, %v1667_v50 }
  0xff   : > { %v1263_v19 = vpop.f32.mrf.mxu0  ;;  %v1311_v20 = vpop.f32.mrf.mxu1 }
 0x100   : > { %1462 = vtanh.f32 %v602_v17  ;;  %v1264_v21 = vadd.f32 %v1263_v19, %v1262_v15  ;;  %v1312_v22 = vadd.f32 %v1311_v20, %v1310_v16 }
 0x101   : > { %1464 = vtanh.f32 %v666_v18  ;;  %v1265_v23 = vpop.f32.mrf.mxu0  ;;  %v1313_v24 = vpop.f32.mrf.mxu1 }
 0x102   : > { %v607_v25 = vadd.f32 %v1264_v21, %v1667_v50  ;;  %v1451_v26 = vpop.eup %1450  ;;  %v671_v27 = vadd.f32 %v1312_v22, %v1667_v50 }
 0x103   : > { %v1266_v28 = vpop.f32.mrf.mxu0  ;;  %v1314_v29 = vpop.f32.mrf.mxu1 }
 0x104   : > { %v1453_v30 = vpop.eup %1452  ;;  %v1267_v31 = vadd.f32 %v1266_v28, %v1265_v23  ;;  %v1315_v32 = vadd.f32 %v1314_v29, %v1313_v24  ;;  %1466 = vtanh.f32 %v607_v25 }
 0x105   : > { %v1455_v33 = vpop.eup %1454  ;;  %v1268_v34 = vpop.f32.mrf.mxu0  ;;  %1468 = vtanh.f32 %v671_v27 }
 0x106   : > { %v1316_v35 = vpop.f32.mrf.mxu1  ;;  %v1457_v36 = vpop.eup %1456  ;;  %v1142_v37 = vpack.c.bf16 %v1455_v33, %v1451_v26  ;;  %v610_v38 = vadd.f32 %v1267_v31, %v1667_v50  ;;  %v674_v39 = vadd.f32 %v1315_v32, %v1667_v50 }
 0x107   : > { %v1182_v40 = vpack.c.bf16 %v1457_v36, %v1453_v30  ;;  %v1269_v41 = vpop.f32.mrf.mxu0 }
 0x108   : > { %v1317_v42 = vpop.f32.mrf.mxu1  ;;  %1143 = vst [vmem:[%s1683_s8] sm:$0xff] %v1142_v37   ;;  %1470 = vtanh.f32 %v610_v38  ;;  %v1270_v43 = vadd.f32 %v1269_v41, %v1268_v34 }
 0x109   : > { %v1318_v44 = vadd.f32 %v1317_v42, %v1316_v35  ;;  %1226 = vst [vmem:[%s1683_s8 + $0x40] sm:$0xff] %v1182_v40   ;;  %1472 = vtanh.f32 %v674_v39  ;;  %v1271_v45 = vpop.f32.mrf.mxu0  ;;  %v1459_v48 = vpop.eup %1458 }
 0x10a   : > { %v1319_v46 = vpop.f32.mrf.mxu1  ;;  %v615_v47 = vadd.f32 %v1270_v43, %v1667_v50  ;;  %v1461_v53 = vpop.eup %1460 }
 0x10b   : > { %v679_v49 = vadd.f32 %v1318_v44, %v1667_v50  ;;  %v1272_v51 = vpop.f32.mrf.mxu0 }
 0x10c   : > { %v1320_v52 = vpop.f32.mrf.mxu1  ;;  %v1273_v54 = vadd.f32 %v1272_v51, %v1271_v45  ;;  %1474 = vtanh.f32 %v615_v47 }
 0x10d   : > { %v1321_v55 = vadd.f32 %v1320_v52, %v1319_v46  ;;  %v1463_v56 = vpop.eup %1462  ;;  %v1274_v57 = vpop.f32.mrf.mxu0  ;;  %1476 = vtanh.f32 %v679_v49 }
 0x10e   : > { %v1322_v58 = vpop.f32.mrf.mxu1  ;;  %v1465_v59 = vpop.eup %1464  ;;  %v1147_v60 = vpack.c.bf16 %v1463_v56, %v1459_v48  ;;  %v618_v61 = vadd.f32 %v1273_v54, %v1667_v50 }
 0x10f   : > { %v682_v62 = vadd.f32 %v1321_v55, %v1667_v50  ;;  %v1187_v63 = vpack.c.bf16 %v1465_v59, %v1461_v53  ;;  %v1275_v0 = vpop.f32.mrf.mxu0 }
 0x110   : > { %v1323_v1 = vpop.f32.mrf.mxu1  ;;  %1219 = vst [vmem:[%s1683_s8 + $0x8] sm:$0xff] %v1147_v60   ;;  %1478 = vtanh.f32 %v618_v61  ;;  %v1276_v2 = vadd.f32 %v1275_v0, %v1274_v57 }
 0x111   : > { %v1324_v3 = vadd.f32 %v1323_v1, %v1322_v58  ;;  %1227 = vst [vmem:[%s1683_s8 + $0x48] sm:$0xff] %v1187_v63   ;;  %1480 = vtanh.f32 %v682_v62  ;;  %v1277_v4 = vpop.f32.mrf.mxu0  ;;  %v1467_v7 = vpop.eup %1466 }
 0x112   : > { %v1325_v5 = vpop.f32.mrf.mxu1  ;;  %v623_v6 = vadd.f32 %v1276_v2, %v1667_v50  ;;  %v1469_v11 = vpop.eup %1468 }
 0x113   : > { %v687_v8 = vadd.f32 %v1324_v3, %v1667_v50  ;;  %v1278_v9 = vpop.f32.mrf.mxu0 }
 0x114   : > { %v1326_v10 = vpop.f32.mrf.mxu1  ;;  %v1279_v12 = vadd.f32 %v1278_v9, %v1277_v4  ;;  %1482 = vtanh.f32 %v623_v6 }
 0x115   : > { %v1327_v13 = vadd.f32 %v1326_v10, %v1325_v5  ;;  %v1471_v14 = vpop.eup %1470  ;;  %v1280_v15 = vpop.f32.mrf.mxu0  ;;  %1484 = vtanh.f32 %v687_v8 }
 0x116   : > { %v1328_v16 = vpop.f32.mrf.mxu1  ;;  %v1473_v17 = vpop.eup %1472  ;;  %v1152_v18 = vpack.c.bf16 %v1471_v14, %v1467_v7  ;;  %v626_v19 = vadd.f32 %v1279_v12, %v1667_v50 }
 0x117   : > { %v690_v20 = vadd.f32 %v1327_v13, %v1667_v50  ;;  %v1192_v21 = vpack.c.bf16 %v1473_v17, %v1469_v11  ;;  %v1281_v22 = vpop.f32.mrf.mxu0 }
 0x118   : > { %v1329_v23 = vpop.f32.mrf.mxu1  ;;  %1220 = vst [vmem:[%s1683_s8 + $0x10] sm:$0xff] %v1152_v18   ;;  %1486 = vtanh.f32 %v626_v19  ;;  %v1282_v24 = vadd.f32 %v1281_v22, %v1280_v15 }
 0x119   : > { %v1330_v25 = vadd.f32 %v1329_v23, %v1328_v16  ;;  %1228 = vst [vmem:[%s1683_s8 + $0x50] sm:$0xff] %v1192_v21   ;;  %1488 = vtanh.f32 %v690_v20  ;;  %v1283_v26 = vpop.f32.mrf.mxu0  ;;  %v1475_v29 = vpop.eup %1474 }
 0x11a   : > { %v1331_v27 = vpop.f32.mrf.mxu1  ;;  %v631_v28 = vadd.f32 %v1282_v24, %v1667_v50  ;;  %v1477_v33 = vpop.eup %1476 }
 0x11b   : > { %v695_v30 = vadd.f32 %v1330_v25, %v1667_v50  ;;  %v1284_v31 = vpop.f32.mrf.mxu0 }
 0x11c   : > { %v1332_v32 = vpop.f32.mrf.mxu1  ;;  %v1285_v34 = vadd.f32 %v1284_v31, %v1283_v26  ;;  %1490 = vtanh.f32 %v631_v28 }
 0x11d   : > { %v1333_v35 = vadd.f32 %v1332_v32, %v1331_v27  ;;  %v1479_v36 = vpop.eup %1478  ;;  %v1286_v37 = vpop.f32.mrf.mxu0  ;;  %1492 = vtanh.f32 %v695_v30 }
 0x11e   : > { %v1334_v38 = vpop.f32.mrf.mxu1  ;;  %v1481_v39 = vpop.eup %1480  ;;  %v1157_v40 = vpack.c.bf16 %v1479_v36, %v1475_v29  ;;  %v634_v41 = vadd.f32 %v1285_v34, %v1667_v50 }
 0x11f   : > { %v698_v42 = vadd.f32 %v1333_v35, %v1667_v50  ;;  %v1197_v43 = vpack.c.bf16 %v1481_v39, %v1477_v33  ;;  %v1287_v44 = vpop.f32.mrf.mxu0 }
 0x120   : > { %v1335_v45 = vpop.f32.mrf.mxu1  ;;  %1221 = vst [vmem:[%s1683_s8 + $0x18] sm:$0xff] %v1157_v40   ;;  %1494 = vtanh.f32 %v634_v41  ;;  %v1288_v46 = vadd.f32 %v1287_v44, %v1286_v37 }
 0x121   : > { %v1336_v47 = vadd.f32 %v1335_v45, %v1334_v38  ;;  %1229 = vst [vmem:[%s1683_s8 + $0x58] sm:$0xff] %v1197_v43   ;;  %1496 = vtanh.f32 %v698_v42  ;;  %v1289_v48 = vpop.f32.mrf.mxu0  ;;  %v1483_v52 = vpop.eup %1482 }
 0x122   : > { %v1337_v49 = vpop.f32.mrf.mxu1  ;;  %v639_v51 = vadd.f32 %v1288_v46, %v1667_v50  ;;  %v1485_v56 = vpop.eup %1484 }
 0x123   : > { %v703_v53 = vadd.f32 %v1336_v47, %v1667_v50  ;;  %v1290_v54 = vpop.f32.mrf.mxu0 }
 0x124   : > { %v1338_v55 = vpop.f32.mrf.mxu1  ;;  %v1291_v57 = vadd.f32 %v1290_v54, %v1289_v48  ;;  %1498 = vtanh.f32 %v639_v51 }
 0x125   : > { %v1339_v58 = vadd.f32 %v1338_v55, %v1337_v49  ;;  %v1487_v59 = vpop.eup %1486  ;;  %v1292_v60 = vpop.f32.mrf.mxu0  ;;  %1500 = vtanh.f32 %v703_v53 }
 0x126   : > { %v1340_v61 = vpop.f32.mrf.mxu1  ;;  %v1489_v62 = vpop.eup %1488  ;;  %v1162_v63 = vpack.c.bf16 %v1487_v59, %v1483_v52  ;;  %v642_v0 = vadd.f32 %v1291_v57, %v1667_v50 }
 0x127   : > { %v706_v1 = vadd.f32 %v1339_v58, %v1667_v50  ;;  %v1202_v2 = vpack.c.bf16 %v1489_v62, %v1485_v56  ;;  %v1293_v3 = vpop.f32.mrf.mxu0 }
 0x128   : > { %v1341_v4 = vpop.f32.mrf.mxu1  ;;  %1222 = vst [vmem:[%s1683_s8 + $0x20] sm:$0xff] %v1162_v63   ;;  %1502 = vtanh.f32 %v642_v0  ;;  %v1294_v5 = vadd.f32 %v1293_v3, %v1292_v60 }
 0x129   : > { %v1342_v6 = vadd.f32 %v1341_v4, %v1340_v61  ;;  %1230 = vst [vmem:[%s1683_s8 + $0x60] sm:$0xff] %v1202_v2   ;;  %1504 = vtanh.f32 %v706_v1  ;;  %v1295_v7 = vpop.f32.mrf.mxu0  ;;  %v1491_v10 = vpop.eup %1490 }
 0x12a   : > { %v1343_v8 = vpop.f32.mrf.mxu1  ;;  %v647_v9 = vadd.f32 %v1294_v5, %v1667_v50  ;;  %v1493_v14 = vpop.eup %1492 }
 0x12b   : > { %v711_v11 = vadd.f32 %v1342_v6, %v1667_v50  ;;  %v1296_v12 = vpop.f32.mrf.mxu0 }
 0x12c   : > { %v1344_v13 = vpop.f32.mrf.mxu1  ;;  %v1297_v15 = vadd.f32 %v1296_v12, %v1295_v7  ;;  %1506 = vtanh.f32 %v647_v9 }
 0x12d   : > { %v1345_v16 = vadd.f32 %v1344_v13, %v1343_v8  ;;  %v1495_v17 = vpop.eup %1494  ;;  %1508 = vtanh.f32 %v711_v11 }
 0x12e   : > { %v1497_v18 = vpop.eup %1496  ;;  %v1167_v19 = vpack.c.bf16 %v1495_v17, %v1491_v10  ;;  %v650_v20 = vadd.f32 %v1297_v15, %v1667_v50 }
 0x12f   : > { %v714_v21 = vadd.f32 %v1345_v16, %v1667_v50  ;;  %v1207_v22 = vpack.c.bf16 %v1497_v18, %v1493_v14 }
 0x130   : > { %1223 = vst [vmem:[%s1683_s8 + $0x28] sm:$0xff] %v1167_v19   ;;  %1510 = vtanh.f32 %v650_v20 }
 0x131   : > { %1231 = vst [vmem:[%s1683_s8 + $0x68] sm:$0xff] %v1207_v22   ;;  %1512 = vtanh.f32 %v714_v21  ;;  %v1499_v23 = vpop.eup %1498 }
 0x132   : > { %v1501_v24 = vpop.eup %1500 }
 0x135   : > { %v1503_v25 = vpop.eup %1502 }
 0x136   : > { %v1505_v26 = vpop.eup %1504  ;;  %v1172_v27 = vpack.c.bf16 %v1503_v25, %v1499_v23 }
 0x137   : > { %v1212_v28 = vpack.c.bf16 %v1505_v26, %v1501_v24 }
 0x138   : > { %1224 = vst [vmem:[%s1683_s8 + $0x30] sm:$0xff] %v1172_v27  }
 0x139   : > { %1232 = vst [vmem:[%s1683_s8 + $0x70] sm:$0xff] %v1212_v28   ;;  %v1507_v29 = vpop.eup %1506 }
 0x13a   : > { %v1509_v30 = vpop.eup %1508 }
 0x13d   : > { %v1511_v31 = vpop.eup %1510 }
 0x13e   : > { %v1513_v50 = vpop.eup %1512  ;;  %v1177_v32 = vpack.c.bf16 %v1511_v31, %v1507_v29 }
 0x13f   : > { %v1217_v33 = vpack.c.bf16 %v1513_v50, %v1509_v30 }
 0x140   : > { %1225 = vst [vmem:[%s1683_s8 + $0x38] sm:$0xff] %v1177_v32  }
 0x141   : > { %1233 = vst [vmem:[%s1683_s8 + $0x78] sm:$0xff] %v1217_v33  }
 0x142 PF: > { %s13_s14 = sadd.s32 1, %s1536_s14   ;;  %s1736_s12 = smov %s1532_s13 }
 0x143   : > { %p10_p5 = scmp.ge.s32.totalorder %s13_s14, 4   ;;  %s1737_s13 = smov %s1739_s15 }
 0x145   :  { %12 = sbr.rel (!%p10_p5) target bundleno = 2 (0x2), region = 68 }

</bundles_post_ra>
